<compile_context>
chip_gen: v5e
topology: v5e:2x2
jax: 0.10.0
libtpu: 0.0.40
codegen_flags: <defaults>
</compile_context>

<pallas_src>
import functools

import jax
import jax.numpy as jnp
from jax import lax
from jax.experimental import pallas as pl
from jax.experimental.pallas import tpu as pltpu


# ----------------------------------------------------------------------------
# Fused kernel.  grid = (B, N//TQ, N//TKV), kv axis innermost.
#   xq_ref : (1, TQ,  D)    bf16  query-side x tile        (block idx: b, qi)
#   xkv_ref: (1, TKV, D)    bf16  key/value-side x tile    (block idx: b, kj; frozen for qi>0 when caching)
#   wq_ref : (D, H*C)       bf16  q projection weight      (resident)
#   wkv_ref: (D, 2*H*C)     bf16  fused k|v projection     (resident)
#   wo_ref : (H*C, D)       bf16  output projection weight (resident)
#   bo_ref : (1, D)         f32   output projection bias   (resident)
#   o_ref  : (1, TQ, D)     f32   final output tile        (written at last kj)
# scratch (persists across the whole grid):
#   q_s    : (TQ, H*C)      bf16  scaled queries for the current q-tile
#   m_s    : (TQ, H)        f32   running row max, one column per head
#   l_s    : (TQ, H)        f32   running row sum, one column per head
#   acc_s  : (TQ, H*C)      f32   unnormalized attention output (lane slab)
#   kv_s   : (N, 2*H*C)     bf16  whole-sequence projected K|V cache (optional)
# ----------------------------------------------------------------------------
def _fused_attn_kernel(xq_ref, xkv_ref, wq_ref, wkv_ref, wo_ref, bo_ref,
                       o_ref, q_s, m_s, l_s, acc_s, *maybe_cache,
                       scale, heads, dim_head, block_kv, cache_kv, bf16_exp):
    kj = pl.program_id(2)
    n_kv = pl.num_programs(2)
    H, C = heads, dim_head
    HC = H * C

    @pl.when(kj == 0)
    def _init():
        # Q projection once per (b, q-tile), full H*C wide, scale folded in.
        q = jnp.dot(xq_ref[0], wq_ref[...],
                    preferred_element_type=jnp.float32)          # (TQ, H*C) f32
        q_s[...] = (q * scale).astype(jnp.bfloat16)
        m_s[...] = jnp.full_like(m_s, -jnp.inf)
        l_s[...] = jnp.zeros_like(l_s)
        acc_s[...] = jnp.zeros_like(acc_s)

    # --- K|V for this kv tile: one fused (TKV, 2*H*C) projection. ------------
    if cache_kv:
        kv_s = maybe_cache[0]
        qi = pl.program_id(1)
        row = pl.multiple_of(kj * block_kv, block_kv)

        @pl.when(qi == 0)
        def _fill_cache():
            kv = jnp.dot(xkv_ref[0], wkv_ref[...],
                         preferred_element_type=jnp.float32)     # (TKV, 2HC) f32
            kv_s[pl.ds(row, block_kv), :] = kv.astype(jnp.bfloat16)

        kv16 = kv_s[pl.ds(row, block_kv), :]                     # (TKV, 2HC) bf16
    else:
        kv = jnp.dot(xkv_ref[0], wkv_ref[...],
                     preferred_element_type=jnp.float32)
        kv16 = kv.astype(jnp.bfloat16)

    q16 = q_s[...]                                               # (TQ, H*C) bf16

    # Online-softmax update, statically unrolled over heads (H is small).
    for g in range(H):
        sl = slice(g * C, (g + 1) * C)
        q_g = q16[:, sl]                                         # (TQ, C)
        k_g = kv16[:, sl]                                        # (TKV, C)
        v_g = kv16[:, HC + g * C: HC + (g + 1) * C]              # (TKV, C)

        # q @ k^T without materializing a transpose: contract last dims.
        sim = lax.dot_general(q_g, k_g, (((1,), (1,)), ((), ())),
                              preferred_element_type=jnp.float32)  # (TQ, TKV) f32

        m_prev = m_s[:, g:g + 1]                                 # (TQ, 1) f32
        m_new = jnp.maximum(m_prev, jnp.max(sim, axis=-1, keepdims=True))
        alpha = jnp.exp(m_prev - m_new)                          # (TQ, 1) f32
        arg = sim - m_new
        if bf16_exp:
            # EUP-bound config on v6e/v7x: bf16 exp, stats stay f32.
            p16 = jnp.exp(arg.astype(jnp.bfloat16))              # (TQ, TKV) bf16
            p_sum = jnp.sum(p16.astype(jnp.float32), axis=-1, keepdims=True)
        else:
            p32 = jnp.exp(arg)
            p16 = p32.astype(jnp.bfloat16)
            p_sum = jnp.sum(p32, axis=-1, keepdims=True)

        l_s[:, g:g + 1] = alpha * l_s[:, g:g + 1] + p_sum
        acc_s[:, sl] = alpha * acc_s[:, sl] + jnp.dot(
            p16, v_g, preferred_element_type=jnp.float32)
        m_s[:, g:g + 1] = m_new

    @pl.when(kj == n_kv - 1)
    def _finalize():
        # Normalize per head (EUP reciprocal), then fused output projection.
        inv = pl.reciprocal(l_s[...], approx=True)               # (TQ, H) f32
        for g in range(H):
            sl = slice(g * C, (g + 1) * C)
            acc_s[:, sl] = acc_s[:, sl] * inv[:, g:g + 1]
        merged = acc_s[...].astype(jnp.bfloat16)                 # (TQ, H*C)
        y = jnp.dot(merged, wo_ref[...], preferred_element_type=jnp.float32)
        y = y + bo_ref[...]                                      # (1, D) broadcast
        o_ref[0] = y.astype(o_ref.dtype)


def _pick_block(n, requested):
    """Largest b <= requested with n % b == 0 and (b % 8 == 0 or b == n)."""
    b = min(requested, n)
    while b > 0:
        if n % b == 0 and (b % 8 == 0 or b == n):
            return b
        b -= 1
    return n


def self_attention_forward(x, params, *, heads, dim_head,
                           block_q=None, block_kv=None,
                           bf16_exp=True, kv_cache_max_bytes=8 * 1024 * 1024):
    """x: (B, N, D) float32.  params: dict of weights (see init_params)."""
    B, N, D = x.shape
    H, C = heads, dim_head
    HC = H * C
    scale = float(dim_head) ** (-0.5)

    # Larger default tiles per the perf review; for short sequences take the
    # whole KV axis in one tile (single-pass softmax).
    block_q = _pick_block(N, 256 if block_q is None else block_q)
    if block_kv is None:
        block_kv = N if N <= 1024 else 512
    block_kv = _pick_block(N, block_kv)
    n_q, n_kv = N // block_q, N // block_kv

    # Whole-sequence projected K/V cache in VMEM scratch (only useful when the
    # kv loop is revisited by >1 q-tiles and the cache fits a modest budget).
    cache_bytes = N * 2 * HC * 2
    cache_kv = (n_q > 1) and (cache_bytes <= kv_cache_max_bytes)

    # One-time downcast of matmul operands to bf16 (f32 accumulation in-kernel);
    # Wk and Wv fused into a single (D, 2*H*C) weight (128-lane-wide output for
    # the small-head config, one matmul per kv step instead of two).
    x_bf = x.astype(jnp.bfloat16)
    wq = params["wq"].astype(jnp.bfloat16)
    wkv = jnp.concatenate([params["wk"], params["wv"]], axis=1).astype(jnp.bfloat16)
    wo = params["wo"].astype(jnp.bfloat16)
    bo = params["bo"].astype(jnp.float32)

    grid = (B, n_q, n_kv)

    if cache_kv:
        # Freeze the kv-side x block index for qi > 0: the tile is neither
        # re-fetched from HBM nor re-projected (kernel reads the VMEM cache).
        xkv_map = lambda b, qi, kj: (b, jnp.where(qi == 0, kj, 0), 0)
        # Scratch (the cache) is per-core: only the batch axis may shard across
        # TensorCores (v7x); the q-tile axis must stay sequential per core.
        dim_sem = ("parallel", "arbitrary", "arbitrary")
    else:
        xkv_map = lambda b, qi, kj: (b, kj, 0)
        dim_sem = ("parallel", "parallel", "arbitrary")

    scratch_shapes = [
        pltpu.VMEM((block_q, HC), jnp.bfloat16),      # q_s
        pltpu.VMEM((block_q, H), jnp.float32),        # m_s
        pltpu.VMEM((block_q, H), jnp.float32),        # l_s
        pltpu.VMEM((block_q, HC), jnp.float32),       # acc_s
    ]
    if cache_kv:
        scratch_shapes.append(pltpu.VMEM((N, 2 * HC), jnp.bfloat16))  # kv_s

    kernel = functools.partial(
        _fused_attn_kernel, scale=scale, heads=H, dim_head=C,
        block_kv=block_kv, cache_kv=cache_kv, bf16_exp=bf16_exp)

    out = pl.pallas_call(
        kernel,
        out_shape=jax.ShapeDtypeStruct((B, N, D), jnp.float32),
        grid=grid,
        in_specs=[
            pl.BlockSpec((1, block_q, D), lambda b, qi, kj: (b, qi, 0)),   # x (q side)
            pl.BlockSpec((1, block_kv, D), xkv_map),                       # x (kv side)
            pl.BlockSpec((D, HC), lambda b, qi, kj: (0, 0)),               # Wq
            pl.BlockSpec((D, 2 * HC), lambda b, qi, kj: (0, 0)),           # W[k|v]
            pl.BlockSpec((HC, D), lambda b, qi, kj: (0, 0)),               # Wo
            pl.BlockSpec((1, D), lambda b, qi, kj: (0, 0)),                # bo
        ],
        out_specs=pl.BlockSpec((1, block_q, D), lambda b, qi, kj: (b, qi, 0)),
        scratch_shapes=scratch_shapes,
        compiler_params=pltpu.CompilerParams(dimension_semantics=dim_sem),
    )(x_bf, x_bf, wq, wkv, wo, bo)
    return out


def reference_forward(x, params, *, heads, dim_head):
    """Pure-JAX f32 re-implementation of forward_plain for verification."""
    B, N, D = x.shape
    H, C = heads, dim_head
    scale = float(dim_head) ** (-0.5)
    q = x @ params["wq"]
    k = x @ params["wk"]
    v = x @ params["wv"]

    def split(t):
        return jnp.transpose(t.reshape(B, N, H, C), (0, 2, 1, 3)).reshape(B * H, N, C)

    q, k, v = split(q), split(k), split(v)
    sim = jnp.einsum("bic,bjc->bij", q, k) * scale
    attn = jax.nn.softmax(sim, axis=-1)
    out = jnp.einsum("bij,bjc->bic", attn, v)
    out = jnp.transpose(out.reshape(B, H, N, C), (0, 2, 1, 3)).reshape(B, N, H * C)
    return out @ params["wo"] + params["bo"][0]


def init_params(key, query_dim, heads, dim_head):
    inner_dim = heads * dim_head
    k1, k2, k3, k4, k5 = jax.random.split(key, 5)
    s = 1.0 / jnp.sqrt(query_dim)
    so = 1.0 / jnp.sqrt(inner_dim)
    return {
        # Stored already-transposed relative to torch Linear.weight (out, in):
        "wq": jax.random.uniform(k1, (query_dim, inner_dim), jnp.float32, -s, s),
        "wk": jax.random.uniform(k2, (query_dim, inner_dim), jnp.float32, -s, s),
        "wv": jax.random.uniform(k3, (query_dim, inner_dim), jnp.float32, -s, s),
        "wo": jax.random.uniform(k4, (inner_dim, query_dim), jnp.float32, -so, so),
        "bo": jax.random.uniform(k5, (1, query_dim), jnp.float32, -so, so),
    }


if __name__ == "__main__":
    # Small but tiling-exercising shapes.
    B, N, QUERY_DIM = 2, 256, 32
    HEADS, DIM_HEAD = 4, 16

    key = jax.random.PRNGKey(0)
    kx, kp = jax.random.split(key)
    x = jax.random.normal(kx, (B, N, QUERY_DIM), dtype=jnp.float32)
    params = init_params(kp, QUERY_DIM, HEADS, DIM_HEAD)

    ref = reference_forward(x, params, heads=HEADS, dim_head=DIM_HEAD)

    # 1) Multi-tile path: 2 q-tiles x 4 kv-tiles -> exercises online softmax,
    #    the fused K|V projection and the whole-sequence VMEM K/V cache.
    out_tiled = self_attention_forward(x, params, heads=HEADS, dim_head=DIM_HEAD,
                                       block_q=128, block_kv=64)
    out_tiled = jax.block_until_ready(out_tiled)
    assert out_tiled.shape == (B, N, QUERY_DIM)
    err_t = float(jnp.max(jnp.abs(out_tiled - ref)))
    # bf16 matmul operands + bf16 exp + approx reciprocal -> relaxed tolerance.
    assert jnp.allclose(out_tiled, ref, rtol=3e-2, atol=3e-2), \
        f"tiled path mismatch vs reference (max abs err {err_t})"

    # 2) Default large-tile path: block_kv == N -> single-pass softmax, no cache.
    out_full = self_attention_forward(x, params, heads=HEADS, dim_head=DIM_HEAD)
    out_full = jax.block_until_ready(out_full)
    err_f = float(jnp.max(jnp.abs(out_full - ref)))
    assert jnp.allclose(out_full, ref, rtol=3e-2, atol=3e-2), \
        f"default path mismatch vs reference (max abs err {err_f})"

    print("KERNEL_OK")
</pallas_src>

<mosaic_0001>
module attributes {stable_mosaic.version = 11 : i64} {
  func.func @_fused_attn_kernel(%arg0: i32, %arg1: i32, %arg2: i32, %arg3: memref<1x128x32xbf16, #tpu.memory_space<vmem>>, %arg4: memref<1x64x32xbf16, #tpu.memory_space<vmem>>, %arg5: memref<32x64xbf16, #tpu.memory_space<vmem>>, %arg6: memref<32x128xbf16, #tpu.memory_space<vmem>>, %arg7: memref<64x32xbf16, #tpu.memory_space<vmem>>, %arg8: memref<1x32xf32, #tpu.memory_space<vmem>>, %arg9: memref<1x128x32xf32, #tpu.memory_space<vmem>>, %arg10: memref<128x64xbf16, #tpu.memory_space<vmem>>, %arg11: memref<128x4xf32, #tpu.memory_space<vmem>>, %arg12: memref<128x4xf32, #tpu.memory_space<vmem>>, %arg13: memref<128x64xf32, #tpu.memory_space<vmem>>, %arg14: memref<256x128xbf16, #tpu.memory_space<vmem>>) attributes {dimension_semantics = [#tpu.dimension_semantics<parallel>, #tpu.dimension_semantics<arbitrary>, #tpu.dimension_semantics<arbitrary>], iteration_bounds = array<i64: 2, 2, 4>, scalar_prefetch = 0 : i64, scratch_operands = 5 : i64, tpu.core_type = #tpu.core_type<tc>, window_params = [{transform_indices = @transform_0, window_bounds = array<i64: 1, 128, 32>}, {transform_indices = @transform_1, window_bounds = array<i64: 1, 64, 32>}, {pipeline_mode = #tpu.pipeline_mode<synchronous>, transform_indices = @transform_2, window_bounds = array<i64: 32, 64>}, {pipeline_mode = #tpu.pipeline_mode<synchronous>, transform_indices = @transform_3, window_bounds = array<i64: 32, 128>}, {pipeline_mode = #tpu.pipeline_mode<synchronous>, transform_indices = @transform_4, window_bounds = array<i64: 64, 32>}, {pipeline_mode = #tpu.pipeline_mode<synchronous>, transform_indices = @transform_5, window_bounds = array<i64: 1, 32>}, {transform_indices = @transform_6, window_bounds = array<i64: 1, 128, 32>}]} {
    %c0_i32 = arith.constant 0 : i32
    %0 = arith.cmpi eq, %arg2, %c0_i32 : i32
    %1 = arith.extui %0 : i1 to i32
    %c0_i32_0 = arith.constant 0 : i32
    %2 = arith.cmpi ne, %1, %c0_i32_0 : i32
    scf.if %2 {
      %c0_63 = arith.constant 0 : index
      %c0_64 = arith.constant 0 : index
      %c0_65 = arith.constant 0 : index
      %126 = vector.load %arg3[%c0_63, %c0_64, %c0_65] : memref<1x128x32xbf16, #tpu.memory_space<vmem>>, vector<1x128x32xbf16>
      %127 = vector.shape_cast %126 : vector<1x128x32xbf16> to vector<128x32xbf16>
      %c0_66 = arith.constant 0 : index
      %c0_67 = arith.constant 0 : index
      %128 = vector.load %arg5[%c0_66, %c0_67] : memref<32x64xbf16, #tpu.memory_space<vmem>>, vector<32x64xbf16>
      %cst_68 = arith.constant dense<0.000000e+00> : vector<128x64xf32>
      %129 = tpu.matmul %127, %128, %cst_68 {dimension_numbers = #tpu.dot_dimension_numbers<[1], [0], [0], [1], [0, 0, 1, 1], [], []>} : vector<128x32xbf16>, vector<32x64xbf16>, vector<128x64xf32> -> vector<128x64xf32>
      %cst_69 = arith.constant 2.500000e-01 : f32
      %130 = vector.broadcast %cst_69 : f32 to vector<128x64xf32>
      %131 = arith.mulf %129, %130 : vector<128x64xf32>
      %132 = arith.truncf %131 : vector<128x64xf32> to vector<128x64xbf16>
      %c0_70 = arith.constant 0 : index
      %c0_71 = arith.constant 0 : index
      %133 = vector.load %arg10[%c0_70, %c0_71] : memref<128x64xbf16, #tpu.memory_space<vmem>>, vector<128x64xbf16>
      tpu.vector_store %arg10[%c0_70, %c0_71], %132 {strides = array<i32>} : memref<128x64xbf16, #tpu.memory_space<vmem>>, vector<128x64xbf16>,
      %cst_72 = arith.constant 0xFF800000 : f32
      %134 = vector.broadcast %cst_72 : f32 to vector<128x4xf32>
      %c0_73 = arith.constant 0 : index
      %c0_74 = arith.constant 0 : index
      %135 = vector.load %arg11[%c0_73, %c0_74] : memref<128x4xf32, #tpu.memory_space<vmem>>, vector<128x4xf32>
      tpu.vector_store %arg11[%c0_73, %c0_74], %134 {strides = array<i32>} : memref<128x4xf32, #tpu.memory_space<vmem>>, vector<128x4xf32>,
      %cst_75 = arith.constant 0.000000e+00 : f32
      %136 = vector.broadcast %cst_75 : f32 to vector<128x4xf32>
      %c0_76 = arith.constant 0 : index
      %c0_77 = arith.constant 0 : index
      %137 = vector.load %arg12[%c0_76, %c0_77] : memref<128x4xf32, #tpu.memory_space<vmem>>, vector<128x4xf32>
      tpu.vector_store %arg12[%c0_76, %c0_77], %136 {strides = array<i32>} : memref<128x4xf32, #tpu.memory_space<vmem>>, vector<128x4xf32>,
      %cst_78 = arith.constant 0.000000e+00 : f32
      %138 = vector.broadcast %cst_78 : f32 to vector<128x64xf32>
      %c0_79 = arith.constant 0 : index
      %c0_80 = arith.constant 0 : index
      %139 = vector.load %arg13[%c0_79, %c0_80] : memref<128x64xf32, #tpu.memory_space<vmem>>, vector<128x64xf32>
      tpu.vector_store %arg13[%c0_79, %c0_80], %138 {strides = array<i32>} : memref<128x64xf32, #tpu.memory_space<vmem>>, vector<128x64xf32>,
    } else {
    }
    %c64_i32 = arith.constant 64 : i32
    %3 = arith.muli %arg2, %c64_i32 : i32
    %4 = tpu.assume_multiple %3, 64 : i32
    %c0_i32_1 = arith.constant 0 : i32
    %5 = arith.cmpi eq, %arg1, %c0_i32_1 : i32
    %6 = arith.extui %5 : i1 to i32
    %c0_i32_2 = arith.constant 0 : i32
    %7 = arith.cmpi ne, %6, %c0_i32_2 : i32
    scf.if %7 {
      %c0_63 = arith.constant 0 : index
      %c0_64 = arith.constant 0 : index
      %c0_65 = arith.constant 0 : index
      %126 = vector.load %arg4[%c0_63, %c0_64, %c0_65] : memref<1x64x32xbf16, #tpu.memory_space<vmem>>, vector<1x64x32xbf16>
      %127 = vector.shape_cast %126 : vector<1x64x32xbf16> to vector<64x32xbf16>
      %c0_66 = arith.constant 0 : index
      %c0_67 = arith.constant 0 : index
      %128 = vector.load %arg6[%c0_66, %c0_67] : memref<32x128xbf16, #tpu.memory_space<vmem>>, vector<32x128xbf16>
      %cst_68 = arith.constant dense<0.000000e+00> : vector<64x128xf32>
      %129 = tpu.matmul %127, %128, %cst_68 {dimension_numbers = #tpu.dot_dimension_numbers<[1], [0], [0], [1], [0, 0, 1, 1], [], []>} : vector<64x32xbf16>, vector<32x128xbf16>, vector<64x128xf32> -> vector<64x128xf32>
      %130 = arith.truncf %129 : vector<64x128xf32> to vector<64x128xbf16>
      %131 = arith.index_cast %4 : i32 to index
      %c0_69 = arith.constant 0 : index
      %132 = vector.load %arg14[%131, %c0_69] : memref<256x128xbf16, #tpu.memory_space<vmem>>, vector<64x128xbf16>
      tpu.vector_store %arg14[%131, %c0_69], %130 {strides = array<i32>} : memref<256x128xbf16, #tpu.memory_space<vmem>>, vector<64x128xbf16>,
    } else {
    }
    %8 = arith.index_cast %4 : i32 to index
    %c0 = arith.constant 0 : index
    %9 = vector.load %arg14[%8, %c0] : memref<256x128xbf16, #tpu.memory_space<vmem>>, vector<64x128xbf16>
    %c0_3 = arith.constant 0 : index
    %c0_4 = arith.constant 0 : index
    %10 = vector.load %arg10[%c0_3, %c0_4] : memref<128x64xbf16, #tpu.memory_space<vmem>>, vector<128x64xbf16>
    %11 = vector.extract_strided_slice %10 {offsets = [0, 0], sizes = [128, 16], strides = [1, 1]} : vector<128x64xbf16> to vector<128x16xbf16>
    %12 = vector.extract_strided_slice %9 {offsets = [0, 0], sizes = [64, 16], strides = [1, 1]} : vector<64x128xbf16> to vector<64x16xbf16>
    %13 = vector.extract_strided_slice %9 {offsets = [0, 64], sizes = [64, 16], strides = [1, 1]} : vector<64x128xbf16> to vector<64x16xbf16>
    %cst = arith.constant dense<0.000000e+00> : vector<128x64xf32>
    %14 = tpu.matmul %11, %12, %cst {dimension_numbers = #tpu.dot_dimension_numbers<[1], [1], [0], [0], [0, 0, 1, 0], [], []>} : vector<128x16xbf16>, vector<64x16xbf16>, vector<128x64xf32> -> vector<128x64xf32>
    %c0_5 = arith.constant 0 : index
    %c0_6 = arith.constant 0 : index
    %15 = vector.load %arg11[%c0_5, %c0_6] : memref<128x4xf32, #tpu.memory_space<vmem>>, vector<128x1xf32>
    %cst_7 = arith.constant dense<0xFF800000> : vector<128xf32>
    %16 = vector.multi_reduction <maximumf>, %14, %cst_7 [1] : vector<128x64xf32> to vector<128xf32>
    %17 = vector.shape_cast %16 : vector<128xf32> to vector<128x1xf32>
    %18 = arith.maximumf %15, %17 : vector<128x1xf32>
    %19 = arith.subf %15, %18 : vector<128x1xf32>
    %20 = math.exp %19 : vector<128x1xf32>
    %21 = vector.broadcast %18 : vector<128x1xf32> to vector<128x64xf32>
    %22 = arith.subf %14, %21 : vector<128x64xf32>
    %23 = arith.truncf %22 : vector<128x64xf32> to vector<128x64xbf16>
    %24 = math.exp %23 : vector<128x64xbf16>
    %25 = arith.extf %24 : vector<128x64xbf16> to vector<128x64xf32>
    %cst_8 = arith.constant dense<0.000000e+00> : vector<128xf32>
    %26 = vector.multi_reduction <add>, %25, %cst_8 [1] : vector<128x64xf32> to vector<128xf32>
    %27 = vector.shape_cast %26 : vector<128xf32> to vector<128x1xf32>
    %c0_9 = arith.constant 0 : index
    %c0_10 = arith.constant 0 : index
    %28 = vector.load %arg12[%c0_9, %c0_10] : memref<128x4xf32, #tpu.memory_space<vmem>>, vector<128x1xf32>
    %29 = arith.mulf %20, %28 : vector<128x1xf32>
    %30 = arith.addf %29, %27 : vector<128x1xf32>
    %c0_11 = arith.constant 0 : index
    %c0_12 = arith.constant 0 : index
    %31 = vector.load %arg12[%c0_11, %c0_12] : memref<128x4xf32, #tpu.memory_space<vmem>>, vector<128x1xf32>
    tpu.vector_store %arg12[%c0_11, %c0_12], %30 {strides = array<i32>} : memref<128x4xf32, #tpu.memory_space<vmem>>, vector<128x1xf32>,
    %c0_13 = arith.constant 0 : index
    %c0_14 = arith.constant 0 : index
    %32 = vector.load %arg13[%c0_13, %c0_14] : memref<128x64xf32, #tpu.memory_space<vmem>>, vector<128x16xf32>
    %33 = vector.broadcast %20 : vector<128x1xf32> to vector<128x16xf32>
    %34 = arith.mulf %33, %32 : vector<128x16xf32>
    %cst_15 = arith.constant dense<0.000000e+00> : vector<128x16xf32>
    %35 = tpu.matmul %24, %13, %cst_15 {dimension_numbers = #tpu.dot_dimension_numbers<[1], [0], [0], [1], [0, 0, 1, 1], [], []>} : vector<128x64xbf16>, vector<64x16xbf16>, vector<128x16xf32> -> vector<128x16xf32>
    %36 = arith.addf %34, %35 : vector<128x16xf32>
    %c0_16 = arith.constant 0 : index
    %c0_17 = arith.constant 0 : index
    %37 = vector.load %arg13[%c0_16, %c0_17] : memref<128x64xf32, #tpu.memory_space<vmem>>, vector<128x16xf32>
    tpu.vector_store %arg13[%c0_16, %c0_17], %36 {strides = array<i32>} : memref<128x64xf32, #tpu.memory_space<vmem>>, vector<128x16xf32>,
    %c0_18 = arith.constant 0 : index
    %c0_19 = arith.constant 0 : index
    %38 = vector.load %arg11[%c0_18, %c0_19] : memref<128x4xf32, #tpu.memory_space<vmem>>, vector<128x1xf32>
    tpu.vector_store %arg11[%c0_18, %c0_19], %18 {strides = array<i32>} : memref<128x4xf32, #tpu.memory_space<vmem>>, vector<128x1xf32>,
    %39 = vector.extract_strided_slice %10 {offsets = [0, 16], sizes = [128, 16], strides = [1, 1]} : vector<128x64xbf16> to vector<128x16xbf16>
    %40 = vector.extract_strided_slice %9 {offsets = [0, 16], sizes = [64, 16], strides = [1, 1]} : vector<64x128xbf16> to vector<64x16xbf16>
    %41 = vector.extract_strided_slice %9 {offsets = [0, 80], sizes = [64, 16], strides = [1, 1]} : vector<64x128xbf16> to vector<64x16xbf16>
    %cst_20 = arith.constant dense<0.000000e+00> : vector<128x64xf32>
    %42 = tpu.matmul %39, %40, %cst_20 {dimension_numbers = #tpu.dot_dimension_numbers<[1], [1], [0], [0], [0, 0, 1, 0], [], []>} : vector<128x16xbf16>, vector<64x16xbf16>, vector<128x64xf32> -> vector<128x64xf32>
    %c0_21 = arith.constant 0 : index
    %c1 = arith.constant 1 : index
    %43 = vector.load %arg11[%c0_21, %c1] : memref<128x4xf32, #tpu.memory_space<vmem>>, vector<128x1xf32>
    %cst_22 = arith.constant dense<0xFF800000> : vector<128xf32>
    %44 = vector.multi_reduction <maximumf>, %42, %cst_22 [1] : vector<128x64xf32> to vector<128xf32>
    %45 = vector.shape_cast %44 : vector<128xf32> to vector<128x1xf32>
    %46 = arith.maximumf %43, %45 : vector<128x1xf32>
    %47 = arith.subf %43, %46 : vector<128x1xf32>
    %48 = math.exp %47 : vector<128x1xf32>
    %49 = vector.broadcast %46 : vector<128x1xf32> to vector<128x64xf32>
    %50 = arith.subf %42, %49 : vector<128x64xf32>
    %51 = arith.truncf %50 : vector<128x64xf32> to vector<128x64xbf16>
    %52 = math.exp %51 : vector<128x64xbf16>
    %53 = arith.extf %52 : vector<128x64xbf16> to vector<128x64xf32>
    %cst_23 = arith.constant dense<0.000000e+00> : vector<128xf32>
    %54 = vector.multi_reduction <add>, %53, %cst_23 [1] : vector<128x64xf32> to vector<128xf32>
    %55 = vector.shape_cast %54 : vector<128xf32> to vector<128x1xf32>
    %c0_24 = arith.constant 0 : index
    %c1_25 = arith.constant 1 : index
    %56 = vector.load %arg12[%c0_24, %c1_25] : memref<128x4xf32, #tpu.memory_space<vmem>>, vector<128x1xf32>
    %57 = arith.mulf %48, %56 : vector<128x1xf32>
    %58 = arith.addf %57, %55 : vector<128x1xf32>
    %c0_26 = arith.constant 0 : index
    %c1_27 = arith.constant 1 : index
    %59 = vector.load %arg12[%c0_26, %c1_27] : memref<128x4xf32, #tpu.memory_space<vmem>>, vector<128x1xf32>
    tpu.vector_store %arg12[%c0_26, %c1_27], %58 {strides = array<i32>} : memref<128x4xf32, #tpu.memory_space<vmem>>, vector<128x1xf32>,
    %c0_28 = arith.constant 0 : index
    %c16 = arith.constant 16 : index
    %60 = vector.load %arg13[%c0_28, %c16] : memref<128x64xf32, #tpu.memory_space<vmem>>, vector<128x16xf32>
    %61 = vector.broadcast %48 : vector<128x1xf32> to vector<128x16xf32>
    %62 = arith.mulf %61, %60 : vector<128x16xf32>
    %cst_29 = arith.constant dense<0.000000e+00> : vector<128x16xf32>
    %63 = tpu.matmul %52, %41, %cst_29 {dimension_numbers = #tpu.dot_dimension_numbers<[1], [0], [0], [1], [0, 0, 1, 1], [], []>} : vector<128x64xbf16>, vector<64x16xbf16>, vector<128x16xf32> -> vector<128x16xf32>
    %64 = arith.addf %62, %63 : vector<128x16xf32>
    %c0_30 = arith.constant 0 : index
    %c16_31 = arith.constant 16 : index
    %65 = vector.load %arg13[%c0_30, %c16_31] : memref<128x64xf32, #tpu.memory_space<vmem>>, vector<128x16xf32>
    tpu.vector_store %arg13[%c0_30, %c16_31], %64 {strides = array<i32>} : memref<128x64xf32, #tpu.memory_space<vmem>>, vector<128x16xf32>,
    %c0_32 = arith.constant 0 : index
    %c1_33 = arith.constant 1 : index
    %66 = vector.load %arg11[%c0_32, %c1_33] : memref<128x4xf32, #tpu.memory_space<vmem>>, vector<128x1xf32>
    tpu.vector_store %arg11[%c0_32, %c1_33], %46 {strides = array<i32>} : memref<128x4xf32, #tpu.memory_space<vmem>>, vector<128x1xf32>,
    %67 = vector.extract_strided_slice %10 {offsets = [0, 32], sizes = [128, 16], strides = [1, 1]} : vector<128x64xbf16> to vector<128x16xbf16>
    %68 = vector.extract_strided_slice %9 {offsets = [0, 32], sizes = [64, 16], strides = [1, 1]} : vector<64x128xbf16> to vector<64x16xbf16>
    %69 = vector.extract_strided_slice %9 {offsets = [0, 96], sizes = [64, 16], strides = [1, 1]} : vector<64x128xbf16> to vector<64x16xbf16>
    %cst_34 = arith.constant dense<0.000000e+00> : vector<128x64xf32>
    %70 = tpu.matmul %67, %68, %cst_34 {dimension_numbers = #tpu.dot_dimension_numbers<[1], [1], [0], [0], [0, 0, 1, 0], [], []>} : vector<128x16xbf16>, vector<64x16xbf16>, vector<128x64xf32> -> vector<128x64xf32>
    %c0_35 = arith.constant 0 : index
    %c2 = arith.constant 2 : index
    %71 = vector.load %arg11[%c0_35, %c2] : memref<128x4xf32, #tpu.memory_space<vmem>>, vector<128x1xf32>
    %cst_36 = arith.constant dense<0xFF800000> : vector<128xf32>
    %72 = vector.multi_reduction <maximumf>, %70, %cst_36 [1] : vector<128x64xf32> to vector<128xf32>
    %73 = vector.shape_cast %72 : vector<128xf32> to vector<128x1xf32>
    %74 = arith.maximumf %71, %73 : vector<128x1xf32>
    %75 = arith.subf %71, %74 : vector<128x1xf32>
    %76 = math.exp %75 : vector<128x1xf32>
    %77 = vector.broadcast %74 : vector<128x1xf32> to vector<128x64xf32>
    %78 = arith.subf %70, %77 : vector<128x64xf32>
    %79 = arith.truncf %78 : vector<128x64xf32> to vector<128x64xbf16>
    %80 = math.exp %79 : vector<128x64xbf16>
    %81 = arith.extf %80 : vector<128x64xbf16> to vector<128x64xf32>
    %cst_37 = arith.constant dense<0.000000e+00> : vector<128xf32>
    %82 = vector.multi_reduction <add>, %81, %cst_37 [1] : vector<128x64xf32> to vector<128xf32>
    %83 = vector.shape_cast %82 : vector<128xf32> to vector<128x1xf32>
    %c0_38 = arith.constant 0 : index
    %c2_39 = arith.constant 2 : index
    %84 = vector.load %arg12[%c0_38, %c2_39] : memref<128x4xf32, #tpu.memory_space<vmem>>, vector<128x1xf32>
    %85 = arith.mulf %76, %84 : vector<128x1xf32>
    %86 = arith.addf %85, %83 : vector<128x1xf32>
    %c0_40 = arith.constant 0 : index
    %c2_41 = arith.constant 2 : index
    %87 = vector.load %arg12[%c0_40, %c2_41] : memref<128x4xf32, #tpu.memory_space<vmem>>, vector<128x1xf32>
    tpu.vector_store %arg12[%c0_40, %c2_41], %86 {strides = array<i32>} : memref<128x4xf32, #tpu.memory_space<vmem>>, vector<128x1xf32>,
    %c0_42 = arith.constant 0 : index
    %c32 = arith.constant 32 : index
    %88 = vector.load %arg13[%c0_42, %c32] : memref<128x64xf32, #tpu.memory_space<vmem>>, vector<128x16xf32>
    %89 = vector.broadcast %76 : vector<128x1xf32> to vector<128x16xf32>
    %90 = arith.mulf %89, %88 : vector<128x16xf32>
    %cst_43 = arith.constant dense<0.000000e+00> : vector<128x16xf32>
    %91 = tpu.matmul %80, %69, %cst_43 {dimension_numbers = #tpu.dot_dimension_numbers<[1], [0], [0], [1], [0, 0, 1, 1], [], []>} : vector<128x64xbf16>, vector<64x16xbf16>, vector<128x16xf32> -> vector<128x16xf32>
    %92 = arith.addf %90, %91 : vector<128x16xf32>
    %c0_44 = arith.constant 0 : index
    %c32_45 = arith.constant 32 : index
    %93 = vector.load %arg13[%c0_44, %c32_45] : memref<128x64xf32, #tpu.memory_space<vmem>>, vector<128x16xf32>
    tpu.vector_store %arg13[%c0_44, %c32_45], %92 {strides = array<i32>} : memref<128x64xf32, #tpu.memory_space<vmem>>, vector<128x16xf32>,
    %c0_46 = arith.constant 0 : index
    %c2_47 = arith.constant 2 : index
    %94 = vector.load %arg11[%c0_46, %c2_47] : memref<128x4xf32, #tpu.memory_space<vmem>>, vector<128x1xf32>
    tpu.vector_store %arg11[%c0_46, %c2_47], %74 {strides = array<i32>} : memref<128x4xf32, #tpu.memory_space<vmem>>, vector<128x1xf32>,
    %95 = vector.extract_strided_slice %10 {offsets = [0, 48], sizes = [128, 16], strides = [1, 1]} : vector<128x64xbf16> to vector<128x16xbf16>
    %96 = vector.extract_strided_slice %9 {offsets = [0, 48], sizes = [64, 16], strides = [1, 1]} : vector<64x128xbf16> to vector<64x16xbf16>
    %97 = vector.extract_strided_slice %9 {offsets = [0, 112], sizes = [64, 16], strides = [1, 1]} : vector<64x128xbf16> to vector<64x16xbf16>
    %cst_48 = arith.constant dense<0.000000e+00> : vector<128x64xf32>
    %98 = tpu.matmul %95, %96, %cst_48 {dimension_numbers = #tpu.dot_dimension_numbers<[1], [1], [0], [0], [0, 0, 1, 0], [], []>} : vector<128x16xbf16>, vector<64x16xbf16>, vector<128x64xf32> -> vector<128x64xf32>
    %c0_49 = arith.constant 0 : index
    %c3 = arith.constant 3 : index
    %99 = vector.load %arg11[%c0_49, %c3] : memref<128x4xf32, #tpu.memory_space<vmem>>, vector<128x1xf32>
    %cst_50 = arith.constant dense<0xFF800000> : vector<128xf32>
    %100 = vector.multi_reduction <maximumf>, %98, %cst_50 [1] : vector<128x64xf32> to vector<128xf32>
    %101 = vector.shape_cast %100 : vector<128xf32> to vector<128x1xf32>
    %102 = arith.maximumf %99, %101 : vector<128x1xf32>
    %103 = arith.subf %99, %102 : vector<128x1xf32>
    %104 = math.exp %103 : vector<128x1xf32>
    %105 = vector.broadcast %102 : vector<128x1xf32> to vector<128x64xf32>
    %106 = arith.subf %98, %105 : vector<128x64xf32>
    %107 = arith.truncf %106 : vector<128x64xf32> to vector<128x64xbf16>
    %108 = math.exp %107 : vector<128x64xbf16>
    %109 = arith.extf %108 : vector<128x64xbf16> to vector<128x64xf32>
    %cst_51 = arith.constant dense<0.000000e+00> : vector<128xf32>
    %110 = vector.multi_reduction <add>, %109, %cst_51 [1] : vector<128x64xf32> to vector<128xf32>
    %111 = vector.shape_cast %110 : vector<128xf32> to vector<128x1xf32>
    %c0_52 = arith.constant 0 : index
    %c3_53 = arith.constant 3 : index
    %112 = vector.load %arg12[%c0_52, %c3_53] : memref<128x4xf32, #tpu.memory_space<vmem>>, vector<128x1xf32>
    %113 = arith.mulf %104, %112 : vector<128x1xf32>
    %114 = arith.addf %113, %111 : vector<128x1xf32>
    %c0_54 = arith.constant 0 : index
    %c3_55 = arith.constant 3 : index
    %115 = vector.load %arg12[%c0_54, %c3_55] : memref<128x4xf32, #tpu.memory_space<vmem>>, vector<128x1xf32>
    tpu.vector_store %arg12[%c0_54, %c3_55], %114 {strides = array<i32>} : memref<128x4xf32, #tpu.memory_space<vmem>>, vector<128x1xf32>,
    %c0_56 = arith.constant 0 : index
    %c48 = arith.constant 48 : index
    %116 = vector.load %arg13[%c0_56, %c48] : memref<128x64xf32, #tpu.memory_space<vmem>>, vector<128x16xf32>
    %117 = vector.broadcast %104 : vector<128x1xf32> to vector<128x16xf32>
    %118 = arith.mulf %117, %116 : vector<128x16xf32>
    %cst_57 = arith.constant dense<0.000000e+00> : vector<128x16xf32>
    %119 = tpu.matmul %108, %97, %cst_57 {dimension_numbers = #tpu.dot_dimension_numbers<[1], [0], [0], [1], [0, 0, 1, 1], [], []>} : vector<128x64xbf16>, vector<64x16xbf16>, vector<128x16xf32> -> vector<128x16xf32>
    %120 = arith.addf %118, %119 : vector<128x16xf32>
    %c0_58 = arith.constant 0 : index
    %c48_59 = arith.constant 48 : index
    %121 = vector.load %arg13[%c0_58, %c48_59] : memref<128x64xf32, #tpu.memory_space<vmem>>, vector<128x16xf32>
    tpu.vector_store %arg13[%c0_58, %c48_59], %120 {strides = array<i32>} : memref<128x64xf32, #tpu.memory_space<vmem>>, vector<128x16xf32>,
    %c0_60 = arith.constant 0 : index
    %c3_61 = arith.constant 3 : index
    %122 = vector.load %arg11[%c0_60, %c3_61] : memref<128x4xf32, #tpu.memory_space<vmem>>, vector<128x1xf32>
    tpu.vector_store %arg11[%c0_60, %c3_61], %102 {strides = array<i32>} : memref<128x4xf32, #tpu.memory_space<vmem>>, vector<128x1xf32>,
    %c3_i32 = arith.constant 3 : i32
    %123 = arith.cmpi eq, %arg2, %c3_i32 : i32
    %124 = arith.extui %123 : i1 to i32
    %c0_i32_62 = arith.constant 0 : i32
    %125 = arith.cmpi ne, %124, %c0_i32_62 : i32
    scf.if %125 {
      %c0_63 = arith.constant 0 : index
      %c0_64 = arith.constant 0 : index
      %126 = vector.load %arg12[%c0_63, %c0_64] : memref<128x4xf32, #tpu.memory_space<vmem>>, vector<128x4xf32>
      %127 = tpu.reciprocal %126 {approx = true} : vector<128x4xf32> -> vector<128x4xf32>
      %c0_65 = arith.constant 0 : index
      %c0_66 = arith.constant 0 : index
      %128 = vector.load %arg13[%c0_65, %c0_66] : memref<128x64xf32, #tpu.memory_space<vmem>>, vector<128x16xf32>
      %129 = vector.extract_strided_slice %127 {offsets = [0, 0], sizes = [128, 1], strides = [1, 1]} : vector<128x4xf32> to vector<128x1xf32>
      %130 = vector.broadcast %129 : vector<128x1xf32> to vector<128x16xf32>
      %131 = arith.mulf %128, %130 : vector<128x16xf32>
      %c0_67 = arith.constant 0 : index
      %c0_68 = arith.constant 0 : index
      %132 = vector.load %arg13[%c0_67, %c0_68] : memref<128x64xf32, #tpu.memory_space<vmem>>, vector<128x16xf32>
      tpu.vector_store %arg13[%c0_67, %c0_68], %131 {strides = array<i32>} : memref<128x64xf32, #tpu.memory_space<vmem>>, vector<128x16xf32>,
      %c0_69 = arith.constant 0 : index
      %c16_70 = arith.constant 16 : index
      %133 = vector.load %arg13[%c0_69, %c16_70] : memref<128x64xf32, #tpu.memory_space<vmem>>, vector<128x16xf32>
      %134 = vector.extract_strided_slice %127 {offsets = [0, 1], sizes = [128, 1], strides = [1, 1]} : vector<128x4xf32> to vector<128x1xf32>
      %135 = vector.broadcast %134 : vector<128x1xf32> to vector<128x16xf32>
      %136 = arith.mulf %133, %135 : vector<128x16xf32>
      %c0_71 = arith.constant 0 : index
      %c16_72 = arith.constant 16 : index
      %137 = vector.load %arg13[%c0_71, %c16_72] : memref<128x64xf32, #tpu.memory_space<vmem>>, vector<128x16xf32>
      tpu.vector_store %arg13[%c0_71, %c16_72], %136 {strides = array<i32>} : memref<128x64xf32, #tpu.memory_space<vmem>>, vector<128x16xf32>,
      %c0_73 = arith.constant 0 : index
      %c32_74 = arith.constant 32 : index
      %138 = vector.load %arg13[%c0_73, %c32_74] : memref<128x64xf32, #tpu.memory_space<vmem>>, vector<128x16xf32>
      %139 = vector.extract_strided_slice %127 {offsets = [0, 2], sizes = [128, 1], strides = [1, 1]} : vector<128x4xf32> to vector<128x1xf32>
      %140 = vector.broadcast %139 : vector<128x1xf32> to vector<128x16xf32>
      %141 = arith.mulf %138, %140 : vector<128x16xf32>
      %c0_75 = arith.constant 0 : index
      %c32_76 = arith.constant 32 : index
      %142 = vector.load %arg13[%c0_75, %c32_76] : memref<128x64xf32, #tpu.memory_space<vmem>>, vector<128x16xf32>
      tpu.vector_store %arg13[%c0_75, %c32_76], %141 {strides = array<i32>} : memref<128x64xf32, #tpu.memory_space<vmem>>, vector<128x16xf32>,
      %c0_77 = arith.constant 0 : index
      %c48_78 = arith.constant 48 : index
      %143 = vector.load %arg13[%c0_77, %c48_78] : memref<128x64xf32, #tpu.memory_space<vmem>>, vector<128x16xf32>
      %144 = vector.extract_strided_slice %127 {offsets = [0, 3], sizes = [128, 1], strides = [1, 1]} : vector<128x4xf32> to vector<128x1xf32>
      %145 = vector.broadcast %144 : vector<128x1xf32> to vector<128x16xf32>
      %146 = arith.mulf %143, %145 : vector<128x16xf32>
      %c0_79 = arith.constant 0 : index
      %c48_80 = arith.constant 48 : index
      %147 = vector.load %arg13[%c0_79, %c48_80] : memref<128x64xf32, #tpu.memory_space<vmem>>, vector<128x16xf32>
      tpu.vector_store %arg13[%c0_79, %c48_80], %146 {strides = array<i32>} : memref<128x64xf32, #tpu.memory_space<vmem>>, vector<128x16xf32>,
      %c0_81 = arith.constant 0 : index
      %c0_82 = arith.constant 0 : index
      %148 = vector.load %arg13[%c0_81, %c0_82] : memref<128x64xf32, #tpu.memory_space<vmem>>, vector<128x64xf32>
      %149 = arith.truncf %148 : vector<128x64xf32> to vector<128x64xbf16>
      %c0_83 = arith.constant 0 : index
      %c0_84 = arith.constant 0 : index
      %150 = vector.load %arg7[%c0_83, %c0_84] : memref<64x32xbf16, #tpu.memory_space<vmem>>, vector<64x32xbf16>
      %cst_85 = arith.constant dense<0.000000e+00> : vector<128x32xf32>
      %151 = tpu.matmul %149, %150, %cst_85 {dimension_numbers = #tpu.dot_dimension_numbers<[1], [0], [0], [1], [0, 0, 1, 1], [], []>} : vector<128x64xbf16>, vector<64x32xbf16>, vector<128x32xf32> -> vector<128x32xf32>
      %c0_86 = arith.constant 0 : index
      %c0_87 = arith.constant 0 : index
      %152 = vector.load %arg8[%c0_86, %c0_87] : memref<1x32xf32, #tpu.memory_space<vmem>>, vector<1x32xf32>
      %153 = vector.broadcast %152 : vector<1x32xf32> to vector<128x32xf32>
      %154 = arith.addf %151, %153 : vector<128x32xf32>
      %c0_88 = arith.constant 0 : index
      %c0_89 = arith.constant 0 : index
      %c0_90 = arith.constant 0 : index
      %155 = vector.load %arg9[%c0_88, %c0_89, %c0_90] : memref<1x128x32xf32, #tpu.memory_space<vmem>>, vector<1x128x32xf32>
      %156 = vector.shape_cast %155 : vector<1x128x32xf32> to vector<128x32xf32>
      %157 = vector.shape_cast %154 : vector<128x32xf32> to vector<1x128x32xf32>
      tpu.vector_store %arg9[%c0_88, %c0_89, %c0_90], %157 {strides = array<i32>} : memref<1x128x32xf32, #tpu.memory_space<vmem>>, vector<1x128x32xf32>,
    } else {
    }
    return
  }
  func.func @transform_0(%arg0: i32, %arg1: i32, %arg2: i32) -> (i32, i32, i32) {
    %c0_i32 = arith.constant 0 : i32
    %c0_i32_0 = arith.constant 0 : i32
    return %arg0, %arg1, %c0_i32 : i32, i32, i32
  }
  func.func @transform_1(%arg0: i32, %arg1: i32, %arg2: i32) -> (i32, i32, i32) {
    %c0_i32 = arith.constant 0 : i32
    %0 = arith.cmpi eq, %arg1, %c0_i32 : i32
    %c0_i32_0 = arith.constant 0 : i32
    %1 = arith.select %0, %arg2, %c0_i32_0 : i32
    %c0_i32_1 = arith.constant 0 : i32
    %c0_i32_2 = arith.constant 0 : i32
    return %arg0, %1, %c0_i32_1 : i32, i32, i32
  }
  func.func @transform_2(%arg0: i32, %arg1: i32, %arg2: i32) -> (i32, i32) {
    %c0_i32 = arith.constant 0 : i32
    %c0_i32_0 = arith.constant 0 : i32
    %c0_i32_1 = arith.constant 0 : i32
    return %c0_i32, %c0_i32_0 : i32, i32
  }
  func.func @transform_3(%arg0: i32, %arg1: i32, %arg2: i32) -> (i32, i32) {
    %c0_i32 = arith.constant 0 : i32
    %c0_i32_0 = arith.constant 0 : i32
    %c0_i32_1 = arith.constant 0 : i32
    return %c0_i32, %c0_i32_0 : i32, i32
  }
  func.func @transform_4(%arg0: i32, %arg1: i32, %arg2: i32) -> (i32, i32) {
    %c0_i32 = arith.constant 0 : i32
    %c0_i32_0 = arith.constant 0 : i32
    %c0_i32_1 = arith.constant 0 : i32
    return %c0_i32, %c0_i32_0 : i32, i32
  }
  func.func @transform_5(%arg0: i32, %arg1: i32, %arg2: i32) -> (i32, i32) {
    %c0_i32 = arith.constant 0 : i32
    %c0_i32_0 = arith.constant 0 : i32
    %c0_i32_1 = arith.constant 0 : i32
    return %c0_i32, %c0_i32_0 : i32, i32
  }
  func.func @transform_6(%arg0: i32, %arg1: i32, %arg2: i32) -> (i32, i32, i32) {
    %c0_i32 = arith.constant 0 : i32
    %c0_i32_0 = arith.constant 0 : i32
    return %arg0, %arg1, %c0_i32 : i32, i32, i32
  }
}

</mosaic_0001>

<bundles_post_ra>
// kernel: tpu_custom_call.1
= control target key start
LH: loop header
LB: loop body
LE: loop exit
PB: predicated region body
PF: predicated region fallthrough
CT: control target
= control target key end

     0   :  { %s5660_s21 = smov 0   ;;  %s5662_s22 = smov 0   ;;  %s8085_s0 = inlined_call_operand.vmem [shape: bf16[2,256,32], index: 0, kind: input, shape index: {}]   ;;  %s8086_s1 = inlined_call_operand.vmem [shape: bf16[2,256,32], index: 1, kind: input, shape index: {}]   ;;  %s8087_s2 = inlined_call_operand.vmem [shape: bf16[32,64], index: 2, kind: input, shape index: {}]   ;;  %s8088_s3 = inlined_call_operand.vmem [shape: bf16[32,128], index: 3, kind: input, shape index: {}]   ;;  %s8089_s4 = inlined_call_operand.vmem [shape: bf16[64,32], index: 4, kind: input, shape index: {}]   ;;  %s8090_s5 = inlined_call_operand.vmem [shape: f32[1,32], index: 5, kind: input, shape index: {}]   ;;  %s8091_s6 = inlined_call_operand.vmem [shape: f32[2,256,32], index: 6, kind: output, shape index: {}]  }
   0x1   :  { %s5664_s23 = smov 0   ;;  %s5666_s24 = smov 0  }
   0x2   :  { %s5668_s25 = smov 0   ;;  %s5670_s26 = smov 0  }
   0x3   :  { %s5672_s27 = smov 0  }
   0x4 LB: > { %s28_s28 = sadd.s32 1, %s5594_s24  ;;  %s31_s29 = sadd.s32 1, %s5598_s25  ;;  %s5606_s27 = sphi %s5672_s27, %s16_s27   ;;  %s5602_s26 = sphi %s5670_s26, %s8230_s26   ;;  %s5598_s25 = sphi %s5668_s25, %s8229_s25   ;;  %s5594_s24 = sphi %s5666_s24, %s8228_s24   ;;  %s5590_s23 = sphi %s5664_s23, %s8227_s23   ;;  %s5586_s22 = sphi %s5662_s22, %s8226_s22   ;;  %s5582_s21 = sphi %s5660_s21, %s8225_s21  }
   0x5   : > { %p29_p0 = scmp.ge.s32.totalorder %s28_s28, 4  ;;  %p4826_p1 = scmp.ge.s32.totalorder %s5606_s27, 1 }
   0x6   : > { %p265_p2 = scmp.lt.s32.totalorder %s5606_s27, 17  ;;  %s35_s30 = sadd.s32 1, %s5602_s26 }
   0x7   : > { %s8232_s28 = smov (%p29_p0, %s28_s28), 0  ;;  %s8234_s29 = smov (!%p29_p0, %s31_s29), %s5598_s25 }
   0x8   : > { %p266_p3 = pnand %p4826_p1, %p265_p2  ;;  %p33_p4 = scmp.ge.s32.totalorder %s8234_s29, 2 }
   0xa   : > { %s8236_s29 = smov (%p33_p4, %s8234_s29), 0  ;;  %s8238_s30 = smov (!%p33_p4, %s35_s30), %s5602_s26 }
   0xb   : > { %p37_p5 = scmp.ge.s32.totalorder %s8238_s30, 2  ;;  %269 = sbr.rel (%p266_p3) target bundleno = 3686 (0xe66), region = 44 }
   0xd   : > { %s8240_s30 = smov (%p37_p5, %s8238_s30), 0 }
   0xe   : > { %8125 = sst [smem:[#allocation7_spill]] %s8240_s30 }
  0x10   : > { %s4827_s7 = sshll.u32 %s5586_s22, 4  ;;  %p315_p6 = scmp.lt.s32.totalorder %s5590_s23, 1 }
  0x11   : > { %p317_p7 = scmp.lt.s32.totalorder %s4827_s7, 31  ;;  %p324_p8 = scmp.eq.s32.totalorder %s5586_s22, 0 }
  0x12   : > { %s8242_s23 = smov (!%p315_p6, %s5590_s23), 1  ;;  %p4836_p10 = scmp.ne.s32.totalorder %s5582_s21, 0 }
  0x13   : > { %s8244_s7 = smov (!%p317_p7, %s4827_s7), 31  ;;  %s4828_s8 = sshll.u32 %s8242_s23, 5 }
  0x14   : > { %s320_s9 = sadd.s32 %s4828_s8, %s8244_s7 }
  0x15   : > { %s4829_s10 = sshll.u32 %s320_s9, 2  ;;  %s4835_s11 = sshll.u32 %s320_s9, 3 }
  0x16   : > { %s5711_s14 = scalar_lea.vmem %s8085_s0, %s4829_s10  ;;  %s5716_s17 = scalar_lea.vmem %s8091_s6, %s4835_s11 }
  0x17   : > { %s325_s18 = scalar_select %p324_p8, %s5582_s21, 0 }
  0x19   : > { %s4830_s19 = sshll.u32 %s325_s18, 3 }
  0x1a   : > { %p329_p9 = scmp.lt.s32.totalorder %s4830_s19, 31 }
  0x1b   : > { %352 = sbr.rel (%p4836_p10) target bundleno = 203 (0xcb), region = 48 }
  0x1c   : > { %s8246_s19 = smov (!%p329_p9, %s4830_s19), 31 }
  0x1d   : > { %s332_s20 = sadd.s32 %s4828_s8, %s8246_s19 }
  0x1e   : > { %s4832_s23 = sshll.u32 %s332_s20, 2 }
  0x1f   : > { %s5722_s9 = scalar_lea.vmem %s8086_s1, %s4832_s23 }
  0x20   : > { %v5065_v0 = vld [vmem:[%s8087_s2 + $0x8] sm:$0xff]  ;;  %v5064_v1 = vld [vmem:[%s8087_s2] sm:$0xff]  ;;  %v5058_v3 = vld [vmem:[%s5711_s14 + $0x10] sm:$0xff]  ;;  %vm425_vm0 = vcmask 261120   ;;  %vm531_vm1 = vcmask 519168   ;;  %vm548_vm2 = vcmask 31744  }
  0x21   : > { %456 = vmatpush.bf16.msra.mxu0 %v5065_v0  ;;  %5111 = vmatpush.bf16.msra.mxu1 %v5065_v0  ;;  %v5056_v2 = vld [vmem:[%s5711_s14] sm:$0xff]  ;;  %v5062_v5 = vld [vmem:[%s5711_s14 + $0x30] sm:$0xff]  ;;  %v5057_v6 = vld [vmem:[%s5711_s14 + $0x8] sm:$0xff]  ;;  %v5608_v18 = vmov -inf   ;;  %v5609_v59 = vmov 0.0   ;;  %vm581_vm3 = vcmask 523264  }
  0x22   : > { %5112 = vmatpush.bf16.msra.mxu2 %v5065_v0  ;;  %5113 = vmatpush.bf16.msra.mxu3 %v5065_v0  ;;  %v5060_v4 = vld [vmem:[%s5711_s14 + $0x20] sm:$0xff]  ;;  %v5059_v7 = vld [vmem:[%s5711_s14 + $0x18] sm:$0xff]  ;;  %v5061_v8 = vld [vmem:[%s5711_s14 + $0x28] sm:$0xff]  ;;  %549 = vst.msk [vmem:[#allocation3] sm:$0xff] %vm548_vm2, %v5608_v18 }
  0x23   : > { %v5063_v9 = vld [vmem:[%s5711_s14 + $0x38] sm:$0xff]  ;;  %550 = vst.msk [vmem:[#allocation3 + $0x8] sm:$0xff] %vm548_vm2, %v5608_v18 }
  0x24   : > { %551 = vst.msk [vmem:[#allocation3 + $0x10] sm:$0xff] %vm548_vm2, %v5608_v18 }
  0x25   : > { %457 = vmatpush.bf16.msra.mxu0 %v5064_v1  ;;  %5114 = vmatpush.bf16.msra.mxu1 %v5064_v1  ;;  %552 = vst.msk [vmem:[#allocation3 + $0x18] sm:$0xff] %vm548_vm2, %v5608_v18 }
  0x26   : > { %5115 = vmatpush.bf16.msra.mxu2 %v5064_v1  ;;  %5116 = vmatpush.bf16.msra.mxu3 %v5064_v1  ;;  %553 = vst.msk [vmem:[#allocation3 + $0x20] sm:$0xff] %vm548_vm2, %v5608_v18 }
  0x27   : > { %554 = vst.msk [vmem:[#allocation3 + $0x28] sm:$0xff] %vm548_vm2, %v5608_v18 }
  0x28   : > { %4877 = vmatmul.msk.bf16.vlgmr.msra.gmra.mxu0 %vm425_vm0, %v5056_v2  ;;  %4879 = vmatmul.msk.bf16.vlgmr.msra.gmra.mxu1 %vm425_vm0, %v5058_v3  ;;  %555 = vst.msk [vmem:[#allocation3 + $0x30] sm:$0xff] %vm548_vm2, %v5608_v18 }
  0x29   : > { %4881 = vmatmul.msk.bf16.vlgmr.msra.gmra.mxu2 %vm425_vm0, %v5060_v4  ;;  %4883 = vmatmul.msk.bf16.vlgmr.msra.gmra.mxu3 %vm425_vm0, %v5062_v5  ;;  %556 = vst.msk [vmem:[#allocation3 + $0x38] sm:$0xff] %vm548_vm2, %v5608_v18 }
  0x2a   : > { %557 = vst.msk [vmem:[#allocation3 + $0x40] sm:$0xff] %vm548_vm2, %v5608_v18 }
  0x2b   : > { %558 = vst.msk [vmem:[#allocation3 + $0x48] sm:$0xff] %vm548_vm2, %v5608_v18 }
  0x2c   : > { %559 = vst.msk [vmem:[#allocation3 + $0x50] sm:$0xff] %vm548_vm2, %v5608_v18 }
  0x2d   : > { %560 = vst.msk [vmem:[#allocation3 + $0x58] sm:$0xff] %vm548_vm2, %v5608_v18 }
  0x2e   : > { %561 = vst.msk [vmem:[#allocation3 + $0x60] sm:$0xff] %vm548_vm2, %v5608_v18 }
  0x2f   : > { %562 = vst.msk [vmem:[#allocation3 + $0x68] sm:$0xff] %vm548_vm2, %v5608_v18 }
  0x30   : > { %563 = vst.msk [vmem:[#allocation3 + $0x70] sm:$0xff] %vm548_vm2, %v5608_v18 }
  0x31   : > { %564 = vst.msk [vmem:[#allocation3 + $0x78] sm:$0xff] %vm548_vm2, %v5608_v18 }
  0x32   : > { %565 = vst.msk [vmem:[#allocation4] sm:$0xff] %vm548_vm2, %v5609_v59 }
  0x33   : > { %566 = vst.msk [vmem:[#allocation4 + $0x8] sm:$0xff] %vm548_vm2, %v5609_v59 }
  0x34   : > { %567 = vst.msk [vmem:[#allocation4 + $0x10] sm:$0xff] %vm548_vm2, %v5609_v59 }
  0x35   : > { %568 = vst.msk [vmem:[#allocation4 + $0x18] sm:$0xff] %vm548_vm2, %v5609_v59 }
  0x36   : > { %569 = vst.msk [vmem:[#allocation4 + $0x20] sm:$0xff] %vm548_vm2, %v5609_v59 }
  0x37   : > { %570 = vst.msk [vmem:[#allocation4 + $0x28] sm:$0xff] %vm548_vm2, %v5609_v59 }
  0x38   : > { %4878 = vmatmul.msk.bf16.gmra.mxu0 %vm425_vm0, %v5057_v6  ;;  %4880 = vmatmul.msk.bf16.gmra.mxu1 %vm425_vm0, %v5059_v7  ;;  %571 = vst.msk [vmem:[#allocation4 + $0x30] sm:$0xff] %vm548_vm2, %v5609_v59 }
  0x39   : > { %4882 = vmatmul.msk.bf16.gmra.mxu2 %vm425_vm0, %v5061_v8  ;;  %4884 = vmatmul.msk.bf16.gmra.mxu3 %vm425_vm0, %v5063_v9  ;;  %572 = vst.msk [vmem:[#allocation4 + $0x38] sm:$0xff] %vm548_vm2, %v5609_v59 }
  0x3a   : > { %573 = vst.msk [vmem:[#allocation4 + $0x40] sm:$0xff] %vm548_vm2, %v5609_v59 }
  0x3b   : > { %574 = vst.msk [vmem:[#allocation4 + $0x48] sm:$0xff] %vm548_vm2, %v5609_v59 }
  0x3c   : > { %575 = vst.msk [vmem:[#allocation4 + $0x50] sm:$0xff] %vm548_vm2, %v5609_v59 }
  0x3d   : > { %576 = vst.msk [vmem:[#allocation4 + $0x58] sm:$0xff] %vm548_vm2, %v5609_v59 }
  0x3e   : > { %577 = vst.msk [vmem:[#allocation4 + $0x60] sm:$0xff] %vm548_vm2, %v5609_v59 }
  0x3f   : > { %578 = vst.msk [vmem:[#allocation4 + $0x68] sm:$0xff] %vm548_vm2, %v5609_v59 }
  0x40   : > { %579 = vst.msk [vmem:[#allocation4 + $0x70] sm:$0xff] %vm548_vm2, %v5609_v59 }
  0x41   : > { %580 = vst.msk [vmem:[#allocation4 + $0x78] sm:$0xff] %vm548_vm2, %v5609_v59 }
  0x42   : > { %582 = vst.msk [vmem:[#allocation5] sm:$0xff] %vm581_vm3, %v5609_v59 }
  0x43   : > { %583 = vst.msk [vmem:[#allocation5 + $0x8] sm:$0xff] %vm581_vm3, %v5609_v59 }
  0x44   : > { %584 = vst.msk [vmem:[#allocation5 + $0x10] sm:$0xff] %vm581_vm3, %v5609_v59 }
  0x45   : > { %585 = vst.msk [vmem:[#allocation5 + $0x18] sm:$0xff] %vm581_vm3, %v5609_v59 }
  0x46   : > { %586 = vst.msk [vmem:[#allocation5 + $0x20] sm:$0xff] %vm581_vm3, %v5609_v59 }
  0x47   : > { %587 = vst.msk [vmem:[#allocation5 + $0x28] sm:$0xff] %vm581_vm3, %v5609_v59 }
  0x48   : > { %588 = vst.msk [vmem:[#allocation5 + $0x30] sm:$0xff] %vm581_vm3, %v5609_v59 }
  0x49   : > { %589 = vst.msk [vmem:[#allocation5 + $0x38] sm:$0xff] %vm581_vm3, %v5609_v59 }
  0x4a   : > { %590 = vst.msk [vmem:[#allocation5 + $0x40] sm:$0xff] %vm581_vm3, %v5609_v59 }
  0x4b   : > { %591 = vst.msk [vmem:[#allocation5 + $0x48] sm:$0xff] %vm581_vm3, %v5609_v59 }
  0x4c   : > { %592 = vst.msk [vmem:[#allocation5 + $0x50] sm:$0xff] %vm581_vm3, %v5609_v59 }
  0x4d   : > { %593 = vst.msk [vmem:[#allocation5 + $0x58] sm:$0xff] %vm581_vm3, %v5609_v59 }
  0x4e   : > { %594 = vst.msk [vmem:[#allocation5 + $0x60] sm:$0xff] %vm581_vm3, %v5609_v59 }
  0x4f   : > { %595 = vst.msk [vmem:[#allocation5 + $0x68] sm:$0xff] %vm581_vm3, %v5609_v59 }
  0x50   : > { %596 = vst.msk [vmem:[#allocation5 + $0x70] sm:$0xff] %vm581_vm3, %v5609_v59 }
  0x51   : > { %597 = vst.msk [vmem:[#allocation5 + $0x78] sm:$0xff] %vm581_vm3, %v5609_v59 }
  0xa5   : > { %v459_v10 = vpop.f32.mrf.mxu0  ;;  %v469_v11 = vpop.f32.mrf.mxu1 }
  0xa6   : > { %v499_v12 = vmul.f32 0.25, %v459_v10  ;;  %v503_v13 = vmul.f32 0.25, %v469_v11 }
  0xa8   : > { %v515_v14 = vpack.c.bf16 %v499_v12, %v499_v12  ;;  %v519_v15 = vpack.c.bf16 %v503_v13, %v503_v13 }
  0xaa   : > { %532 = vst.msk [vmem:[#allocation2] sm:$0xf] %vm531_vm1, %v515_v14 }
  0xab   : > { %536 = vst.msk [vmem:[#allocation2 + $0x10] sm:$0xf] %vm531_vm1, %v519_v15 }
  0xac   : > { %v479_v16 = vpop.f32.mrf.mxu2  ;;  %v489_v17 = vpop.f32.mrf.mxu3 }
  0xad   : > { %v507_v19 = vmul.f32 0.25, %v479_v16  ;;  %v511_v20 = vmul.f32 0.25, %v489_v17  ;;  %v461_v21 = vpop.f32.mrf.mxu0  ;;  %v471_v22 = vpop.f32.mrf.mxu1 }
  0xae   : > { %v500_v23 = vmul.f32 0.25, %v461_v21  ;;  %v504_v24 = vmul.f32 0.25, %v471_v22 }
  0xaf   : > { %v523_v25 = vpack.c.bf16 %v507_v19, %v507_v19  ;;  %v527_v26 = vpack.c.bf16 %v511_v20, %v511_v20 }
  0xb0   : > { %v516_v27 = vpack.c.bf16 %v500_v23, %v500_v23  ;;  %v520_v28 = vpack.c.bf16 %v504_v24, %v504_v24 }
  0xb1   : > { %540 = vst.msk [vmem:[#allocation2 + $0x20] sm:$0xf] %vm531_vm1, %v523_v25 }
  0xb2   : > { %544 = vst.msk [vmem:[#allocation2 + $0x30] sm:$0xf] %vm531_vm1, %v527_v26 }
  0xb3   : > { %533 = vst.msk [vmem:[#allocation2 + $0x4] sm:$0xf] %vm531_vm1, %v516_v27 }
  0xb4   : > { %537 = vst.msk [vmem:[#allocation2 + $0x14] sm:$0xf] %vm531_vm1, %v520_v28  ;;  %v481_v29 = vpop.f32.mrf.mxu2  ;;  %v491_v30 = vpop.f32.mrf.mxu3 }
  0xb5   : > { %v508_v31 = vmul.f32 0.25, %v481_v29  ;;  %v512_v32 = vmul.f32 0.25, %v491_v30  ;;  %v464_v33 = vpop.f32.mrf.mxu0  ;;  %v474_v34 = vpop.f32.mrf.mxu1 }
  0xb6   : > { %v501_v35 = vmul.f32 0.25, %v464_v33  ;;  %v505_v36 = vmul.f32 0.25, %v474_v34 }
  0xb7   : > { %v524_v37 = vpack.c.bf16 %v508_v31, %v508_v31  ;;  %v528_v38 = vpack.c.bf16 %v512_v32, %v512_v32 }
  0xb8   : > { %v517_v39 = vpack.c.bf16 %v501_v35, %v501_v35  ;;  %v521_v40 = vpack.c.bf16 %v505_v36, %v505_v36 }
  0xb9   : > { %541 = vst.msk [vmem:[#allocation2 + $0x24] sm:$0xf] %vm531_vm1, %v524_v37 }
  0xba   : > { %545 = vst.msk [vmem:[#allocation2 + $0x34] sm:$0xf] %vm531_vm1, %v528_v38 }
  0xbb   : > { %534 = vst.msk [vmem:[#allocation2 + $0x8] sm:$0xf] %vm531_vm1, %v517_v39 }
  0xbc   : > { %538 = vst.msk [vmem:[#allocation2 + $0x18] sm:$0xf] %vm531_vm1, %v521_v40  ;;  %v484_v41 = vpop.f32.mrf.mxu2  ;;  %v494_v42 = vpop.f32.mrf.mxu3 }
  0xbd   : > { %v509_v43 = vmul.f32 0.25, %v484_v41  ;;  %v513_v44 = vmul.f32 0.25, %v494_v42  ;;  %v466_v45 = vpop.f32.mrf.mxu0  ;;  %v476_v46 = vpop.f32.mrf.mxu1 }
  0xbe   : > { %v502_v47 = vmul.f32 0.25, %v466_v45  ;;  %v506_v48 = vmul.f32 0.25, %v476_v46 }
  0xbf   : > { %v525_v49 = vpack.c.bf16 %v509_v43, %v509_v43  ;;  %v529_v50 = vpack.c.bf16 %v513_v44, %v513_v44 }
  0xc0   : > { %v518_v51 = vpack.c.bf16 %v502_v47, %v502_v47  ;;  %v522_v52 = vpack.c.bf16 %v506_v48, %v506_v48 }
  0xc1   : > { %542 = vst.msk [vmem:[#allocation2 + $0x28] sm:$0xf] %vm531_vm1, %v525_v49 }
  0xc2   : > { %546 = vst.msk [vmem:[#allocation2 + $0x38] sm:$0xf] %vm531_vm1, %v529_v50 }
  0xc3   : > { %535 = vst.msk [vmem:[#allocation2 + $0xc] sm:$0xf] %vm531_vm1, %v518_v51 }
  0xc4   : > { %539 = vst.msk [vmem:[#allocation2 + $0x1c] sm:$0xf] %vm531_vm1, %v522_v52  ;;  %v486_v53 = vpop.f32.mrf.mxu2  ;;  %v496_v54 = vpop.f32.mrf.mxu3 }
  0xc5   : > { %v510_v55 = vmul.f32 0.25, %v486_v53  ;;  %v514_v56 = vmul.f32 0.25, %v496_v54 }
  0xc7   : > { %v526_v57 = vpack.c.bf16 %v510_v55, %v510_v55  ;;  %v530_v58 = vpack.c.bf16 %v514_v56, %v514_v56 }
  0xc9   : > { %543 = vst.msk [vmem:[#allocation2 + $0x2c] sm:$0xf] %vm531_vm1, %v526_v57 }
  0xca   : > { %547 = vst.msk [vmem:[#allocation2 + $0x3c] sm:$0xf] %vm531_vm1, %v530_v58 }
  0xcb PF: > { %s4885_s30 = sshll.u32 %s5582_s21, 6  ;;  %p4886_p11 = scmp.ne.s32.totalorder %s5586_s22, 0 }
  0xcc   : > { %s697_s22 = sshra.s32 (!%p4886_p11), %s4885_s30, 3 }
  0xcd   : > { %602 = sbr.rel (%p4886_p11) target bundleno = 363 (0x16b), region = 52  ;;  %s4915_s18 = sshll.u32 (!%p4886_p11), %s697_s22, 2 }
  0xce   : > { %s700_s19 = scalar_lea.vmem (!%p4886_p11), [#allocation6], %s4915_s18 }
  0xd2   : > { %v5071_v60 = vld [vmem:[%s8088_s3 + $0x8] sm:$0xff]  ;;  %v5070_v61 = vld [vmem:[%s8088_s3] sm:$0xff]  ;;  %vm647_vm4 = vcmask 261120   ;;  %v5068_v0 = vld [vmem:[%s5722_s9 + $0x10] sm:$0xff] }
  0xd3   : > { %666 = vmatpush.bf16.msra.mxu0 %v5071_v60  ;;  %5117 = vmatpush.bf16.msra.mxu1 %v5071_v60  ;;  %v5066_v62 = vld [vmem:[%s5722_s9] sm:$0xff]  ;;  %v5067_v63 = vld [vmem:[%s5722_s9 + $0x8] sm:$0xff]  ;;  %v5069_v1 = vld [vmem:[%s5722_s9 + $0x18] sm:$0xff] }
  0xd4   : > { %5118 = vmatpush.bf16.msra.mxu2 %v5071_v60  ;;  %5119 = vmatpush.bf16.msra.mxu3 %v5071_v60 }
  0xd7   : > { %667 = vmatpush.bf16.msra.mxu0 %v5070_v61  ;;  %5120 = vmatpush.bf16.msra.mxu1 %v5070_v61 }
  0xd8   : > { %5121 = vmatpush.bf16.msra.mxu2 %v5070_v61  ;;  %5122 = vmatpush.bf16.msra.mxu3 %v5070_v61 }
  0xda   : > { %4911 = vmatmul.msk.bf16.vlgmr.msra.gmra.mxu0 %vm647_vm4, %v5066_v62  ;;  %4912 = vmatmul.msk.bf16.vlgmr.msra.gmra.mxu1 %vm647_vm4, %v5067_v63 }
  0xdb   : > { %4913 = vmatmul.msk.bf16.vlgmr.msra.gmra.mxu2 %vm647_vm4, %v5068_v0  ;;  %4914 = vmatmul.msk.bf16.vlgmr.msra.gmra.mxu3 %vm647_vm4, %v5069_v1 }
 0x157   : > { %v669_v2 = vpop.f32.mrf.mxu0  ;;  %v674_v3 = vpop.f32.mrf.mxu1 }
 0x15e   : > { %v679_v4 = vpop.f32.mrf.mxu2  ;;  %v684_v5 = vpop.f32.mrf.mxu3 }
 0x15f   : > { %v671_v6 = vpop.f32.mrf.mxu0  ;;  %v676_v7 = vpop.f32.mrf.mxu1 }
 0x160   : > { %v5091_v8 = vpack.c.bf16 %v671_v6, %v669_v2  ;;  %v5096_v9 = vpack.c.bf16 %v676_v7, %v674_v3 }
 0x162   : > { %5092 = vst [vmem:[%s700_s19] sm:$0xff] %v5091_v8  }
 0x163   : > { %5108 = vst [vmem:[%s700_s19 + $0x8] sm:$0xff] %v5096_v9  }
 0x166   : > { %v681_v10 = vpop.f32.mrf.mxu2  ;;  %v686_v11 = vpop.f32.mrf.mxu3 }
 0x167   : > { %v5101_v12 = vpack.c.bf16 %v681_v10, %v679_v4  ;;  %v5106_v13 = vpack.c.bf16 %v686_v11, %v684_v5 }
 0x169   : > { %5109 = vst [vmem:[%s700_s19 + $0x10] sm:$0xff] %v5101_v12  }
 0x16a   : > { %5110 = vst [vmem:[%s700_s19 + $0x18] sm:$0xff] %v5106_v13  }
 0x16b PF: > { %s709_s20 = sshra.s32 %s4885_s30, 3  ;;  %vm797_vm5 = vcmask 130048   ;;  %s5610_s9 = smov 64   ;;  %v5077_v19 = vld [vmem:[#allocation2 + $0x8] sm:$0xff]  ;;  %v5076_v21 = vld [vmem:[#allocation2] sm:$0xff]  ;;  %v5078_v22 = vld [vmem:[#allocation2 + $0x10] sm:$0xff] }
 0x16c   : > { %s4916_s23 = sshll.u32 %s709_s20, 2  ;;  %s5611_s10 = smov 112   ;;  %v5080_v23 = vld [vmem:[#allocation2 + $0x20] sm:$0xff]  ;;  %v5079_v25 = vld [vmem:[#allocation2 + $0x18] sm:$0xff]  ;;  %v5081_v26 = vld [vmem:[#allocation2 + $0x28] sm:$0xff]  ;;  %vm899_vm6 = vcmask 523264  }
 0x16d   : > { %s5843_s7 = scalar_lea.vmem [#allocation6], %s4916_s23  ;;  %v5083_v27 = vld [vmem:[#allocation2 + $0x38] sm:$0xff]  ;;  %v5082_v29 = vld [vmem:[#allocation2 + $0x30] sm:$0xff]  ;;  %s5612_s12 = smov 48   ;;  %vm1284_vm7 = vcmask 7168   ;;  %vm2055_vm8 = vcmask 15368  }
 0x16e   : > { %s5613_s8 = smov 96   ;;  %s5616_s11 = smov 80   ;;  %vm2349_vm9 = vcmask 261248   ;;  %vm2891_vm10 = vcmask 23568   ;;  %vm3727_vm11 = vcmask 31768   ;;  %vm3185_vm12 = vcmask 392448  }
 0x16f   : > { %s5617_s30 = smov 16   ;;  %s5619_s13 = smov 32   ;;  %vm4021_vm13 = vcmask 523648  }
 0x170   : > { %p5029_p12 = scmp.ne.s32.totalorder %s5582_s21, 3 }
 0x171   : > { %v5072_v14 = vld [vmem:[%s5843_s7] sm:$0xff]  ;;  %v5075_v15 = vld [vmem:[%s5843_s7 + $0x18] sm:$0xff]  ;;  %v5074_v16 = vld [vmem:[%s5843_s7 + $0x10] sm:$0xff] }
 0x172   : > { %v5073_v17 = vld [vmem:[%s5843_s7 + $0x8] sm:$0xff]  ;;  %1413 = vrot.lane.b32.xlu0 %v5072_v14, %s5610_s9  ;;  %v832_v18 = vsel %vm797_vm5, %v5075_v15, 0  ;;  %1417 = vrot.lane.b32.xlu1 %v5074_v16, %s5610_s9  ;;  %v829_v20 = vsel %vm797_vm5, %v5074_v16, 0  ;;  %v823_v28 = vsel %vm797_vm5, %v5072_v14, 0 }
 0x173   : > { %838 = vmatpush.bf16.xpose.msra.mxu0 %v832_v18  ;;  %1415 = vrot.lane.b32.xlu2 %v5073_v17, %s5610_s9  ;;  %v826_v24 = vsel %vm797_vm5, %v5073_v17, 0 }
 0x17a   : > { %1419 = vrot.lane.b32.xlu0 %v5075_v15, %s5610_s9  ;;  %1548 = vrot.lane.b32.xlu1 %v5077_v19, %s5611_s10 }
 0x17b   : > { %839 = vmatpush.bf16.xpose.msra.mxu0 %v829_v20  ;;  %1546 = vrot.lane.b32.xlu2 %v5076_v21, %s5611_s10 }
 0x182   : > { %1550 = vrot.lane.b32.xlu0 %v5078_v22, %s5611_s10  ;;  %1554 = vrot.lane.b32.xlu1 %v5080_v23, %s5611_s10 }
 0x183   : > { %840 = vmatpush.bf16.xpose.msra.mxu0 %v826_v24  ;;  %1552 = vrot.lane.b32.xlu2 %v5079_v25, %s5611_s10  ;;  %v883_v24 = vld [vmem:[#allocation3] sm:$0xff] }
 0x18a   : > { %1556 = vrot.lane.b32.xlu0 %v5081_v26, %s5611_s10  ;;  %1560 = vrot.lane.b32.xlu1 %v5083_v27, %s5611_s10 }
 0x18b   : > { %841 = vmatpush.bf16.xpose.msra.mxu0 %v823_v28  ;;  %1558 = vrot.lane.b32.xlu2 %v5082_v29, %s5611_s10 }
 0x192   : > { %1562 = vrot.lane.b32.xlu0 %v5072_v14, %s5611_s10  ;;  %4965 = vmatmul.msk.bf16.vlgmr.msra.gmra.mxu0 %vm797_vm5, %v5076_v21 }
 0x193   : > { %1566 = vrot.lane.b32.xlu1 %v5074_v16, %s5611_s10  ;;  %1564 = vrot.lane.b32.xlu2 %v5073_v17, %s5611_s10 }
 0x19a   : > { %1568 = vrot.lane.b32.xlu0 %v5075_v15, %s5611_s10 }
 0x19b   : > { %2188 = vrot.lane.b32.xlu1 %v5074_v16, %s5612_s12  ;;  %2184 = vrot.lane.b32.xlu2 %v5072_v14, %s5612_s12  ;;  %v8092_v14 = vmov 0  }
 0x19c   : > { %5208 = vset.pattern.permute.xlu1 %v8092_v14  ;;  %5210 = vset.pattern.permute.xlu0 %v8092_v14 }
 0x19d   : > { %5209 = vset.pattern.permute.xlu2 %v8092_v14 }
 0x1a2   : > { %4966 = vmatmul.msk.bf16.gmra.mxu0 %vm797_vm5, %v5077_v19  ;;  %2186 = vrot.lane.b32.xlu0 %v5073_v17, %s5612_s12 }
 0x1a3   : > { %2382 = vrot.lane.b32.xlu1 %v5076_v21, %s5613_s8  ;;  %2190 = vrot.lane.b32.xlu2 %v5075_v15, %s5612_s12 }
 0x1aa   : > { %2386 = vrot.lane.b32.xlu0 %v5078_v22, %s5613_s8 }
 0x1ab   : > { %2388 = vrot.lane.b32.xlu1 %v5079_v25, %s5613_s8  ;;  %2384 = vrot.lane.b32.xlu2 %v5077_v19, %s5613_s8 }
 0x1b2   : > { %4967 = vmatmul.msk.bf16.gmra.mxu0 %vm797_vm5, %v5078_v22  ;;  %2392 = vrot.lane.b32.xlu0 %v5081_v26, %s5613_s8 }
 0x1b3   : > { %2394 = vrot.lane.b32.xlu1 %v5082_v29, %s5613_s8  ;;  %2390 = vrot.lane.b32.xlu2 %v5080_v23, %s5613_s8 }
 0x1bb   : > { %2396 = vrot.lane.b32.xlu2 %v5083_v27, %s5613_s8 }
 0x1c2   : > { %4968 = vmatmul.msk.bf16.gmra.mxu0 %vm797_vm5, %v5079_v25 }
 0x1cd   : > { %v1416_v33 = vpop.permute.xlu2 %1415 }
 0x1d2   : > { %4969 = vmatmul.msk.bf16.gmra.mxu0 %vm797_vm5, %v5080_v23 }
 0x1d5   : > { %v1547_v36 = vpop.permute.xlu2 %1546 }
 0x1dd   : > { %v1553_v40 = vpop.permute.xlu2 %1552 }
 0x1e2   : > { %4970 = vmatmul.msk.bf16.gmra.mxu0 %vm797_vm5, %v5081_v26 }
 0x1e4   : > { %v1414_v30 = vpop.permute.xlu0 %1413  ;;  %v1418_v31 = vpop.permute.xlu1 %1417 }
 0x1e5   : > { %v5880_v44 = vpop.permute.xlu2 %1558 }
 0x1ec   : > { %v1420_v32 = vpop.permute.xlu0 %1419  ;;  %v1549_v34 = vpop.permute.xlu1 %1548 }
 0x1ed   : > { %1453 = vmatpush.bf16.msra.mxu1 %v1420_v32  ;;  %v1565_v50 = vpop.permute.xlu2 %1564 }
 0x1ee   : > { %v1598_v52 = vsel %vm797_vm5, %v1565_v50, 0 }
 0x1f1   : > { %1454 = vmatpush.bf16.msra.mxu1 %v1418_v31 }
 0x1f2   : > { %4971 = vmatmul.msk.bf16.gmra.mxu0 %vm797_vm5, %v5082_v29 }
 0x1f4   : > { %v1551_v35 = vpop.permute.xlu0 %1550  ;;  %v5874_v38 = vpop.permute.xlu1 %1554 }
 0x1f5   : > { %1455 = vmatpush.bf16.msra.mxu1 %v1416_v33  ;;  %v2185_v59 = vpop.permute.xlu2 %2184  ;;  %v884_v33 = vld [vmem:[#allocation3 + $0x8] sm:$0xff] }
 0x1f9   : > { %1456 = vmatpush.bf16.msra.mxu1 %v1414_v30 }
 0x1fc   : > { %v5872_v37 = vpop.permute.xlu0 %1556  ;;  %v5877_v41 = vpop.permute.xlu1 %1560 }
 0x1fd   : > { %v2191_v62 = vpop.permute.xlu2 %2190 }
 0x1fe   : > { %2224 = vmatpush.bf16.msra.mxu3 %v2191_v62 }
 0x202   : > { %4972 = vmatmul.msk.bf16.gmra.mxu0 %vm797_vm5, %v5083_v27 }
 0x204   : > { %v1563_v39 = vpop.permute.xlu0 %1562 }
 0x205   : > { %v1567_v46 = vpop.permute.xlu1 %1566  ;;  %v1595_v55 = vsel %vm797_vm5, %v1563_v39, 0  ;;  %v5964_v28 = vpop.permute.xlu2 %2384 }
 0x206   : > { %v1601_v48 = vsel %vm797_vm5, %v1567_v46, 0  ;;  %8130 = vst [vmem:[#allocation12_spill] sm:$0xff] %v5964_v28  ;;  %v886_v46 = vld [vmem:[#allocation3 + $0x18] sm:$0xff] }
 0x20c   : > { %v1569_v42 = vpop.permute.xlu0 %1568 }
 0x20d   : > { %v1604_v43 = vsel %vm797_vm5, %v1569_v42, 0  ;;  %v2189_v0 = vpop.permute.xlu1 %2188 }
 0x20e   : > { %1610 = vmatpush.bf16.xpose.msra.mxu2 %v1604_v43  ;;  %2225 = vmatpush.bf16.msra.mxu3 %v2189_v0  ;;  %v6008_v0 = vld [vmem:[#allocation3 + $0x38] sm:$0xff] }
 0x20f   : > { %v5882_v45 = vpop.f32.mrf.mxu0 }
 0x210   : > { %v900_v47 = vsel %vm899_vm6, %v5882_v45, -inf }
 0x211   : > { %901 = vmax.xlane.f32.xlu0 %v900_v47 }
 0x214   : > { %v2187_v2 = vpop.permute.xlu0 %2186 }
 0x215   : > { %2226 = vmatpush.bf16.msra.mxu3 %v2187_v2  ;;  %v5948_v18 = vpop.permute.xlu1 %2382 }
 0x216   : > { %1611 = vmatpush.bf16.xpose.msra.mxu2 %v1601_v48  ;;  %8127 = vst [vmem:[#allocation9_spill] sm:$0xff] %v5948_v18  ;;  %v887_v48 = vld [vmem:[#allocation3 + $0x20] sm:$0xff] }
 0x217   : > { %v5887_v49 = vpop.f32.mrf.mxu0 }
 0x218   : > { %v903_v51 = vsel %vm899_vm6, %v5887_v49, -inf }
 0x219   : > { %904 = vmax.xlane.f32.xlu0 %v903_v51  ;;  %2227 = vmatpush.bf16.msra.mxu3 %v2185_v59  ;;  %v5999_v59 = vld [vmem:[#allocation3 + $0x30] sm:$0xff] }
 0x21c   : > { %v5946_v17 = vpop.permute.xlu0 %2386 }
 0x21d   : > { %8126 = vst [vmem:[#allocation8_spill] sm:$0xff] %v5946_v17  ;;  %v5960_v23 = vpop.permute.xlu1 %2388 }
 0x21e   : > { %1612 = vmatpush.bf16.xpose.msra.mxu2 %v1598_v52  ;;  %8129 = vst [vmem:[#allocation11_spill] sm:$0xff] %v5960_v23  ;;  %v5988_v52 = vld [vmem:[#allocation3 + $0x28] sm:$0xff] }
 0x21f   : > { %v5892_v53 = vpop.f32.mrf.mxu0 }
 0x220   : > { %v906_v54 = vsel %vm899_vm6, %v5892_v53, -inf }
 0x221   : > { %907 = vmax.xlane.f32.xlu1 %v906_v54 }
 0x224   : > { %v5954_v21 = vpop.permute.xlu0 %2392 }
 0x225   : > { %8128 = vst [vmem:[#allocation10_spill] sm:$0xff] %v5954_v21  ;;  %v5971_v32 = vpop.permute.xlu1 %2394 }
 0x226   : > { %1613 = vmatpush.bf16.xpose.msra.mxu2 %v1595_v55  ;;  %8131 = vst [vmem:[#allocation13_spill] sm:$0xff] %v5971_v32 }
 0x227   : > { %v5897_v56 = vpop.f32.mrf.mxu0 }
 0x228   : > { %v909_v57 = vsel %vm899_vm6, %v5897_v56, -inf }
 0x229   : > { %910 = vmax.xlane.f32.xlu1 %v909_v57 }
 0x22d   : > { %4981 = vmatmul.msk.bf16.vlgmr.msra.gmra.mxu2 %vm797_vm5, %v1547_v36 }
 0x22f   : > { %v5902_v58 = vpop.f32.mrf.mxu0 }
 0x230   : > { %v912_v60 = vsel %vm899_vm6, %v5902_v58, -inf }
 0x231   : > { %913 = vmax.xlane.f32.xlu2 %v912_v60 }
 0x237   : > { %v5906_v61 = vpop.f32.mrf.mxu0 }
 0x238   : > { %v915_v63 = vsel %vm899_vm6, %v5906_v61, -inf }
 0x239   : > { %916 = vmax.xlane.f32.xlu2 %v915_v63 }
 0x23d   : > { %4982 = vmatmul.msk.bf16.gmra.mxu2 %vm797_vm5, %v1549_v34 }
 0x23f   : > { %v5911_v1 = vpop.f32.mrf.mxu0 }
 0x240   : > { %v918_v3 = vsel %vm899_vm6, %v5911_v1, -inf }
 0x241   : > { %919 = vmax.xlane.f32.xlu0 %v918_v3 }
 0x247   : > { %v5915_v4 = vpop.f32.mrf.mxu0 }
 0x248   : > { %v921_v5 = vsel %vm899_vm6, %v5915_v4, -inf }
 0x249   : > { %922 = vmax.xlane.f32.xlu1 %v921_v5  ;;  %v6015_v5 = vld [vmem:[#allocation3 + $0x40] sm:$0xff] }
 0x24d   : > { %4983 = vmatmul.msk.bf16.gmra.mxu2 %vm797_vm5, %v1551_v35 }
 0x24f   : > { %v5920_v6 = vpop.f32.mrf.mxu0 }
 0x250   : > { %v924_v7 = vsel %vm899_vm6, %v5920_v6, -inf }
 0x251   : > { %925 = vmax.xlane.f32.xlu2 %v924_v7 }
 0x257   : > { %v5924_v8 = vpop.f32.mrf.mxu0 }
 0x258   : > { %v927_v9 = vsel %vm899_vm6, %v5924_v8, -inf }
 0x259   : > { %928 = vmax.xlane.f32.xlu0 %v927_v9 }
 0x25d   : > { %4984 = vmatmul.msk.bf16.gmra.mxu2 %vm797_vm5, %v1553_v40 }
 0x25f   : > { %v5929_v10 = vpop.f32.mrf.mxu0 }
 0x260   : > { %v930_v11 = vsel %vm899_vm6, %v5929_v10, -inf }
 0x261   : > { %931 = vmax.xlane.f32.xlu1 %v930_v11 }
 0x267   : > { %v5933_v12 = vpop.f32.mrf.mxu0 }
 0x268   : > { %v933_v13 = vsel %vm899_vm6, %v5933_v12, -inf }
 0x269   : > { %934 = vmax.xlane.f32.xlu2 %v933_v13 }
 0x26d   : > { %4985 = vmatmul.msk.bf16.gmra.mxu2 %vm797_vm5, %v5874_v38  ;;  %v885_v38 = vld [vmem:[#allocation3 + $0x10] sm:$0xff] }
 0x26f   : > { %v5941_v15 = vpop.f32.mrf.mxu0 }
 0x270   : > { %v936_v16 = vsel %vm899_vm6, %v5941_v15, -inf }
 0x271   : > { %937 = vmax.xlane.f32.xlu0 %v936_v16 }
 0x277   : > { %v5950_v19 = vpop.f32.mrf.mxu0 }
 0x278   : > { %v939_v20 = vsel %vm899_vm6, %v5950_v19, -inf }
 0x279   : > { %940 = vmax.xlane.f32.xlu1 %v939_v20 }
 0x27d   : > { %4986 = vmatmul.msk.bf16.gmra.mxu2 %vm797_vm5, %v5872_v37  ;;  %v5976_v37 = vpop.permute.xlu2 %2390 }
 0x27e   : > { %8132 = vst [vmem:[#allocation14_spill] sm:$0xff] %v5976_v37 }
 0x27f   : > { %v5958_v22 = vpop.f32.mrf.mxu0 }
 0x280   : > { %v942_v25 = vsel %vm899_vm6, %v5958_v22, -inf }
 0x281   : > { %943 = vmax.xlane.f32.xlu2 %v942_v25  ;;  %v6028_v25 = vld [vmem:[#allocation3 + $0x48] sm:$0xff] }
 0x284   : > { %v902_v26 = vpop.xlane.xlu0 %901 }
 0x285   : > { %v948_v27 = vmax.f32 %v883_v24, %v902_v26  ;;  %v5982_v43 = vpop.permute.xlu2 %2396 }
 0x286   : > { %8134 = vst [vmem:[#allocation16_spill] sm:$0xff] %v5982_v43 }
 0x287   : > { %v5966_v29 = vpop.f32.mrf.mxu0  ;;  %1530 = vst.msk [vmem:[#allocation3] sm:$0xff] %vm1284_vm7, %v948_v27  ;;  %v964_v31 = vsub.f32 %v883_v24, %v948_v27 }
 0x288   : > { %v945_v30 = vsel %vm899_vm6, %v5966_v29, -inf }
 0x289   : > { %946 = vmax.xlane.f32.xlu0 %v945_v30  ;;  %v980_v35 = vmul.f32 1.442695, %v964_v31 }
 0x28b   : > { %5222 = vpow2.f32 %v980_v35 }
 0x28c   : > { %v905_v34 = vpop.xlane.xlu0 %904 }
 0x28d   : > { %4987 = vmatmul.msk.bf16.gmra.mxu2 %vm797_vm5, %v5880_v44  ;;  %v949_v36 = vmax.f32 %v884_v33, %v905_v34  ;;  %v6038_v34 = vld [vmem:[#allocation3 + $0x50] sm:$0xff] }
 0x28e   : > { %v6114_v43 = vld [vmem:[#allocation3] sm:$0xff] }
 0x28f   : > { %1531 = vst.msk [vmem:[#allocation3 + $0x8] sm:$0xff] %vm1284_vm7, %v949_v36  ;;  %v965_v7 = vsub.f32 %v884_v33, %v949_v36 }
 0x291   : > { %v5978_v42 = vpop.eup %5222  ;;  %v982_v24 = vmul.f32 1.442695, %v965_v7  ;;  %v6068_v7 = vld [vmem:[#allocation3 + $0x68] sm:$0xff] }
 0x292   : > { %1014 = vperm.xlu1 %5208, %v948_v27   ;;  %8133 = vst [vmem:[#allocation15_spill] sm:$0xff] %v5978_v42 }
 0x293   : > { %5224 = vpow2.f32 %v982_v24  ;;  %v6077_v24 = vld [vmem:[#allocation3 + $0x78] sm:$0xff] }
 0x294   : > { %v908_v39 = vpop.xlane.xlu1 %907 }
 0x295   : > { %v950_v40 = vmax.f32 %v885_v38, %v908_v39 }
 0x297   : > { %1532 = vst.msk [vmem:[#allocation3 + $0x10] sm:$0xff] %vm1284_vm7, %v950_v40  ;;  %v966_v26 = vsub.f32 %v885_v38, %v950_v40 }
 0x299   : > { %v984_v31 = vmul.f32 1.442695, %v966_v26  ;;  %v6035_v33 = vpop.eup %5224  ;;  %v6079_v26 = vld [vmem:[#allocation3 + $0x70] sm:$0xff] }
 0x29a   : > { %1319 = vperm.xlu1 %5208, %v5978_v42  }
 0x29b   : > { %5226 = vpow2.f32 %v984_v31 }
 0x29c   : > { %v911_v44 = vpop.xlane.xlu1 %910 }
 0x29d   : > { %4988 = vmatmul.msk.bf16.gmra.mxu2 %vm797_vm5, %v5877_v41  ;;  %1024 = vperm.xlu0 %5210, %v950_v40   ;;  %v951_v47 = vmax.f32 %v886_v46, %v911_v44 }
 0x29f   : > { %1533 = vst.msk [vmem:[#allocation3 + $0x18] sm:$0xff] %vm1284_vm7, %v951_v47  ;;  %v967_v38 = vsub.f32 %v886_v46, %v951_v47 }
 0x2a1   : > { %v6045_v44 = vpop.eup %5226 }
 0x2a4   : > { %v914_v50 = vpop.xlane.xlu2 %913 }
 0x2a5   : > { %v952_v51 = vmax.f32 %v887_v48, %v914_v50  ;;  %v986_v50 = vmul.f32 1.442695, %v967_v38 }
 0x2a7   : > { %1534 = vst.msk [vmem:[#allocation3 + $0x20] sm:$0xff] %vm1284_vm7, %v952_v51  ;;  %v968_v35 = vsub.f32 %v887_v48, %v952_v51 }
 0x2a9   : > { %v988_v40 = vmul.f32 1.442695, %v968_v35 }
 0x2ab   : > { %5228 = vpow2.f32 %v988_v40 }
 0x2ac   : > { %v917_v54 = vpop.xlane.xlu2 %916  ;;  %5230 = vpow2.f32 %v986_v50 }
 0x2ad   : > { %v5991_v55 = vmax.f32 %v5988_v52, %v917_v54  ;;  %v6047_v54 = vld [vmem:[#allocation3 + $0x58] sm:$0xff] }
 0x2af   : > { %1535 = vst.msk [vmem:[#allocation3 + $0x28] sm:$0xff] %vm1284_vm7, %v5991_v55 }
 0x2b0   : > { %v5995_v57 = vpop.f32.mrf.mxu2 }
 0x2b1   : > { %v1671_v41 = vsel %vm899_vm6, %v5995_v57, -inf  ;;  %v6055_v46 = vpop.eup %5228 }
 0x2b2   : > { %1672 = vmax.xlane.f32.xlu2 %v1671_v41  ;;  %8135 = vst [vmem:[#allocation17_spill] sm:$0xff] %v6055_v46 }
 0x2b4   : > { %v920_v60 = vpop.xlane.xlu0 %919 }
 0x2b5   : > { %v6002_v62 = vmax.f32 %v5999_v59, %v920_v60  ;;  %v6057_v60 = vld [vmem:[#allocation3 + $0x60] sm:$0xff] }
 0x2b7   : > { %1536 = vst.msk [vmem:[#allocation3 + $0x30] sm:$0xff] %vm1284_vm7, %v6002_v62 }
 0x2b8   : > { %v6006_v63 = vpop.f32.mrf.mxu2 }
 0x2b9   : > { %v1674_v11 = vsel %vm899_vm6, %v6006_v63, -inf }
 0x2bc   : > { %v923_v2 = vpop.xlane.xlu1 %922 }
 0x2bd   : > { %v6011_v3 = vmax.f32 %v6008_v0, %v923_v2 }
 0x2bf   : > { %1537 = vst.msk [vmem:[#allocation3 + $0x38] sm:$0xff] %vm1284_vm7, %v6011_v3 }
 0x2c0   : > { %v6017_v9 = vpop.f32.mrf.mxu2 }
 0x2c1   : > { %v1677_v20 = vsel %vm899_vm6, %v6017_v9, -inf }
 0x2c4   : > { %1675 = vmax.xlane.f32.xlu1 %v1674_v11  ;;  %v926_v13 = vpop.xlane.xlu2 %925 }
 0x2c5   : > { %v6022_v16 = vmax.f32 %v6015_v5, %v926_v13 }
 0x2c7   : > { %1678 = vmax.xlane.f32.xlu0 %v1677_v20  ;;  %1538 = vst.msk [vmem:[#allocation3 + $0x40] sm:$0xff] %vm1284_vm7, %v6022_v16 }
 0x2c8   : > { %v6075_v20 = vpop.f32.mrf.mxu2 }
 0x2c9   : > { %v1680_v40 = vsel %vm899_vm6, %v6075_v20, -inf }
 0x2ca   : > { %1019 = vperm.xlu2 %5209, %v949_v36  }
 0x2cc   : > { %v929_v27 = vpop.xlane.xlu0 %928 }
 0x2cd   : > { %v6031_v30 = vmax.f32 %v6028_v25, %v929_v27 }
 0x2cf   : > { %1539 = vst.msk [vmem:[#allocation3 + $0x48] sm:$0xff] %vm1284_vm7, %v6031_v30 }
 0x2d0   : > { %v6089_v38 = vpop.f32.mrf.mxu2 }
 0x2d1   : > { %8137 = vst [vmem:[#allocation19_spill] sm:$0xff] %v6089_v38 }
 0x2d2   : > { %1324 = vperm.xlu2 %5209, %v6035_v33  }
 0x2d4   : > { %v932_v36 = vpop.xlane.xlu1 %931 }
 0x2d5   : > { %v6041_v39 = vmax.f32 %v6038_v34, %v932_v36 }
 0x2d7   : > { %1540 = vst.msk [vmem:[#allocation3 + $0x50] sm:$0xff] %vm1284_vm7, %v6041_v39 }
 0x2d8   : > { %v6095_v50 = vpop.f32.mrf.mxu2 }
 0x2d9   : > { %8138 = vst [vmem:[#allocation20_spill] sm:$0xff] %v6095_v50 }
 0x2da   : > { %1029 = vperm.xlu2 %5209, %v951_v47   ;;  %v6060_v47 = vpop.eup %5230 }
 0x2db   : > { %1329 = vperm.xlu0 %5210, %v6045_v44   ;;  %8136 = vst [vmem:[#allocation18_spill] sm:$0xff] %v6060_v47 }
 0x2dc   : > { %v935_v41 = vpop.xlane.xlu2 %934 }
 0x2dd   : > { %1034 = vperm.xlu1 %5208, %v952_v51   ;;  %v6051_v48 = vmax.f32 %v6047_v54, %v935_v41  ;;  %v1686_v41 = vsel %vm899_vm6, %v6095_v50, -inf }
 0x2df   : > { %1541 = vst.msk [vmem:[#allocation3 + $0x58] sm:$0xff] %vm1284_vm7, %v6051_v48 }
 0x2e0   : > { %v6129_v23 = vpop.f32.mrf.mxu2 }
 0x2e1   : > { %8142 = vst [vmem:[#allocation24_spill] sm:$0xff] %v6129_v23 }
 0x2e3   : > { %1339 = vperm.xlu0 %5210, %v6055_v46  }
 0x2e4   : > { %v938_v2 = vpop.xlane.xlu0 %937 }
 0x2e5   : > { %1334 = vperm.xlu1 %5208, %v6060_v47   ;;  %v6064_v51 = vmax.f32 %v6057_v60, %v938_v2  ;;  %v1683_v2 = vsel %vm899_vm6, %v6089_v38, -inf }
 0x2e7   : > { %1542 = vst.msk [vmem:[#allocation3 + $0x60] sm:$0xff] %vm1284_vm7, %v6064_v51 }
 0x2ec   : > { %v941_v11 = vpop.xlane.xlu1 %940 }
 0x2ed   : > { %v6071_v13 = vmax.f32 %v6068_v7, %v941_v11  ;;  %v971_v11 = vsub.f32 %v6008_v0, %v6011_v3 }
 0x2ef   : > { %1543 = vst.msk [vmem:[#allocation3 + $0x68] sm:$0xff] %vm1284_vm7, %v6071_v13 }
 0x2f4   : > { %v944_v27 = vpop.xlane.xlu2 %943 }
 0x2f5   : > { %v6082_v35 = vmax.f32 %v6079_v26, %v944_v27  ;;  %v969_v27 = vsub.f32 %v5988_v52, %v5991_v55 }
 0x2f7   : > { %1544 = vst.msk [vmem:[#allocation3 + $0x70] sm:$0xff] %vm1284_vm7, %v6082_v35  ;;  %v990_v14 = vmul.f32 1.442695, %v969_v27 }
 0x2fc   : > { %v947_v31 = vpop.xlane.xlu0 %946 }
 0x2fd   : > { %v6085_v36 = vmax.f32 %v6077_v24, %v947_v31  ;;  %v994_v31 = vmul.f32 1.442695, %v971_v11 }
 0x2ff   : > { %1545 = vst.msk [vmem:[#allocation3 + $0x78] sm:$0xff] %vm1284_vm7, %v6085_v36  ;;  %5232 = vpow2.f32 %v994_v31 }
 0x300   : > { %5234 = vpow2.f32 %v990_v14 }
 0x303   : > { %1681 = vmax.xlane.f32.xlu2 %v1680_v40 }
 0x304   : > { %v1015_v14 = vpop.permute.xlu1 %1014 }
 0x305   : > { %v6106_v40 = vpop.eup %5232 }
 0x306   : > { %8139 = vst [vmem:[#allocation21_spill] sm:$0xff] %v6106_v40 }
 0x30d   : > { %1687 = vmax.xlane.f32.xlu0 %v1686_v41  ;;  %v970_v41 = vsub.f32 %v5999_v59, %v6002_v62  ;;  %v1092_v59 = vsub.f32 %v5882_v45, %v1015_v14  ;;  %v6133_v45 = vld [vmem:[#allocation3 + $0x8] sm:$0xff] }
 0x30f   : > { %1684 = vmax.xlane.f32.xlu1 %v1683_v2  ;;  %v6111_v2 = vpop.eup %5234  ;;  %v992_v0 = vmul.f32 1.442695, %v970_v41  ;;  %v6126_v41 = vpop.permute.xlu1 %1319 }
 0x310   : > { %8140 = vst [vmem:[#allocation22_spill] sm:$0xff] %v6111_v2 }
 0x311   : > { %5236 = vpow2.f32 %v992_v0 }
 0x317   : > { %v6124_v31 = vpop.eup %5236 }
 0x318   : > { %8141 = vst [vmem:[#allocation23_spill] sm:$0xff] %v6124_v31 }
 0x31b   : > { %1039 = vperm.xlu2 %5209, %v5991_v55  }
 0x321   : > { %1354 = vperm.xlu0 %5210, %v6106_v40  }
 0x323   : > { %1344 = vperm.xlu2 %5209, %v6111_v2  }
 0x325   : > { %v1673_v52 = vpop.xlane.xlu2 %1672 }
 0x326   : > { %v6117_v11 = vmax.f32 %v6114_v43, %v1673_v52  ;;  %v1025_v52 = vpop.permute.xlu0 %1024 }
 0x328   : > { %2366 = vst.msk [vmem:[#allocation3] sm:$0xff] %vm2055_vm8, %v6117_v11  ;;  %1044 = vperm.xlu1 %5208, %v6002_v62  }
 0x32d   : > { %v1020_v55 = vpop.permute.xlu2 %1019 }
 0x32e   : > { %v1093_v27 = vsub.f32 %v5887_v49, %v1020_v55  ;;  %v6140_v55 = vld [vmem:[#allocation3 + $0x10] sm:$0xff] }
 0x330   : > { %v1108_v32 = vpack.c.bf16 %v1093_v27, %v1092_v59  ;;  %1349 = vperm.xlu1 %5208, %v6124_v31   ;;  %v6145_v27 = vpop.f32.mrf.mxu2  ;;  %v6279_v31 = vld [vmem:[#allocation3 + $0x38] sm:$0xff] }
 0x331   : > { %8143 = vst [vmem:[#allocation25_spill] sm:$0xff] %v6145_v27 }
 0x332   : > { %v1116_v21 = vunpack.c.l.bf16 %v1108_v32  ;;  %v1117_v37 = vunpack.c.h.bf16 %v1108_v32 }
 0x334   : > { %v1132_v17 = vmul.f32 1.442695, %v1116_v21  ;;  %v1134_v62 = vmul.f32 1.442695, %v1117_v37 }
 0x335   : > { %v6131_v0 = vpop.permute.xlu2 %1324 }
 0x336   : > { %5238 = vpow2.f32 %v1132_v17 }
 0x337   : > { %5240 = vpow2.f32 %v1134_v62  ;;  %v1676_v49 = vpop.xlane.xlu1 %1675  ;;  %v1094_v62 = vsub.f32 %v5892_v53, %v1025_v52  ;;  %v1689_v53 = vsel %vm899_vm6, %v6129_v23, -inf  ;;  %v1303_v23 = vld [vmem:[#allocation5 + $0x10] sm:$0xff] }
 0x338   : > { %v6136_v14 = vmax.f32 %v6133_v45, %v1676_v49  ;;  %v6155_v46 = vpop.f32.mrf.mxu2 }
 0x339   : > { %8144 = vst [vmem:[#allocation26_spill] sm:$0xff] %v6155_v46  ;;  %v1695_v38 = vsel %vm899_vm6, %v6155_v46, -inf }
 0x33a   : > { %2367 = vst.msk [vmem:[#allocation3 + $0x8] sm:$0xff] %vm2055_vm8, %v6136_v14  ;;  %v1679_v32 = vpop.xlane.xlu0 %1678 }
 0x33b   : > { %v6143_v59 = vmax.f32 %v6140_v55, %v1679_v32 }
 0x33c   : > { %v5239_v21 = vpop.eup %5238 }
 0x33d   : > { %v5241_v37 = vpop.eup %5240  ;;  %2368 = vst.msk [vmem:[#allocation3 + $0x10] sm:$0xff] %vm2055_vm8, %v6143_v59  ;;  %v1030_v17 = vpop.permute.xlu2 %1029 }
 0x33e   : > { %v1095_v49 = vsub.f32 %v5897_v56, %v1030_v17  ;;  %v6151_v28 = vpack.c.bf16 %v5241_v37, %v5239_v21  ;;  %v973_v17 = vsub.f32 %v6028_v25, %v6031_v30 }
 0x340   : > { %v1109_v18 = vpack.c.bf16 %v1095_v49, %v1094_v62  ;;  %4973 = vmatmul.msk.bf16.vlgmr.msra.gmra.mxu1 %vm899_vm6, %v6151_v28 }
 0x342   : > { %v1118_v32 = vunpack.c.l.bf16 %v1109_v18  ;;  %v1119_v2 = vunpack.c.h.bf16 %v1109_v18  ;;  %v974_v18 = vsub.f32 %v6038_v34, %v6041_v39 }
 0x344   : > { %v1136_v40 = vmul.f32 1.442695, %v1118_v32  ;;  %v1138_v47 = vmul.f32 1.442695, %v1119_v2 }
 0x346   : > { %5242 = vpow2.f32 %v1136_v40  ;;  %v1000_v40 = vmul.f32 1.442695, %v974_v18 }
 0x347   : > { %5244 = vpow2.f32 %v1138_v47  ;;  %v1692_v47 = vsel %vm899_vm6, %v6145_v27, -inf }
 0x348   : > { %5246 = vpow2.f32 %v1000_v40  ;;  %v6202_v40 = vld [vmem:[#allocation3 + $0x28] sm:$0xff] }
 0x34b   : > { %1696 = vmax.xlane.f32.xlu0 %v1695_v38  ;;  %v972_v38 = vsub.f32 %v6015_v5, %v6022_v16  ;;  %v998_v5 = vmul.f32 1.442695, %v973_v17 }
 0x34c   : > { %v5243_v56 = vpop.eup %5242  ;;  %1690 = vmax.xlane.f32.xlu2 %v1689_v53 }
 0x34d   : > { %v5245_v52 = vpop.eup %5244  ;;  %v996_v2 = vmul.f32 1.442695, %v972_v38  ;;  %v6181_v62 = vpop.permute.xlu0 %1329 }
 0x34e   : > { %v6161_v21 = vpack.c.bf16 %v5245_v52, %v5243_v56  ;;  %v6173_v37 = vpop.eup %5246  ;;  %v6191_v52 = vpop.f32.mrf.mxu2 }
 0x34f   : > { %5248 = vpow2.f32 %v996_v2  ;;  %8145 = vst [vmem:[#allocation27_spill] sm:$0xff] %v6173_v37  ;;  %v1035_v49 = vpop.permute.xlu1 %1034 }
 0x350   : > { %4974 = vmatmul.msk.bf16.gmra.mxu1 %vm899_vm6, %v6161_v21  ;;  %5250 = vpow2.f32 %v998_v5  ;;  %8147 = vst [vmem:[#allocation29_spill] sm:$0xff] %v6191_v52  ;;  %v1096_v18 = vsub.f32 %v5902_v58, %v1035_v49  ;;  %v6207_v5 = vld [vmem:[#allocation3 + $0x20] sm:$0xff] }
 0x355   : > { %v6176_v34 = vpop.eup %5248  ;;  %v6189_v56 = vpop.permute.xlu0 %1339 }
 0x356   : > { %8146 = vst [vmem:[#allocation28_spill] sm:$0xff] %v6176_v34  ;;  %v6195_v25 = vpop.eup %5250 }
 0x357   : > { %8148 = vst [vmem:[#allocation30_spill] sm:$0xff] %v6195_v25 }
 0x35a   : > { %1693 = vmax.xlane.f32.xlu1 %v1692_v47 }
 0x35f   : > { %1059 = vperm.xlu0 %5210, %v6031_v30   ;;  %v6197_v30 = vpop.permute.xlu1 %1334 }
 0x364   : > { %1049 = vperm.xlu2 %5209, %v6011_v3   ;;  %v6184_v3 = vld [vmem:[#allocation3 + $0x18] sm:$0xff] }
 0x367   : > { %1369 = vperm.xlu0 %5210, %v6173_v37  }
 0x36c   : > { %1359 = vperm.xlu2 %5209, %v6176_v34   ;;  %v6209_v34 = vpop.f32.mrf.mxu2 }
 0x36d   : > { %8149 = vst [vmem:[#allocation31_spill] sm:$0xff] %v6209_v34 }
 0x373   : > { %1054 = vperm.xlu1 %5208, %v6022_v16  }
 0x376   : > { %v1682_v32 = vpop.xlane.xlu2 %1681 }
 0x377   : > { %v6187_v53 = vmax.f32 %v6184_v3, %v1682_v32 }
 0x379   : > { %2369 = vst.msk [vmem:[#allocation3 + $0x18] sm:$0xff] %vm2055_vm8, %v6187_v53 }
 0x37b   : > { %1364 = vperm.xlu1 %5208, %v6195_v25  }
 0x37e   : > { %v1040_v16 = vpop.permute.xlu2 %1039 }
 0x37f   : > { %v1097_v47 = vsub.f32 %v5906_v61, %v1040_v16 }
 0x380   : > { %v1688_v38 = vpop.xlane.xlu0 %1687 }
 0x381   : > { %v1110_v2 = vpack.c.bf16 %v1097_v47, %v1096_v18  ;;  %v6205_v17 = vmax.f32 %v6202_v40, %v1688_v38  ;;  %v6218_v18 = vpop.f32.mrf.mxu2 }
 0x382   : > { %v1685_v32 = vpop.xlane.xlu1 %1684  ;;  %8150 = vst [vmem:[#allocation32_spill] sm:$0xff] %v6218_v18 }
 0x383   : > { %v1120_v37 = vunpack.c.l.bf16 %v1110_v2  ;;  %v1121_v46 = vunpack.c.h.bf16 %v1110_v2  ;;  %2371 = vst.msk [vmem:[#allocation3 + $0x28] sm:$0xff] %vm2055_vm8, %v6205_v17  ;;  %v6214_v58 = vmax.f32 %v6207_v5, %v1685_v32  ;;  %v1704_v2 = vsel %vm899_vm6, %v6218_v18, -inf }
 0x385   : > { %v1140_v61 = vmul.f32 1.442695, %v1120_v37  ;;  %v1142_v49 = vmul.f32 1.442695, %v1121_v46  ;;  %2370 = vst.msk [vmem:[#allocation3 + $0x20] sm:$0xff] %vm2055_vm8, %v6214_v58  ;;  %v1698_v46 = vsel %vm899_vm6, %v6191_v52, -inf  ;;  %v977_v37 = vsub.f32 %v6068_v7, %v6071_v13 }
 0x387   : > { %5252 = vpow2.f32 %v1140_v61  ;;  %v1006_v32 = vmul.f32 1.442695, %v977_v37  ;;  %v1701_v61 = vsel %vm899_vm6, %v6209_v34, -inf  ;;  %v6246_v37 = vpop.permute.xlu2 %1344 }
 0x388   : > { %5254 = vpow2.f32 %v1142_v49  ;;  %v975_v49 = vsub.f32 %v6047_v54, %v6051_v48  ;;  %v1301_v54 = vld [vmem:[#allocation5] sm:$0xff] }
 0x389   : > { %5256 = vpow2.f32 %v1006_v32 }
 0x38d   : > { %v5253_v16 = vpop.eup %5252 }
 0x38e   : > { %v5255_v47 = vpop.eup %5254 }
 0x38f   : > { %v6220_v38 = vpack.c.bf16 %v5255_v47, %v5253_v16  ;;  %v1002_v16 = vmul.f32 1.442695, %v975_v49  ;;  %v6235_v47 = vpop.eup %5256  ;;  %v1397_v49 = vmul.f32 %v6126_v41, %v1301_v54 }
 0x390   : > { %8151 = vst [vmem:[#allocation33_spill] sm:$0xff] %v6235_v47 }
 0x391   : > { %4975 = vmatmul.msk.bf16.gmra.mxu1 %vm899_vm6, %v6220_v38  ;;  %1705 = vmax.xlane.f32.xlu0 %v1704_v2  ;;  %5258 = vpow2.f32 %v1002_v16  ;;  %v6250_v16 = vld [vmem:[#allocation3 + $0x40] sm:$0xff] }
 0x393   : > { %v6242_v2 = vpop.permute.xlu0 %1354 }
 0x395   : > { %1699 = vmax.xlane.f32.xlu2 %v1698_v46  ;;  %v976_v46 = vsub.f32 %v6057_v60, %v6064_v51  ;;  %v6257_v60 = vld [vmem:[#allocation3 + $0x30] sm:$0xff] }
 0x397   : > { %v6239_v7 = vpop.eup %5258  ;;  %v1004_v32 = vmul.f32 1.442695, %v976_v46  ;;  %v1302_v46 = vld [vmem:[#allocation5 + $0x8] sm:$0xff] }
 0x398   : > { %8152 = vst [vmem:[#allocation34_spill] sm:$0xff] %v6239_v7 }
 0x399   : > { %5260 = vpow2.f32 %v1004_v32 }
 0x39f   : > { %v6268_v54 = vpop.eup %5260 }
 0x3a0   : > { %8153 = vst [vmem:[#allocation35_spill] sm:$0xff] %v6268_v54 }
 0x3a5   : > { %1702 = vmax.xlane.f32.xlu1 %v1701_v61  ;;  %1074 = vperm.xlu0 %5210, %v6064_v51   ;;  %v1045_v61 = vpop.permute.xlu1 %1044 }
 0x3ad   : > { %1064 = vperm.xlu2 %5209, %v6041_v39   ;;  %1384 = vperm.xlu0 %5210, %v6235_v47  }
 0x3b5   : > { %1374 = vperm.xlu2 %5209, %v6239_v7   ;;  %v6252_v7 = vpop.f32.mrf.mxu2 }
 0x3bd   : > { %v1458_v39 = vpop.f32.mrf.mxu1  ;;  %v6276_v52 = vpop.f32.mrf.mxu2 }
 0x3be   : > { %v1498_v18 = vadd.f32 %v1458_v39, %v1397_v49  ;;  %1069 = vperm.xlu1 %5208, %v6051_v48   ;;  %v1697_v47 = vpop.xlane.xlu0 %1696  ;;  %v1398_v48 = vmul.f32 %v6131_v0, %v1302_v46  ;;  %v1098_v39 = vsub.f32 %v5911_v1, %v1045_v61  ;;  %v1399_v0 = vmul.f32 %v6181_v62, %v1303_v23 }
 0x3bf   : > { %v6255_v34 = vmax.f32 %v6250_v16, %v1697_v47  ;;  %v1691_v51 = vpop.xlane.xlu2 %1690  ;;  %v6270_v47 = vpop.permute.xlu1 %1349 }
 0x3c0   : > { %1514 = vst.msk [vmem:[#allocation5] sm:$0xff] %vm797_vm5, %v1498_v18  ;;  %v6261_v41 = vmax.f32 %v6257_v60, %v1691_v51 }
 0x3c1   : > { %2374 = vst.msk [vmem:[#allocation3 + $0x40] sm:$0xff] %vm2055_vm8, %v6255_v34 }
 0x3c2   : > { %2372 = vst.msk [vmem:[#allocation3 + $0x30] sm:$0xff] %vm2055_vm8, %v6261_v41 }
 0x3c5   : > { %v1460_v32 = vpop.f32.mrf.mxu1  ;;  %v6287_v23 = vpop.f32.mrf.mxu2 }
 0x3c6   : > { %v1499_v49 = vadd.f32 %v1460_v32, %v1398_v48  ;;  %1379 = vperm.xlu1 %5208, %v6268_v54  }
 0x3c7   : > { %v1050_v18 = vpop.permute.xlu2 %1049 }
 0x3c8   : > { %1515 = vst.msk [vmem:[#allocation5 + $0x8] sm:$0xff] %vm797_vm5, %v1499_v49  ;;  %v1099_v51 = vsub.f32 %v5915_v4, %v1050_v18  ;;  %v1304_v4 = vld [vmem:[#allocation5 + $0x18] sm:$0xff] }
 0x3ca   : > { %v1111_v27 = vpack.c.bf16 %v1099_v51, %v1098_v39 }
 0x3cc   : > { %v1122_v46 = vunpack.c.l.bf16 %v1111_v27  ;;  %v1123_v25 = vunpack.c.h.bf16 %v1111_v27  ;;  %v1400_v27 = vmul.f32 %v6197_v30, %v1304_v4 }
 0x3cd   : > { %v1463_v50 = vpop.f32.mrf.mxu1  ;;  %v1694_v48 = vpop.xlane.xlu1 %1693 }
 0x3ce   : > { %v1144_v32 = vmul.f32 1.442695, %v1122_v46  ;;  %v1146_v54 = vmul.f32 1.442695, %v1123_v25  ;;  %v1500_v42 = vadd.f32 %v1463_v50, %v1399_v0  ;;  %v6282_v1 = vmax.f32 %v6279_v31, %v1694_v48 }
 0x3cf   : > { %v1713_v50 = vsel %vm899_vm6, %v6287_v23, -inf }
 0x3d0   : > { %5262 = vpow2.f32 %v1144_v32  ;;  %1516 = vst.msk [vmem:[#allocation5 + $0x10] sm:$0xff] %vm797_vm5, %v1500_v42 }
 0x3d1   : > { %5264 = vpow2.f32 %v1146_v54  ;;  %2373 = vst.msk [vmem:[#allocation3 + $0x38] sm:$0xff] %vm2055_vm8, %v6282_v1  ;;  %v1707_v54 = vsel %vm899_vm6, %v6252_v7, -inf  ;;  %v1060_v30 = vpop.permute.xlu0 %1059 }
 0x3d2   : > { %v1101_v39 = vsub.f32 %v5924_v8, %v1060_v30  ;;  %v1710_v8 = vsel %vm899_vm6, %v6276_v52, -inf }
 0x3d5   : > { %v1465_v62 = vpop.f32.mrf.mxu1 }
 0x3d6   : > { %v5263_v61 = vpop.eup %5262  ;;  %v1501_v49 = vadd.f32 %v1465_v62, %v1400_v27  ;;  %v1735_v27 = vsub.f32 %v6114_v43, %v6117_v11  ;;  %v978_v62 = vsub.f32 %v6079_v26, %v6082_v35  ;;  %v1738_v43 = vsub.f32 %v6184_v3, %v6187_v53  ;;  %v6324_v3 = vpop.permute.xlu2 %1359 }
 0x3d7   : > { %v5265_v25 = vpop.eup %5264  ;;  %1714 = vmax.xlane.f32.xlu0 %v1713_v50 }
 0x3d8   : > { %1517 = vst.msk [vmem:[#allocation5 + $0x18] sm:$0xff] %vm797_vm5, %v1501_v49  ;;  %v6293_v42 = vpack.c.bf16 %v5265_v25, %v5263_v61  ;;  %v1008_v61 = vmul.f32 1.442695, %v978_v62  ;;  %v5615_v49 = vmov 1   ;;  %v979_v62 = vsub.f32 %v6077_v24, %v6085_v36 }
 0x3da   : > { %4976 = vmatmul.msk.bf16.gmra.mxu1 %vm899_vm6, %v6293_v42 }
 0x3de   : > { %1708 = vmax.xlane.f32.xlu2 %v1707_v54  ;;  %v1757_v54 = vmul.f32 1.442695, %v1738_v43  ;;  %v1306_v43 = vld [vmem:[#allocation5 + $0x28] sm:$0xff] }
 0x3e5   : > { %v1055_v18 = vpop.permute.xlu1 %1054 }
 0x3e6   : > { %v1100_v51 = vsub.f32 %v5920_v6, %v1055_v18  ;;  %v1751_v6 = vmul.f32 1.442695, %v1735_v27  ;;  %v6318_v18 = vpop.permute.xlu0 %1369  ;;  %v1305_v27 = vld [vmem:[#allocation5 + $0x20] sm:$0xff] }
 0x3e8   : > { %v1112_v0 = vpack.c.bf16 %v1101_v39, %v1100_v51  ;;  %v6329_v51 = vld [vmem:[#allocation3 + $0x58] sm:$0xff] }
 0x3ea   : > { %v1124_v46 = vunpack.c.l.bf16 %v1112_v0  ;;  %v1125_v48 = vunpack.c.h.bf16 %v1112_v0 }
 0x3eb   : > { %1089 = vperm.xlu0 %5210, %v6085_v36  }
 0x3ec   : > { %v1148_v32 = vmul.f32 1.442695, %v1124_v46  ;;  %v1150_v4 = vmul.f32 1.442695, %v1125_v48  ;;  %v6336_v48 = vld [vmem:[#allocation3 + $0x48] sm:$0xff] }
 0x3ee   : > { %5266 = vpow2.f32 %v1148_v32 }
 0x3ef   : > { %5268 = vpow2.f32 %v1150_v4 }
 0x3f0   : > { %1711 = vmax.xlane.f32.xlu1 %v1710_v8  ;;  %5270 = vpow2.f32 %v1751_v6  ;;  %v1401_v8 = vmul.f32 %v6189_v56, %v1305_v27  ;;  %v8157_v27 = vmov 0  }
 0x3f1   : > { %5272 = vpow2.f32 %v1008_v61 }
 0x3f2   : > { %5274 = vpow2.f32 %v1757_v54 }
 0x3f3   : > { %5212 = vset.pattern.permute.xlu0 %v5615_v49 }
 0x3f4   : > { %v5267_v50 = vpop.eup %5266  ;;  %1790 = vperm.xlu0 %5212, %v6136_v14  }
 0x3f5   : > { %v5269_v25 = vpop.eup %5268 }
 0x3f6   : > { %1079 = vperm.xlu2 %5209, %v6071_v13   ;;  %v6312_v26 = vpack.c.bf16 %v5269_v25, %v5267_v50  ;;  %v6316_v30 = vpop.eup %5270  ;;  %v1010_v50 = vmul.f32 1.442695, %v979_v62  ;;  %v6347_v25 = vpop.permute.xlu1 %1364  ;;  %v1174_v62 = vunpack.c.l.bf16 %v6161_v21 }
 0x3f7   : > { %8154 = vst [vmem:[#allocation36_spill] sm:$0xff] %v6316_v30  ;;  %v6321_v39 = vpop.eup %5272 }
 0x3f8   : > { %4977 = vmatmul.msk.bf16.gmra.mxu1 %vm899_vm6, %v6312_v26  ;;  %8155 = vst [vmem:[#allocation37_spill] sm:$0xff] %v6321_v39  ;;  %v6326_v13 = vpop.eup %5274  ;;  %5276 = vpow2.f32 %v1010_v50 }
 0x3f9   : > { %8156 = vst [vmem:[#allocation38_spill] sm:$0xff] %v6326_v13 }
 0x3fc   : > { %2090 = vperm.xlu0 %5212, %v6316_v30  }
 0x3fe   : > { %1389 = vperm.xlu2 %5209, %v6321_v39   ;;  %v6358_v56 = vpop.eup %5276 }
 0x404   : > { %2105 = vperm.xlu0 %5212, %v6326_v13   ;;  %v1706_v0 = vpop.xlane.xlu0 %1705  ;;  %v1736_v13 = vsub.f32 %v6133_v45, %v6136_v14 }
 0x405   : > { %v6332_v46 = vmax.f32 %v6329_v51, %v1706_v0 }
 0x406   : > { %5214 = vset.pattern.permute.xlu2 %v5615_v49 }
 0x407   : > { %2377 = vst.msk [vmem:[#allocation3 + $0x58] sm:$0xff] %vm2055_vm8, %v6332_v46 }
 0x408   : > { %v1700_v32 = vpop.xlane.xlu2 %1699 }
 0x409   : > { %v6339_v4 = vmax.f32 %v6336_v48, %v1700_v32  ;;  %1084 = vperm.xlu1 %5208, %v6082_v35   ;;  %v1402_v35 = vmul.f32 %v6246_v37, %v1306_v43  ;;  %v6352_v32 = vld [vmem:[#allocation3 + $0x50] sm:$0xff] }
 0x40b   : > { %2375 = vst.msk [vmem:[#allocation3 + $0x48] sm:$0xff] %vm2055_vm8, %v6339_v4 }
 0x40e   : > { %v1468_v6 = vpop.f32.mrf.mxu1 }
 0x40f   : > { %v1502_v61 = vadd.f32 %v1468_v6, %v1401_v8  ;;  %v1194_v8 = vsel %vm899_vm6, %v1174_v62, 0.0 }
 0x410   : > { %v1065_v6 = vpop.permute.xlu2 %1064 }
 0x411   : > { %1518 = vst.msk [vmem:[#allocation5 + $0x20] sm:$0xff] %vm797_vm5, %v1502_v61  ;;  %5211 = vset.pattern.permute.xlu1 %v5615_v49  ;;  %v1102_v50 = vsub.f32 %v5929_v10, %v1065_v6 }
 0x412   : > { %1785 = vperm.xlu1 %5211, %v6117_v11   ;;  %v6364_v11 = vpop.f32.mrf.mxu2 }
 0x413   : > { %8158 = vst [vmem:[#allocation39_spill] sm:$0xff] %v6364_v11  ;;  %v1716_v37 = vsel %vm899_vm6, %v6364_v11, -inf }
 0x416   : > { %v1470_v54 = vpop.f32.mrf.mxu1 }
 0x417   : > { %v1503_v0 = vadd.f32 %v1470_v54, %v1402_v35  ;;  %v1740_v35 = vsub.f32 %v6202_v40, %v6205_v17  ;;  %v1075_v62 = vpop.permute.xlu0 %1074  ;;  %v1173_v40 = vunpack.c.h.bf16 %v6151_v28 }
 0x418   : > { %v1703_v24 = vpop.xlane.xlu1 %1702 }
 0x419   : > { %1519 = vst.msk [vmem:[#allocation5 + $0x28] sm:$0xff] %vm797_vm5, %v1503_v0  ;;  %v6356_v36 = vmax.f32 %v6352_v32, %v1703_v24  ;;  %v1761_v24 = vmul.f32 1.442695, %v1740_v35  ;;  %v1191_v45 = vsel %vm899_vm6, %v1173_v40, 0.0 }
 0x41a   : > { %5213 = vset.pattern.permute.xlu1 %v8157_v27 }
 0x41b   : > { %2376 = vst.msk [vmem:[#allocation3 + $0x50] sm:$0xff] %vm2055_vm8, %v6356_v36  ;;  %1394 = vperm.xlu1 %5213, %v6358_v56  }
 0x423   : > { %5215 = vset.pattern.permute.xlu1 %v5615_v49 }
 0x427   : > { %1717 = vmax.xlane.f32.xlu2 %v1716_v37 }
 0x42e   : > { %1195 = vadd.xlane.f32.xlu0 %v1194_v8  ;;  %v1753_v8 = vmul.f32 1.442695, %v1736_v13  ;;  %v6391_v13 = vpop.permute.xlu2 %1374 }
 0x430   : > { %v1070_v61 = vpop.permute.xlu1 %1069 }
 0x431   : > { %v1103_v43 = vsub.f32 %v5933_v12, %v1070_v61 }
 0x433   : > { %v1113_v54 = vpack.c.bf16 %v1103_v43, %v1102_v50  ;;  %v6382_v50 = vpop.permute.xlu0 %1384  ;;  %v6394_v43 = vld [vmem:[#allocation3 + $0x70] sm:$0xff] }
 0x435   : > { %v1126_v49 = vunpack.c.l.bf16 %v1113_v54  ;;  %v1127_v0 = vunpack.c.h.bf16 %v1113_v54 }
 0x437   : > { %v1152_v27 = vmul.f32 1.442695, %v1126_v49  ;;  %v1154_v37 = vmul.f32 1.442695, %v1127_v0  ;;  %v6401_v49 = vld [vmem:[#allocation3 + $0x60] sm:$0xff] }
 0x438   : > { %v6414_v39 = vpop.permute.xlu1 %1379 }
 0x439   : > { %5278 = vpow2.f32 %v1152_v27  ;;  %v1307_v27 = vld [vmem:[#allocation5 + $0x30] sm:$0xff] }
 0x43a   : > { %5280 = vpow2.f32 %v1154_v37  ;;  %v1403_v37 = vmul.f32 %v6270_v47, %v1307_v27 }
 0x43b   : > { %5282 = vpow2.f32 %v1761_v24 }
 0x43c   : > { %5284 = vpow2.f32 %v1753_v8  ;;  %v1737_v8 = vsub.f32 %v6140_v55, %v6143_v59 }
 0x43f   : > { %v5279_v10 = vpop.eup %5278  ;;  %1795 = vperm.xlu2 %5214, %v6143_v59  }
 0x440   : > { %v5281_v12 = vpop.eup %5280 }
 0x441   : > { %v6378_v6 = vpop.eup %5282  ;;  %v6380_v61 = vpack.c.bf16 %v5281_v12, %v5279_v10 }
 0x442   : > { %8159 = vst [vmem:[#allocation40_spill] sm:$0xff] %v6378_v6  ;;  %2115 = vperm.xlu0 %5212, %v6378_v6   ;;  %v6388_v14 = vpop.eup %5284  ;;  %v1308_v6 = vld [vmem:[#allocation5 + $0x38] sm:$0xff] }
 0x443   : > { %4978 = vmatmul.msk.bf16.gmra.mxu1 %vm899_vm6, %v6380_v61  ;;  %v1404_v11 = vmul.f32 %v6242_v2, %v1308_v6  ;;  %v1172_v6 = vunpack.c.l.bf16 %v6151_v28  ;;  %v1743_v28 = vsub.f32 %v6250_v16, %v6255_v34 }
 0x445   : > { %1192 = vadd.xlane.f32.xlu1 %v1191_v45  ;;  %v1104_v45 = vsub.f32 %v5941_v15, %v1075_v62 }
 0x447   : > { %2095 = vperm.xlu2 %5214, %v6388_v14  }
 0x44a   : > { %1825 = vperm.xlu0 %5212, %v6255_v34   ;;  %v1715_v35 = vpop.xlane.xlu0 %1714 }
 0x44b   : > { %v6397_v54 = vmax.f32 %v6394_v43, %v1715_v35 }
 0x44d   : > { %2380 = vst.msk [vmem:[#allocation3 + $0x70] sm:$0xff] %vm2055_vm8, %v6397_v54 }
 0x451   : > { %v1709_v0 = vpop.xlane.xlu2 %1708 }
 0x452   : > { %v6404_v24 = vmax.f32 %v6401_v49, %v1709_v0  ;;  %v1755_v0 = vmul.f32 1.442695, %v1737_v8 }
 0x454   : > { %2378 = vst.msk [vmem:[#allocation3 + $0x60] sm:$0xff] %vm2055_vm8, %v6404_v24  ;;  %5286 = vpow2.f32 %v1755_v0 }
 0x457   : > { %v1473_v10 = vpop.f32.mrf.mxu1 }
 0x458   : > { %v1504_v12 = vadd.f32 %v1473_v10, %v1403_v37  ;;  %v1188_v10 = vsel %vm899_vm6, %v1172_v6, 0.0 }
 0x459   : > { %v1080_v40 = vpop.permute.xlu2 %1079 }
 0x45a   : > { %1520 = vst.msk [vmem:[#allocation5 + $0x30] sm:$0xff] %vm797_vm5, %v1504_v12  ;;  %v1105_v35 = vsub.f32 %v5950_v19, %v1080_v40  ;;  %v6419_v19 = vld [vmem:[#allocation3 + $0x68] sm:$0xff]  ;;  %v6424_v2 = vpop.eup %5286  ;;  %v1178_v12 = vunpack.c.l.bf16 %v6293_v42  ;;  %v1309_v40 = vld [vmem:[#allocation5 + $0x40] sm:$0xff] }
 0x45c   : > { %v1114_v30 = vpack.c.bf16 %v1105_v35, %v1104_v45  ;;  %v1206_v45 = vsel %vm899_vm6, %v1178_v12, 0.0  ;;  %v1405_v35 = vmul.f32 %v6324_v3, %v1309_v40 }
 0x45e   : > { %v1128_v47 = vunpack.c.l.bf16 %v1114_v30  ;;  %v1129_v27 = vunpack.c.h.bf16 %v1114_v30  ;;  %1800 = vperm.xlu1 %5215, %v6187_v53  }
 0x45f   : > { %v1475_v55 = vpop.f32.mrf.mxu1 }
 0x460   : > { %v1156_v59 = vmul.f32 1.442695, %v1128_v47  ;;  %v1158_v37 = vmul.f32 1.442695, %v1129_v27  ;;  %v1505_v15 = vadd.f32 %v1475_v55, %v1404_v11  ;;  %v1090_v27 = vpop.permute.xlu0 %1089 }
 0x462   : > { %5288 = vpow2.f32 %v1156_v59  ;;  %1521 = vst.msk [vmem:[#allocation5 + $0x38] sm:$0xff] %vm797_vm5, %v1505_v15 }
 0x463   : > { %5290 = vpow2.f32 %v1158_v37  ;;  %v1712_v62 = vpop.xlane.xlu1 %1711  ;;  %v1107_v37 = vsub.f32 %v5966_v29, %v1090_v27 }
 0x464   : > { %v6422_v8 = vmax.f32 %v6419_v19, %v1712_v62  ;;  %v1767_v62 = vmul.f32 1.442695, %v1743_v28 }
 0x466   : > { %2379 = vst.msk [vmem:[#allocation3 + $0x68] sm:$0xff] %vm2055_vm8, %v6422_v8  ;;  %2100 = vperm.xlu1 %5215, %v6424_v2   ;;  %5292 = vpow2.f32 %v1767_v62 }
 0x468   : > { %v5289_v53 = vpop.eup %5288  ;;  %v1791_v12 = vpop.permute.xlu0 %1790 }
 0x469   : > { %v5291_v30 = vpop.eup %5290 }
 0x46a   : > { %v6429_v11 = vpack.c.bf16 %v5291_v30, %v5289_v53 }
 0x46c   : > { %4979 = vmatmul.msk.bf16.gmra.mxu1 %vm899_vm6, %v6429_v11 }
 0x46e   : > { %1810 = vperm.xlu1 %5215, %v6205_v17   ;;  %v1310_v17 = vld [vmem:[#allocation5 + $0x48] sm:$0xff] }
 0x46f   : > { %v1406_v59 = vmul.f32 %v6347_v25, %v1310_v17  ;;  %v1864_v25 = vsub.f32 %v6006_v63, %v1791_v12  ;;  %v6458_v63 = vpop.permute.xlu2 %1389  ;;  %v1238_v12 = vld [vmem:[#allocation4 + $0x10] sm:$0xff] }
 0x470   : > { %1189 = vadd.xlane.f32.xlu2 %v1188_v10 }
 0x474   : > { %1207 = vadd.xlane.f32.xlu0 %v1206_v45 }
 0x475   : > { %v1478_v0 = vpop.f32.mrf.mxu1 }
 0x476   : > { %v1506_v47 = vadd.f32 %v1478_v0, %v1405_v35 }
 0x478   : > { %1522 = vst.msk [vmem:[#allocation5 + $0x40] sm:$0xff] %vm797_vm5, %v1506_v47 }
 0x47b   : > { %v1085_v55 = vpop.permute.xlu1 %1084 }
 0x47c   : > { %v1106_v15 = vsub.f32 %v5958_v22, %v1085_v55  ;;  %v6448_v22 = vpop.eup %5292 }
 0x47d   : > { %v1480_v53 = vpop.f32.mrf.mxu1 }
 0x47e   : > { %v1115_v3 = vpack.c.bf16 %v1107_v37, %v1106_v15  ;;  %v1507_v30 = vadd.f32 %v1480_v53, %v1406_v59  ;;  %v1176_v37 = vunpack.c.l.bf16 %v6220_v38 }
 0x480   : > { %v1130_v6 = vunpack.c.l.bf16 %v1115_v3  ;;  %v1131_v10 = vunpack.c.h.bf16 %v1115_v3  ;;  %1523 = vst.msk [vmem:[#allocation5 + $0x48] sm:$0xff] %vm797_vm5, %v1507_v30  ;;  %v1200_v53 = vsel %vm899_vm6, %v1176_v37, 0.0  ;;  %v1311_v37 = vld [vmem:[#allocation5 + $0x50] sm:$0xff] }
 0x482   : > { %v1160_v40 = vmul.f32 1.442695, %v1130_v6  ;;  %v1162_v34 = vmul.f32 1.442695, %v1131_v10  ;;  %v6468_v6 = vld [vmem:[#allocation3 + $0x78] sm:$0xff] }
 0x484   : > { %5294 = vpow2.f32 %v1160_v40  ;;  %v1786_v16 = vpop.permute.xlu1 %1785  ;;  %v1254_v40 = vmul.f32 %v6045_v44, %v1238_v12 }
 0x485   : > { %5296 = vpow2.f32 %v1162_v34  ;;  %v1863_v29 = vsub.f32 %v5995_v57, %v1786_v16  ;;  %v6456_v57 = vpop.permute.xlu0 %2090 }
 0x487   : > { %v1879_v45 = vpack.c.bf16 %v1864_v25, %v1863_v29  ;;  %v1741_v25 = vsub.f32 %v6257_v60, %v6261_v41  ;;  %v1175_v29 = vunpack.c.h.bf16 %v6161_v21 }
 0x488   : > { %1805 = vperm.xlu2 %5214, %v6214_v58   ;;  %2130 = vperm.xlu0 %5212, %v6448_v22  }
 0x489   : > { %v1887_v35 = vunpack.c.l.bf16 %v1879_v45  ;;  %v1888_v0 = vunpack.c.h.bf16 %v1879_v45  ;;  %v1181_v45 = vunpack.c.h.bf16 %v6312_v26 }
 0x48a   : > { %v5295_v47 = vpop.eup %5294 }
 0x48b   : > { %v5297_v27 = vpop.eup %5296  ;;  %v1903_v28 = vmul.f32 1.442695, %v1887_v35  ;;  %v1905_v17 = vmul.f32 1.442695, %v1888_v0  ;;  %v1763_v35 = vmul.f32 1.442695, %v1741_v25 }
 0x48c   : > { %v6452_v55 = vpack.c.bf16 %v5297_v27, %v5295_v47  ;;  %v1197_v47 = vsel %vm899_vm6, %v1175_v29, 0.0  ;;  %v1215_v44 = vsel %vm899_vm6, %v1181_v45, 0.0  ;;  %v1237_v27 = vld [vmem:[#allocation4 + $0x8] sm:$0xff] }
 0x48d   : > { %5298 = vpow2.f32 %v1903_v28  ;;  %v6466_v3 = vpop.permute.xlu0 %2105  ;;  %v6481_v0 = vpop.permute.xlu1 %1394  ;;  %v1253_v28 = vmul.f32 %v6035_v33, %v1237_v27 }
 0x48e   : > { %5300 = vpow2.f32 %v1905_v17  ;;  %4980 = vmatmul.msk.bf16.gmra.mxu1 %vm899_vm6, %v6452_v55 }
 0x48f   : > { %5302 = vpow2.f32 %v1763_v35 }
 0x493   : > { %v5299_v59 = vpop.eup %5298 }
 0x494   : > { %v5301_v15 = vpop.eup %5300 }
 0x495   : > { %v6461_v62 = vpack.c.bf16 %v5301_v15, %v5299_v59  ;;  %v6487_v60 = vpop.eup %5302  ;;  %v1739_v59 = vsub.f32 %v6207_v5, %v6214_v58 }
 0x497   : > { %4989 = vmatmul.msk.bf16.vlgmr.msra.gmra.mxu3 %vm899_vm6, %v6461_v62  ;;  %v1759_v15 = vmul.f32 1.442695, %v1739_v59 }
 0x498   : > { %1201 = vadd.xlane.f32.xlu1 %v1200_v53  ;;  %v1407_v53 = vmul.f32 %v6318_v18, %v1311_v37 }
 0x499   : > { %5304 = vpow2.f32 %v1759_v15 }
 0x49a   : > { %v1718_v30 = vpop.xlane.xlu2 %1717 }
 0x49b   : > { %v6471_v10 = vmax.f32 %v6468_v6, %v1718_v30  ;;  %v1746_v30 = vsub.f32 %v6329_v51, %v6332_v46 }
 0x49d   : > { %2381 = vst.msk [vmem:[#allocation3 + $0x78] sm:$0xff] %vm2055_vm8, %v6471_v10 }
 0x49f   : > { %v6499_v58 = vpop.eup %5304 }
 0x4a1   : > { %v1196_v34 = vpop.xlane.xlu0 %1195 }
 0x4a2   : > { %v1270_v16 = vadd.f32 %v1254_v40, %v1196_v34  ;;  %v1773_v40 = vmul.f32 1.442695, %v1746_v30  ;;  %v1312_v34 = vld [vmem:[#allocation5 + $0x58] sm:$0xff]  ;;  %v1796_v51 = vpop.permute.xlu2 %1795 }
 0x4a3   : > { %v1408_v5 = vmul.f32 %v6391_v13, %v1312_v34  ;;  %v1865_v45 = vsub.f32 %v6017_v9, %v1796_v51  ;;  %v1313_v34 = vld [vmem:[#allocation5 + $0x60] sm:$0xff] }
 0x4a4   : > { %1287 = vst.msk [vmem:[#allocation4 + $0x10] sm:$0xff] %vm1284_vm7, %v1270_v16  ;;  %5306 = vpow2.f32 %v1773_v40  ;;  %v1242_v40 = vld [vmem:[#allocation4 + $0x30] sm:$0xff]  ;;  %v1409_v51 = vmul.f32 %v6414_v39, %v1313_v34  ;;  %v1177_v34 = vunpack.c.h.bf16 %v6220_v38 }
 0x4aa   : > { %v6503_v18 = vpop.eup %5306 }
 0x4b1   : > { %1198 = vadd.xlane.f32.xlu2 %v1197_v47  ;;  %1820 = vperm.xlu1 %5215, %v6282_v1  }
 0x4b2   : > { %1216 = vadd.xlane.f32.xlu0 %v1215_v44 }
 0x4b4   : > { %v6509_v35 = vpop.permute.xlu0 %2115 }
 0x4b8   : > { %v1193_v21 = vpop.xlane.xlu1 %1192 }
 0x4b9   : > { %v1269_v17 = vadd.f32 %v1253_v28, %v1193_v21  ;;  %2120 = vperm.xlu1 %5215, %v6487_v60   ;;  %v6512_v21 = vpop.permute.xlu2 %2095 }
 0x4bb   : > { %1286 = vst.msk [vmem:[#allocation4 + $0x8] sm:$0xff] %vm1284_vm7, %v1269_v17  ;;  %v1179_v17 = vunpack.c.h.bf16 %v6293_v42 }
 0x4bc   : > { %v6515_v59 = vpop.permute.xlu0 %1825 }
 0x4c0   : > { %v1483_v12 = vpop.f32.mrf.mxu1 }
 0x4c1   : > { %v1508_v33 = vadd.f32 %v1483_v12, %v1407_v53  ;;  %v8160_v53 = vld [vmem:[#allocation15_spill] sm:$0xff]  ;;  %v1209_v12 = vsel %vm899_vm6, %v1179_v17, 0.0 }
 0x4c3   : > { %1524 = vst.msk [vmem:[#allocation5 + $0x50] sm:$0xff] %vm797_vm5, %v1508_v33 }
 0x4c6   : > { %1840 = vperm.xlu0 %5212, %v6332_v46  }
 0x4c8   : > { %v1485_v16 = vpop.f32.mrf.mxu1 }
 0x4c9   : > { %v1509_v25 = vadd.f32 %v1485_v16, %v1408_v5  ;;  %2110 = vperm.xlu2 %5214, %v6499_v58   ;;  %v8161_v5 = vld [vmem:[#allocation23_spill] sm:$0xff] }
 0x4ca   : > { %v1258_v16 = vmul.f32 %v8161_v5, %v1242_v40 }
 0x4cb   : > { %1525 = vst.msk [vmem:[#allocation5 + $0x58] sm:$0xff] %vm797_vm5, %v1509_v25 }
 0x4ce   : > { %2145 = vperm.xlu0 %5212, %v6503_v18  }
 0x4d0   : > { %v1801_v29 = vpop.permute.xlu1 %1800 }
 0x4d1   : > { %v1866_v46 = vsub.f32 %v6075_v20, %v1801_v29  ;;  %1815 = vperm.xlu2 %5214, %v6261_v41   ;;  %v1236_v41 = vld [vmem:[#allocation4] sm:$0xff] }
 0x4d2   : > { %v1252_v30 = vmul.f32 %v8160_v53, %v1236_v41 }
 0x4d3   : > { %v1880_v13 = vpack.c.bf16 %v1866_v46, %v1865_v45 }
 0x4d5   : > { %v1889_v47 = vunpack.c.l.bf16 %v1880_v13  ;;  %v1890_v44 = vunpack.c.h.bf16 %v1880_v13 }
 0x4d6   : > { %1855 = vperm.xlu0 %5212, %v6397_v54  }
 0x4d7   : > { %v1907_v27 = vmul.f32 1.442695, %v1889_v47  ;;  %v1909_v28 = vmul.f32 1.442695, %v1890_v44  ;;  %v8162_v44 = vld [vmem:[#allocation20_spill] sm:$0xff] }
 0x4d8   : > { %v6517_v20 = vpop.permute.xlu1 %2100 }
 0x4d9   : > { %5308 = vpow2.f32 %v1907_v27 }
 0x4da   : > { %5310 = vpow2.f32 %v1909_v28  ;;  %v8163_v28 = vld [vmem:[#allocation19_spill] sm:$0xff] }
 0x4df   : > { %v5309_v9 = vpop.eup %5308 }
 0x4e0   : > { %v5311_v37 = vpop.eup %5310  ;;  %v1811_v45 = vpop.permute.xlu1 %1810 }
 0x4e1   : > { %v6519_v15 = vpack.c.bf16 %v5311_v37, %v5309_v9  ;;  %v1868_v27 = vsub.f32 %v8162_v44, %v1811_v45  ;;  %v1314_v9 = vld [vmem:[#allocation5 + $0x68] sm:$0xff]  ;;  %v1742_v45 = vsub.f32 %v6279_v31, %v6282_v1  ;;  %v1240_v44 = vld [vmem:[#allocation4 + $0x20] sm:$0xff]  ;;  %v1316_v31 = vld [vmem:[#allocation5 + $0x78] sm:$0xff] }
 0x4e2   : > { %v1410_v37 = vmul.f32 %v6382_v50, %v1314_v9 }
 0x4e3   : > { %4990 = vmatmul.msk.bf16.gmra.mxu3 %vm899_vm6, %v6519_v15  ;;  %v1190_v33 = vpop.xlane.xlu2 %1189  ;;  %1210 = vadd.xlane.f32.xlu1 %v1209_v12 }
 0x4e4   : > { %v1268_v42 = vadd.f32 %v1252_v30, %v1190_v33 }
 0x4e6   : > { %1285 = vst.msk [vmem:[#allocation4] sm:$0xff] %vm1284_vm7, %v1268_v42  ;;  %v1744_v42 = vsub.f32 %v6336_v48, %v6339_v4 }
 0x4e7   : > { %v1208_v25 = vpop.xlane.xlu0 %1207 }
 0x4e8   : > { %v1274_v29 = vadd.f32 %v1258_v16, %v1208_v25  ;;  %v1769_v5 = vmul.f32 1.442695, %v1744_v42  ;;  %v1203_v16 = vsel %vm899_vm6, %v1177_v34, 0.0  ;;  %v8165_v42 = vld [vmem:[#allocation18_spill] sm:$0xff] }
 0x4e9   : > { %v1488_v46 = vpop.f32.mrf.mxu1 }
 0x4ea   : > { %1291 = vst.msk [vmem:[#allocation4 + $0x30] sm:$0xff] %vm1284_vm7, %v1274_v29  ;;  %v1510_v13 = vadd.f32 %v1488_v46, %v1409_v51  ;;  %v1184_v51 = vunpack.c.l.bf16 %v6429_v11  ;;  %v1749_v46 = vsub.f32 %v6394_v43, %v6397_v54  ;;  %v1412_v43 = vmul.f32 %v6481_v0, %v1316_v31  ;;  %v8166_v0 = vld [vmem:[#allocation30_spill] sm:$0xff] }
 0x4eb   : > { %v1806_v47 = vpop.permute.xlu2 %1805 }
 0x4ec   : > { %1526 = vst.msk [vmem:[#allocation5 + $0x60] sm:$0xff] %vm797_vm5, %v1510_v13  ;;  %v1867_v17 = vsub.f32 %v8163_v28, %v1806_v47  ;;  %v1224_v48 = vsel %vm899_vm6, %v1184_v51, 0.0  ;;  %v1765_v13 = vmul.f32 1.442695, %v1742_v45  ;;  %v1315_v47 = vld [vmem:[#allocation5 + $0x70] sm:$0xff] }
 0x4ed   : > { %v1411_v28 = vmul.f32 %v6458_v63, %v1315_v47  ;;  %v8167_v47 = vld [vmem:[#allocation25_spill] sm:$0xff] }
 0x4ee   : > { %v1881_v41 = vpack.c.bf16 %v1868_v27, %v1867_v17  ;;  %v1779_v27 = vmul.f32 1.442695, %v1749_v46  ;;  %v8164_v17 = vld [vmem:[#allocation17_spill] sm:$0xff] }
 0x4ef   : > { %v1256_v9 = vmul.f32 %v8164_v17, %v1240_v44 }
 0x4f0   : > { %v1891_v53 = vunpack.c.l.bf16 %v1881_v41  ;;  %v1892_v30 = vunpack.c.h.bf16 %v1881_v41 }
 0x4f1   : > { %v1490_v39 = vpop.f32.mrf.mxu1 }
 0x4f2   : > { %v1911_v12 = vmul.f32 1.442695, %v1891_v53  ;;  %v1913_v33 = vmul.f32 1.442695, %v1892_v30  ;;  %v1511_v40 = vadd.f32 %v1490_v39, %v1410_v37 }
 0x4f4   : > { %5312 = vpow2.f32 %v1911_v12  ;;  %1527 = vst.msk [vmem:[#allocation5 + $0x68] sm:$0xff] %vm797_vm5, %v1511_v40  ;;  %v1245_v40 = vld [vmem:[#allocation4 + $0x48] sm:$0xff] }
 0x4f5   : > { %5314 = vpow2.f32 %v1913_v33  ;;  %v1239_v33 = vld [vmem:[#allocation4 + $0x18] sm:$0xff] }
 0x4f6   : > { %5316 = vpow2.f32 %v1769_v5  ;;  %v1255_v34 = vmul.f32 %v8165_v42, %v1239_v33 }
 0x4f7   : > { %5318 = vpow2.f32 %v1765_v13 }
 0x4f8   : > { %5320 = vpow2.f32 %v1779_v27  ;;  %v8168_v27 = vld [vmem:[#allocation24_spill] sm:$0xff] }
 0x4fa   : > { %v5313_v25 = vpop.eup %5312  ;;  %1204 = vadd.xlane.f32.xlu2 %v1203_v16  ;;  %v6565_v12 = vpop.permute.xlu0 %2130  ;;  %v1261_v16 = vmul.f32 %v8166_v0, %v1245_v40 }
 0x4fb   : > { %v5315_v50 = vpop.eup %5314 }
 0x4fc   : > { %1835 = vperm.xlu1 %5215, %v6356_v36   ;;  %v6540_v29 = vpack.c.bf16 %v5315_v50, %v5313_v25  ;;  %v6545_v38 = vpop.eup %5316 }
 0x4fd   : > { %v6556_v1 = vpop.eup %5318 }
 0x4fe   : > { %4991 = vmatmul.msk.bf16.gmra.mxu3 %vm899_vm6, %v6540_v29  ;;  %v6560_v54 = vpop.eup %5320 }
 0x500   : > { %1225 = vadd.xlane.f32.xlu0 %v1224_v48  ;;  %v1182_v48 = vunpack.c.l.bf16 %v6380_v61 }
 0x504   : > { %2135 = vperm.xlu1 %5215, %v6545_v38  }
 0x50b   : > { %v1493_v41 = vpop.f32.mrf.mxu1  ;;  %v1202_v37 = vpop.xlane.xlu1 %1201 }
 0x50c   : > { %v1512_v53 = vadd.f32 %v1493_v41, %v1411_v28  ;;  %v1272_v30 = vadd.f32 %v1256_v9, %v1202_v37  ;;  %v1187_v37 = vunpack.c.h.bf16 %v6452_v55 }
 0x50e   : > { %1528 = vst.msk [vmem:[#allocation5 + $0x70] sm:$0xff] %vm797_vm5, %v1512_v53  ;;  %v1233_v31 = vsel %vm899_vm6, %v1187_v37, 0.0 }
 0x50f   : > { %1289 = vst.msk [vmem:[#allocation4 + $0x20] sm:$0xff] %vm1284_vm7, %v1272_v30 }
 0x512   : > { %2125 = vperm.xlu2 %5214, %v6556_v1  }
 0x513   : > { %v1495_v63 = vpop.f32.mrf.mxu1 }
 0x514   : > { %v1513_v39 = vadd.f32 %v1495_v63, %v1412_v43  ;;  %2160 = vperm.xlu0 %5212, %v6560_v54   ;;  %v1180_v43 = vunpack.c.l.bf16 %v6312_v26  ;;  %v1747_v63 = vsub.f32 %v6401_v49, %v6404_v24  ;;  %v1745_v26 = vsub.f32 %v6352_v32, %v6356_v36  ;;  %v6602_v32 = vld [vmem:[%s5843_s7] sm:$0xff] }
 0x516   : > { %1529 = vst.msk [vmem:[#allocation5 + $0x78] sm:$0xff] %vm797_vm5, %v1513_v39  ;;  %v1944_v39 = vunpack.c.h.bf16 %v6461_v62  ;;  %v1212_v33 = vsel %vm899_vm6, %v1180_v43, 0.0 }
 0x518   : > { %v1962_v0 = vsel %vm899_vm6, %v1944_v39, 0.0  ;;  %v1185_v39 = vunpack.c.h.bf16 %v6429_v11  ;;  %v1750_v11 = vsub.f32 %v6468_v6, %v6471_v10 }
 0x51a   : > { %1830 = vperm.xlu2 %5214, %v6339_v4   ;;  %v1218_v4 = vsel %vm899_vm6, %v1182_v48, 0.0 }
 0x523   : > { %v1821_v46 = vpop.permute.xlu1 %1820 }
 0x524   : > { %v1199_v5 = vpop.xlane.xlu2 %1198  ;;  %v1870_v44 = vsub.f32 %v8167_v47, %v1821_v46 }
 0x525   : > { %v1271_v25 = vadd.f32 %v1255_v34, %v1199_v5  ;;  %v1217_v50 = vpop.xlane.xlu0 %1216  ;;  %v1775_v34 = vmul.f32 1.442695, %v1747_v63 }
 0x526   : > { %v1277_v51 = vadd.f32 %v1261_v16, %v1217_v50  ;;  %v1243_v50 = vld [vmem:[#allocation4 + $0x38] sm:$0xff] }
 0x527   : > { %1288 = vst.msk [vmem:[#allocation4 + $0x18] sm:$0xff] %vm1284_vm7, %v1271_v25  ;;  %v1771_v25 = vmul.f32 1.442695, %v1745_v26 }
 0x528   : > { %1294 = vst.msk [vmem:[#allocation4 + $0x48] sm:$0xff] %vm1284_vm7, %v1277_v51  ;;  %v8169_v51 = vld [vmem:[#allocation21_spill] sm:$0xff] }
 0x529   : > { %v1259_v48 = vmul.f32 %v8169_v51, %v1243_v50 }
 0x52b   : > { %v6594_v16 = vpop.permute.xlu1 %2120 }
 0x52c   : > { %v6572_v45 = vpop.permute.xlu2 %2110 }
 0x52e   : > { %1219 = vadd.xlane.f32.xlu1 %v1218_v4 }
 0x534   : > { %v1816_v13 = vpop.permute.xlu2 %1815 }
 0x535   : > { %v1869_v28 = vsub.f32 %v8168_v27, %v1816_v13  ;;  %v1241_v27 = vld [vmem:[#allocation4 + $0x28] sm:$0xff] }
 0x537   : > { %v1882_v17 = vpack.c.bf16 %v1870_v44, %v1869_v28  ;;  %v5479_v44 = vld [vmem:[%s5843_s7 + $0x18] sm:$0xff] }
 0x538   : > { %v1841_v46 = vpop.permute.xlu0 %1840 }
 0x539   : > { %v1893_v9 = vunpack.c.l.bf16 %v1882_v17  ;;  %v1894_v41 = vunpack.c.h.bf16 %v1882_v17  ;;  %v8170_v17 = vld [vmem:[#allocation22_spill] sm:$0xff] }
 0x53b   : > { %v1915_v53 = vmul.f32 1.442695, %v1893_v9  ;;  %v1917_v30 = vmul.f32 1.442695, %v1894_v41  ;;  %v1257_v9 = vmul.f32 %v8170_v17, %v1241_v27 }
 0x53d   : > { %5322 = vpow2.f32 %v1915_v53  ;;  %v1248_v53 = vld [vmem:[#allocation4 + $0x60] sm:$0xff] }
 0x53e   : > { %5324 = vpow2.f32 %v1917_v30  ;;  %1234 = vadd.xlane.f32.xlu0 %v1233_v31  ;;  %v8171_v30 = vld [vmem:[#allocation35_spill] sm:$0xff] }
 0x53f   : > { %5326 = vpow2.f32 %v1775_v34  ;;  %v1264_v31 = vmul.f32 %v8171_v30, %v1248_v53  ;;  %v1947_v53 = vunpack.c.l.bf16 %v6540_v29 }
 0x540   : > { %5328 = vpow2.f32 %v1771_v25  ;;  %v6607_v36 = vpop.permute.xlu0 %2145 }
 0x543   : > { %v5323_v40 = vpop.eup %5322  ;;  %1213 = vadd.xlane.f32.xlu2 %v1212_v33 }
 0x544   : > { %v5325_v42 = vpop.eup %5324 }
 0x545   : > { %v6584_v5 = vpack.c.bf16 %v5325_v42, %v5323_v40  ;;  %v6592_v49 = vpop.eup %5326  ;;  %v8172_v42 = vld [vmem:[#allocation26_spill] sm:$0xff] }
 0x546   : > { %1963 = vadd.xlane.f32.xlu0 %v1962_v0  ;;  %v6599_v47 = vpop.eup %5328  ;;  %v1871_v34 = vsub.f32 %v8172_v42, %v6515_v59  ;;  %v8173_v0 = vld [vmem:[#allocation29_spill] sm:$0xff]  ;;  %v1183_v59 = vunpack.c.h.bf16 %v6380_v61 }
 0x547   : > { %4992 = vmatmul.msk.bf16.gmra.mxu3 %vm899_vm6, %v6584_v5  ;;  %1850 = vperm.xlu1 %5215, %v6422_v8  }
 0x548   : > { %v6612_v28 = vpop.permute.xlu0 %1855 }
 0x54f   : > { %2150 = vperm.xlu1 %5215, %v6592_v49  }
 0x556   : > { %v1211_v4 = vpop.xlane.xlu1 %1210 }
 0x557   : > { %v1275_v13 = vadd.f32 %v1259_v48, %v1211_v4  ;;  %v8174_v4 = vld [vmem:[#allocation31_spill] sm:$0xff] }
 0x559   : > { %1292 = vst.msk [vmem:[#allocation4 + $0x38] sm:$0xff] %vm1284_vm7, %v1275_v13 }
 0x55a   : > { %2398 = vrot.lane.b32.xlu0 %v6602_v32, %s5613_s8 }
 0x55b   : > { %2140 = vperm.xlu2 %5214, %v6599_v47  }
 0x562   : > { %2404 = vrot.lane.b32.xlu0 %v5479_v44, %s5613_s8 }
 0x563   : > { %1845 = vperm.xlu2 %5214, %v6404_v24   ;;  %v1227_v24 = vsel %vm899_vm6, %v1185_v39, 0.0 }
 0x56d   : > { %v1205_v41 = vpop.xlane.xlu2 %1204 }
 0x56e   : > { %v1273_v37 = vadd.f32 %v1257_v9, %v1205_v41  ;;  %v1836_v50 = vpop.permute.xlu1 %1835  ;;  %v8175_v9 = vld [vmem:[#allocation32_spill] sm:$0xff] }
 0x56f   : > { %v1873_v13 = vsub.f32 %v8174_v4, %v1836_v50  ;;  %v1874_v41 = vsub.f32 %v8175_v9, %v1841_v46 }
 0x570   : > { %1290 = vst.msk [vmem:[#allocation4 + $0x28] sm:$0xff] %vm1284_vm7, %v1273_v37  ;;  %v1781_v37 = vmul.f32 1.442695, %v1750_v11  ;;  %v8176_v11 = vld [vmem:[#allocation27_spill] sm:$0xff] }
 0x571   : > { %v1884_v30 = vpack.c.bf16 %v1874_v41, %v1873_v13 }
 0x573   : > { %v1226_v43 = vpop.xlane.xlu0 %1225 }
 0x574   : > { %v1280_v63 = vadd.f32 %v1264_v31, %v1226_v43  ;;  %v1221_v31 = vsel %vm899_vm6, %v1183_v59, 0.0  ;;  %v1971_v43 = vsel %vm899_vm6, %v1947_v53, 0.0  ;;  %v8177_v59 = vld [vmem:[#allocation28_spill] sm:$0xff] }
 0x575   : > { %v6618_v33 = vpop.permute.xlu2 %2125 }
 0x576   : > { %1297 = vst.msk [vmem:[#allocation4 + $0x60] sm:$0xff] %vm1284_vm7, %v1280_v63  ;;  %v1897_v63 = vunpack.c.l.bf16 %v1884_v30 }
 0x579   : > { %1228 = vadd.xlane.f32.xlu1 %v1227_v24  ;;  %v1898_v24 = vunpack.c.h.bf16 %v1884_v30  ;;  %v2008_v30 = vld [vmem:[#allocation4 + $0x8] sm:$0xff] }
 0x57b   : > { %v1925_v42 = vmul.f32 1.442695, %v1898_v24 }
 0x57d   : > { %v1831_v40 = vpop.permute.xlu2 %1830 }
 0x57e   : > { %v1872_v26 = vsub.f32 %v8173_v0, %v1831_v40  ;;  %v1923_v40 = vmul.f32 1.442695, %v1897_v63  ;;  %v2024_v63 = vmul.f32 %v6388_v14, %v2008_v30 }
 0x580   : > { %v1883_v25 = vpack.c.bf16 %v1872_v26, %v1871_v34  ;;  %v1748_v34 = vsub.f32 %v6419_v19, %v6422_v8  ;;  %v6642_v26 = vpop.permute.xlu1 %2135 }
 0x582   : > { %v1895_v51 = vunpack.c.l.bf16 %v1883_v25  ;;  %v1896_v48 = vunpack.c.h.bf16 %v1883_v25  ;;  %v1777_v0 = vmul.f32 1.442695, %v1748_v34 }
 0x584   : > { %v1919_v27 = vmul.f32 1.442695, %v1895_v51  ;;  %v1921_v17 = vmul.f32 1.442695, %v1896_v48  ;;  %v1246_v51 = vld [vmem:[#allocation4 + $0x50] sm:$0xff] }
 0x585   : > { %v1262_v4 = vmul.f32 %v8176_v11, %v1246_v51 }
 0x586   : > { %5330 = vpow2.f32 %v1919_v27  ;;  %v6654_v27 = vpop.permute.xlu0 %2160 }
 0x587   : > { %5332 = vpow2.f32 %v1921_v17  ;;  %v1251_v17 = vld [vmem:[#allocation4 + $0x78] sm:$0xff] }
 0x588   : > { %5334 = vpow2.f32 %v1781_v37  ;;  %v1267_v9 = vmul.f32 %v6358_v56, %v1251_v17 }
 0x589   : > { %5336 = vpow2.f32 %v1923_v40 }
 0x58a   : > { %5338 = vpow2.f32 %v1925_v42  ;;  %v1950_v42 = vunpack.c.h.bf16 %v6584_v5 }
 0x58b   : > { %5340 = vpow2.f32 %v1777_v0 }
 0x58c   : > { %v5331_v6 = vpop.eup %5330  ;;  %1222 = vadd.xlane.f32.xlu2 %v1221_v31  ;;  %1972 = vadd.xlane.f32.xlu0 %v1971_v43 }
 0x58d   : > { %v5333_v39 = vpop.eup %5332 }
 0x58e   : > { %v6633_v46 = vpack.c.bf16 %v5333_v39, %v5331_v6  ;;  %v6637_v61 = vpop.eup %5334  ;;  %v1943_v6 = vunpack.c.l.bf16 %v6461_v62 }
 0x58f   : > { %v5337_v25 = vpop.eup %5336 }
 0x590   : > { %4993 = vmatmul.msk.bf16.gmra.mxu3 %vm899_vm6, %v6633_v46  ;;  %v5339_v50 = vpop.eup %5338  ;;  %v1959_v56 = vsel %vm899_vm6, %v1943_v6, 0.0  ;;  %v1946_v6 = vunpack.c.h.bf16 %v6519_v15 }
 0x591   : > { %v6644_v48 = vpack.c.bf16 %v5339_v50, %v5337_v25  ;;  %v6650_v8 = vpop.eup %5340  ;;  %v1980_v25 = vsel %vm899_vm6, %v1950_v42, 0.0 }
 0x592   : > { %2165 = vperm.xlu1 %5215, %v6637_v61  }
 0x5a0   : > { %4994 = vmatmul.msk.bf16.gmra.mxu3 %vm899_vm6, %v6644_v48  ;;  %3240 = vrot.lane.b32.xlu0 %v5479_v44, %s5616_s11  ;;  %v1244_v44 = vld [vmem:[#allocation4 + $0x40] sm:$0xff] }
 0x5a1   : > { %v1220_v13 = vpop.xlane.xlu1 %1219  ;;  %v1260_v53 = vmul.f32 %v8177_v59, %v1244_v44 }
 0x5a2   : > { %v1278_v19 = vadd.f32 %v1262_v4, %v1220_v13  ;;  %v1186_v13 = vunpack.c.l.bf16 %v6452_v55  ;;  %v1249_v55 = vld [vmem:[#allocation4 + $0x68] sm:$0xff] }
 0x5a4   : > { %1295 = vst.msk [vmem:[#allocation4 + $0x50] sm:$0xff] %vm1284_vm7, %v1278_v19  ;;  %2155 = vperm.xlu2 %5214, %v6650_v8   ;;  %v1230_v19 = vsel %vm899_vm6, %v1186_v13, 0.0  ;;  %v1877_v13 = vsub.f32 %v6287_v23, %v6612_v28 }
 0x5ac   : > { %1860 = vperm.xlu2 %5214, %v6471_v10  }
 0x5b1   : > { %v1235_v41 = vpop.xlane.xlu0 %1234 }
 0x5b2   : > { %v1283_v37 = vadd.f32 %v1267_v9, %v1235_v41 }
 0x5b4   : > { %1300 = vst.msk [vmem:[#allocation4 + $0x78] sm:$0xff] %vm1284_vm7, %v1283_v37  ;;  %v8178_v37 = vld [vmem:[#allocation33_spill] sm:$0xff] }
 0x5b5   : > { %v1265_v44 = vmul.f32 %v8178_v37, %v1249_v55 }
 0x5b6   : > { %v1214_v31 = vpop.xlane.xlu2 %1213 }
 0x5b7   : > { %v1276_v43 = vadd.f32 %v1260_v53, %v1214_v31  ;;  %v5481_v31 = vld [vmem:[%s5843_s7 + $0x10] sm:$0xff] }
 0x5b9   : > { %1293 = vst.msk [vmem:[#allocation4 + $0x40] sm:$0xff] %vm1284_vm7, %v1276_v43  ;;  %v1964_v10 = vpop.xlane.xlu0 %1963  ;;  %v1851_v40 = vpop.permute.xlu1 %1850 }
 0x5ba   : > { %v2040_v39 = vadd.f32 %v2024_v63, %v1964_v10  ;;  %v1876_v62 = vsub.f32 %v6276_v52, %v1851_v40  ;;  %v5480_v52 = vld [vmem:[%s5843_s7 + $0x8] sm:$0xff]  ;;  %v1247_v63 = vld [vmem:[#allocation4 + $0x58] sm:$0xff]  ;;  %v2011_v10 = vld [vmem:[#allocation4 + $0x20] sm:$0xff]  ;;  %v1968_v40 = vsel %vm899_vm6, %v1946_v6, 0.0 }
 0x5bb   : > { %v2027_v42 = vmul.f32 %v6499_v58, %v2011_v10 }
 0x5bc   : > { %2057 = vst.msk [vmem:[#allocation4 + $0x8] sm:$0xff] %vm2055_vm8, %v2040_v39  ;;  %1960 = vadd.xlane.f32.xlu1 %v1959_v56  ;;  %v8179_v39 = vld [vmem:[#allocation34_spill] sm:$0xff] }
 0x5bd   : > { %v1263_v56 = vmul.f32 %v8179_v39, %v1247_v63  ;;  %v1948_v63 = vunpack.c.h.bf16 %v6540_v29  ;;  %v2007_v29 = vld [vmem:[#allocation4] sm:$0xff] }
 0x5be   : > { %v6665_v24 = vpop.permute.xlu2 %2140 }
 0x5bf   : > { %v1974_v23 = vsel %vm899_vm6, %v1948_v63, 0.0 }
 0x5c1   : > { %v6681_v41 = vpop.permute.xlu1 %2150 }
 0x5c6   : > { %v1846_v34 = vpop.permute.xlu2 %1845 }
 0x5c7   : > { %v1875_v14 = vsub.f32 %v6252_v7, %v1846_v34 }
 0x5c9   : > { %v1885_v0 = vpack.c.bf16 %v1876_v62, %v1875_v14 }
 0x5ca   : > { %1981 = vadd.xlane.f32.xlu0 %v1980_v25  ;;  %v1953_v25 = vunpack.c.l.bf16 %v6644_v48 }
 0x5cb   : > { %v1899_v50 = vunpack.c.l.bf16 %v1885_v0  ;;  %v1900_v51 = vunpack.c.h.bf16 %v1885_v0 }
 0x5cc   : > { %v6684_v59 = vpop.permute.xlu0 %2398 }
 0x5cd   : > { %v1927_v11 = vmul.f32 1.442695, %v1899_v50  ;;  %v1929_v4 = vmul.f32 1.442695, %v1900_v51  ;;  %v1989_v51 = vsel %vm899_vm6, %v1953_v25, 0.0 }
 0x5cf   : > { %5342 = vpow2.f32 %v1927_v11 }
 0x5d0   : > { %5344 = vpow2.f32 %v1929_v4 }
 0x5d4   : > { %v2405_v43 = vpop.permute.xlu0 %2404 }
 0x5d5   : > { %v5343_v17 = vpop.eup %5342  ;;  %1231 = vadd.xlane.f32.xlu2 %v1230_v19  ;;  %2400 = vrot.lane.b32.xlu1 %v5480_v52, %s5613_s8  ;;  %v8180_v19 = vld [vmem:[#allocation39_spill] sm:$0xff]  ;;  %v2440_v39 = vsel %vm797_vm5, %v2405_v43, 0 }
 0x5d6   : > { %v5345_v7 = vpop.eup %5344  ;;  %2446 = vmatpush.bf16.xpose.msrb.mxu1 %v2440_v39 }
 0x5d7   : > { %v6675_v9 = vpack.c.bf16 %v5345_v7, %v5343_v17  ;;  %v1945_v7 = vunpack.c.l.bf16 %v6519_v15 }
 0x5d9   : > { %4995 = vmatmul.msk.bf16.gmra.mxu3 %vm899_vm6, %v6675_v9  ;;  %v1956_v11 = vunpack.c.h.bf16 %v6675_v9 }
 0x5db   : > { %v1998_v58 = vsel %vm899_vm6, %v1956_v11, 0.0  ;;  %v1949_v11 = vunpack.c.l.bf16 %v6584_v5  ;;  %v1955_v5 = vunpack.c.l.bf16 %v6675_v9  ;;  %v1951_v9 = vunpack.c.l.bf16 %v6633_v46 }
 0x5dd   : > { %v1983_v39 = vsel %vm899_vm6, %v1951_v9, 0.0 }
 0x5de   : > { %3234 = vrot.lane.b32.xlu0 %v6602_v32, %s5616_s11 }
 0x5ec   : > { %v1229_v53 = vpop.xlane.xlu1 %1228 }
 0x5ed   : > { %v1281_v30 = vadd.f32 %v1265_v44, %v1229_v53  ;;  %2402 = vrot.lane.b32.xlu2 %v5481_v31, %s5613_s8  ;;  %v1965_v53 = vsel %vm899_vm6, %v1945_v7, 0.0  ;;  %v8182_v7 = vld [vmem:[#allocation37_spill] sm:$0xff] }
 0x5ef   : > { %1298 = vst.msk [vmem:[#allocation4 + $0x68] sm:$0xff] %vm1284_vm7, %v1281_v30 }
 0x5ff   : > { %v1223_v34 = vpop.xlane.xlu2 %1222  ;;  %1969 = vadd.xlane.f32.xlu1 %v1968_v40  ;;  %v1973_v62 = vpop.xlane.xlu0 %1972  ;;  %v5482_v40 = vld [vmem:[#allocation2 + $0x20] sm:$0xff] }
 0x600   : > { %v1279_v14 = vadd.f32 %v1263_v56, %v1223_v34  ;;  %v2043_v0 = vadd.f32 %v2027_v42, %v1973_v62  ;;  %v2229_v56 = vpop.f32.mrf.mxu3  ;;  %v8181_v42 = vld [vmem:[#allocation36_spill] sm:$0xff] }
 0x601   : > { %v2023_v34 = vmul.f32 %v8181_v42, %v2007_v29  ;;  %v2010_v29 = vld [vmem:[#allocation4 + $0x18] sm:$0xff] }
 0x602   : > { %1296 = vst.msk [vmem:[#allocation4 + $0x58] sm:$0xff] %vm1284_vm7, %v1279_v14 }
 0x603   : > { %2060 = vst.msk [vmem:[#allocation4 + $0x20] sm:$0xff] %vm2055_vm8, %v2043_v0  ;;  %v2014_v0 = vld [vmem:[#allocation4 + $0x38] sm:$0xff] }
 0x604   : > { %v2030_v25 = vmul.f32 %v6556_v1, %v2014_v0 }
 0x607   : > { %v6696_v50 = vpop.permute.xlu2 %2155 }
 0x608   : > { %1990 = vadd.xlane.f32.xlu0 %v1989_v51 }
 0x60f   : > { %v1861_v4 = vpop.permute.xlu2 %1860 }
 0x610   : > { %v1878_v17 = vsub.f32 %v8180_v19, %v1861_v4  ;;  %1999 = vadd.xlane.f32.xlu0 %v1998_v58  ;;  %v5483_v58 = vld [vmem:[#allocation2] sm:$0xff]  ;;  %v1250_v19 = vld [vmem:[#allocation4 + $0x70] sm:$0xff] }
 0x612   : > { %v1886_v55 = vpack.c.bf16 %v1878_v17, %v1877_v13  ;;  %v3241_v43 = vpop.permute.xlu0 %3240  ;;  %v1977_v13 = vsel %vm899_vm6, %v1949_v11, 0.0  ;;  %v1952_v17 = vunpack.c.h.bf16 %v6633_v46 }
 0x613   : > { %v3276_v0 = vsel %vm797_vm5, %v3241_v43, 0 }
 0x614   : > { %v1901_v37 = vunpack.c.l.bf16 %v1886_v55  ;;  %v1902_v44 = vunpack.c.h.bf16 %v1886_v55  ;;  %v1986_v1 = vsel %vm899_vm6, %v1952_v17, 0.0  ;;  %3282 = vmatpush.bf16.xpose.msrb.mxu0 %v3276_v0  ;;  %v2009_v17 = vld [vmem:[#allocation4 + $0x10] sm:$0xff] }
 0x616   : > { %v1931_v30 = vmul.f32 1.442695, %v1901_v37  ;;  %v1933_v6 = vmul.f32 1.442695, %v1902_v44  ;;  %1966 = vadd.xlane.f32.xlu2 %v1965_v53  ;;  %v1995_v53 = vsel %vm899_vm6, %v1955_v5, 0.0 }
 0x618   : > { %5346 = vpow2.f32 %v1931_v30  ;;  %3236 = vrot.lane.b32.xlu1 %v5480_v52, %s5616_s11  ;;  %v6715_v52 = vpop.permute.xlu1 %2165 }
 0x619   : > { %5348 = vpow2.f32 %v1933_v6 }
 0x61e   : > { %v5347_v28 = vpop.eup %5346  ;;  %1975 = vadd.xlane.f32.xlu2 %v1974_v23 }
 0x61f   : > { %v5349_v10 = vpop.eup %5348 }
 0x620   : > { %v6709_v15 = vpack.c.bf16 %v5349_v10, %v5347_v28  ;;  %v2431_v10 = vsel %vm797_vm5, %v6684_v59, 0  ;;  %v2017_v59 = vld [vmem:[#allocation4 + $0x50] sm:$0xff] }
 0x621   : > { %v2033_v46 = vmul.f32 %v6599_v47, %v2017_v59  ;;  %v2016_v59 = vld [vmem:[#allocation4 + $0x48] sm:$0xff] }
 0x622   : > { %4996 = vmatmul.msk.bf16.gmra.mxu3 %vm899_vm6, %v6709_v15  ;;  %v1958_v63 = vunpack.c.h.bf16 %v6709_v15 }
 0x624   : > { %2285 = vrot.lane.b32.xlu0 %v2229_v56, %s5617_s30  ;;  %v2004_v28 = vsel %vm899_vm6, %v1958_v63, 0.0  ;;  %v8183_v56 = vld [vmem:[#allocation9_spill] sm:$0xff] }
 0x62c   : > { %3226 = vrot.lane.b32.xlu0 %v5482_v40, %s5616_s11  ;;  %v8184_v40 = vld [vmem:[#allocation38_spill] sm:$0xff] }
 0x62d   : > { %v2026_v42 = vmul.f32 %v8184_v40, %v2010_v29  ;;  %v8189_v29 = vld [vmem:[#allocation14_spill] sm:$0xff] }
 0x62f   : > { %v1961_v62 = vpop.xlane.xlu1 %1960 }
 0x630   : > { %v2039_v14 = vadd.f32 %v2023_v34, %v1961_v62 }
 0x632   : > { %2056 = vst.msk [vmem:[#allocation4] sm:$0xff] %vm2055_vm8, %v2039_v14 }
 0x636   : > { %3238 = vrot.lane.b32.xlu2 %v5481_v31, %s5616_s11  ;;  %v1266_v31 = vmul.f32 %v8182_v7, %v1250_v19  ;;  %v2025_v7 = vmul.f32 %v6424_v2, %v2009_v17 }
 0x63d   : > { %v1982_v51 = vpop.xlane.xlu0 %1981 }
 0x63e   : > { %v2046_v4 = vadd.f32 %v2030_v25, %v1982_v51  ;;  %3218 = vrot.lane.b32.xlu2 %v5483_v58, %s5616_s11  ;;  %v8185_v25 = vld [vmem:[#allocation12_spill] sm:$0xff]  ;;  %v2020_v58 = vld [vmem:[#allocation4 + $0x68] sm:$0xff] }
 0x640   : > { %2063 = vst.msk [vmem:[#allocation4 + $0x38] sm:$0xff] %vm2055_vm8, %v2046_v4  ;;  %v5484_v4 = vld [vmem:[#allocation2 + $0x8] sm:$0xff] }
 0x642   : > { %1978 = vadd.xlane.f32.xlu1 %v1977_v13  ;;  %v2036_v13 = vmul.f32 %v6650_v8, %v2020_v58  ;;  %v2072_v8 = vld [vmem:[#allocation5] sm:$0xff] }
 0x647   : > { %v2401_v6 = vpop.permute.xlu1 %2400 }
 0x648   : > { %v1232_v55 = vpop.xlane.xlu2 %1231  ;;  %v2434_v23 = vsel %vm797_vm5, %v2401_v6, 0 }
 0x649   : > { %v1282_v37 = vadd.f32 %v1266_v31, %v1232_v55  ;;  %v8186_v55 = vld [vmem:[#allocation8_spill] sm:$0xff] }
 0x64a   : > { %1987 = vadd.xlane.f32.xlu1 %v1986_v1  ;;  %v8187_v1 = vld [vmem:[#allocation40_spill] sm:$0xff] }
 0x64b   : > { %1299 = vst.msk [vmem:[#allocation4 + $0x70] sm:$0xff] %vm1284_vm7, %v1282_v37  ;;  %v2012_v37 = vld [vmem:[#allocation4 + $0x28] sm:$0xff] }
 0x64c   : > { %v2028_v5 = vmul.f32 %v8187_v1, %v2012_v37  ;;  %v1957_v1 = vunpack.c.l.bf16 %v6709_v15 }
 0x650   : > { %v2403_v44 = vpop.permute.xlu2 %2402  ;;  %v3235_v34 = vpop.permute.xlu0 %3234 }
 0x651   : > { %v2437_v30 = vsel %vm797_vm5, %v2403_v44, 0 }
 0x652   : > { %1996 = vadd.xlane.f32.xlu1 %v1995_v53  ;;  %2447 = vmatpush.bf16.xpose.msrb.mxu1 %v2437_v30  ;;  %v2168_v30 = vmul.f32 %v6456_v57, %v2072_v8 }
 0x65a   : > { %2005 = vadd.xlane.f32.xlu1 %v2004_v28  ;;  %2448 = vmatpush.bf16.xpose.msrb.mxu1 %v2434_v23  ;;  %v8188_v23 = vld [vmem:[#allocation11_spill] sm:$0xff] }
 0x662   : > { %2449 = vmatpush.bf16.xpose.msrb.mxu1 %v2431_v10 }
 0x667   : > { %1984 = vadd.xlane.f32.xlu2 %v1983_v39  ;;  %v1954_v39 = vunpack.c.h.bf16 %v6644_v48  ;;  %v8190_v48 = vld [vmem:[#allocation10_spill] sm:$0xff] }
 0x669   : > { %4997 = vmatmul.msk.bf16.vlgmr.msrb.gmra.mxu1 %vm797_vm5, %v8183_v56  ;;  %v1992_v57 = vsel %vm899_vm6, %v1954_v39, 0.0  ;;  %v3267_v56 = vsel %vm797_vm5, %v3235_v34, 0  ;;  %v2032_v34 = vmul.f32 %v6545_v38, %v2016_v59  ;;  %v6824_v59 = vld [vmem:[#allocation3] sm:$0xff] }
 0x672   : > { %v1970_v62 = vpop.xlane.xlu1 %1969 }
 0x673   : > { %v2042_v14 = vadd.f32 %v2026_v42, %v1970_v62  ;;  %v2013_v42 = vld [vmem:[#allocation4 + $0x30] sm:$0xff] }
 0x674   : > { %v2029_v62 = vmul.f32 %v6487_v60, %v2013_v42 }
 0x675   : > { %2059 = vst.msk [vmem:[#allocation4 + $0x18] sm:$0xff] %vm2055_vm8, %v2042_v14 }
 0x679   : > { %4998 = vmatmul.msk.bf16.gmra.mxu1 %vm797_vm5, %v8185_v25 }
 0x67b   : > { %v1991_v51 = vpop.xlane.xlu0 %1990 }
 0x67c   : > { %v2049_v11 = vadd.f32 %v2033_v46, %v1991_v51  ;;  %v5485_v51 = vld [vmem:[#allocation2 + $0x10] sm:$0xff] }
 0x67e   : > { %2066 = vst.msk [vmem:[#allocation4 + $0x50] sm:$0xff] %vm2055_vm8, %v2049_v11  ;;  %v2019_v11 = vld [vmem:[#allocation4 + $0x60] sm:$0xff] }
 0x67f   : > { %3220 = vrot.lane.b32.xlu2 %v5484_v4, %s5616_s11  ;;  %v2035_v60 = vmul.f32 %v6592_v49, %v2019_v11 }
 0x683   : > { %v2000_v43 = vpop.xlane.xlu0 %1999 }
 0x684   : > { %v2052_v19 = vadd.f32 %v2036_v13, %v2000_v43  ;;  %v8191_v13 = vld [vmem:[#allocation13_spill] sm:$0xff]  ;;  %v2022_v43 = vld [vmem:[#allocation4 + $0x78] sm:$0xff] }
 0x685   : > { %v2038_v38 = vmul.f32 %v6637_v61, %v2022_v43 }
 0x686   : > { %2069 = vst.msk [vmem:[#allocation4 + $0x68] sm:$0xff] %vm2055_vm8, %v2052_v19 }
 0x689   : > { %v1967_v31 = vpop.xlane.xlu2 %1966  ;;  %4999 = vmatmul.msk.bf16.gmra.mxu1 %vm797_vm5, %v8186_v55 }
 0x68a   : > { %v2041_v47 = vadd.f32 %v2025_v7, %v1967_v31  ;;  %v3237_v10 = vpop.permute.xlu1 %3236  ;;  %v2015_v7 = vld [vmem:[#allocation4 + $0x40] sm:$0xff] }
 0x68b   : > { %v3270_v9 = vsel %vm797_vm5, %v3237_v10, 0  ;;  %v8192_v31 = vld [vmem:[#allocation16_spill] sm:$0xff]  ;;  %v2031_v49 = vmul.f32 %v6448_v22, %v2015_v7 }
 0x68c   : > { %2058 = vst.msk [vmem:[#allocation4 + $0x10] sm:$0xff] %vm2055_vm8, %v2041_v47 }
 0x691   : > { %v1976_v44 = vpop.xlane.xlu2 %1975 }
 0x692   : > { %v2044_v53 = vadd.f32 %v2028_v5, %v1976_v44  ;;  %v2001_v44 = vsel %vm899_vm6, %v1957_v1, 0.0 }
 0x694   : > { %2061 = vst.msk [vmem:[#allocation4 + $0x28] sm:$0xff] %vm2055_vm8, %v2044_v53 }
 0x696   : > { %v2286_v6 = vpop.permute.xlu0 %2285 }
 0x697   : > { %v2333_v2 = vadd.f32 %v2286_v6, %v2168_v30  ;;  %v2231_v30 = vpop.f32.mrf.mxu3 }
 0x699   : > { %2350 = vst.msk [vmem:[#allocation5] sm:$0xff] %vm2349_vm9, %v2333_v2  ;;  %v3239_v63 = vpop.permute.xlu2 %3238  ;;  %5000 = vmatmul.msk.bf16.gmra.mxu1 %vm797_vm5, %v8188_v23  ;;  %v2018_v23 = vld [vmem:[#allocation4 + $0x58] sm:$0xff] }
 0x69a   : > { %v3273_v28 = vsel %vm797_vm5, %v3239_v63, 0  ;;  %v5486_v63 = vld [vmem:[#allocation2 + $0x18] sm:$0xff] }
 0x69b   : > { %3283 = vmatpush.bf16.xpose.msrb.mxu0 %v3273_v28  ;;  %v2034_v28 = vmul.f32 %v6503_v18, %v2018_v23 }
 0x69f   : > { %v2234_v6 = vpop.f32.mrf.mxu3 }
 0x6a1   : > { %v3219_v40 = vpop.permute.xlu2 %3218 }
 0x6a3   : > { %3284 = vmatpush.bf16.xpose.msrb.mxu0 %v3270_v9 }
 0x6a7   : > { %v2236_v2 = vpop.f32.mrf.mxu3 }
 0x6a8   : > { %1993 = vadd.xlane.f32.xlu2 %v1992_v57 }
 0x6a9   : > { %5001 = vmatmul.msk.bf16.gmra.mxu1 %vm797_vm5, %v8189_v29 }
 0x6ab   : > { %3285 = vmatpush.bf16.xpose.msrb.mxu0 %v3267_v56 }
 0x6af   : > { %v2239_v42 = vpop.f32.mrf.mxu3 }
 0x6b2   : > { %5013 = vmatmul.msk.bf16.vlgmr.msrb.gmra.mxu0 %vm797_vm5, %v3219_v40 }
 0x6b5   : > { %v1979_v14 = vpop.xlane.xlu1 %1978 }
 0x6b6   : > { %v2045_v0 = vadd.f32 %v2029_v62, %v1979_v14 }
 0x6b7   : > { %v2241_v14 = vpop.f32.mrf.mxu3 }
 0x6b8   : > { %2062 = vst.msk [vmem:[#allocation4 + $0x30] sm:$0xff] %vm2055_vm8, %v2045_v0 }
 0x6b9   : > { %5002 = vmatmul.msk.bf16.gmra.mxu1 %vm797_vm5, %v8190_v48  ;;  %v2021_v48 = vld [vmem:[#allocation4 + $0x70] sm:$0xff] }
 0x6bd   : > { %v1988_v25 = vpop.xlane.xlu1 %1987 }
 0x6be   : > { %v2048_v46 = vadd.f32 %v2032_v34, %v1988_v25  ;;  %v2037_v25 = vmul.f32 %v6560_v54, %v2021_v48 }
 0x6bf   : > { %v2244_v0 = vpop.f32.mrf.mxu3 }
 0x6c0   : > { %2065 = vst.msk [vmem:[#allocation4 + $0x48] sm:$0xff] %vm2055_vm8, %v2048_v46  ;;  %3222 = vrot.lane.b32.xlu2 %v5485_v51, %s5616_s11 }
 0x6c5   : > { %v1997_v4 = vpop.xlane.xlu1 %1996 }
 0x6c6   : > { %v2051_v58 = vadd.f32 %v2035_v60, %v1997_v4  ;;  %v3227_v4 = vpop.permute.xlu0 %3226 }
 0x6c8   : > { %2068 = vst.msk [vmem:[#allocation4 + $0x60] sm:$0xff] %vm2055_vm8, %v2051_v58  ;;  %v6835_v58 = vld [vmem:[#allocation3 + $0x8] sm:$0xff] }
 0x6c9   : > { %5003 = vmatmul.msk.bf16.gmra.mxu1 %vm797_vm5, %v8191_v13 }
 0x6cd   : > { %v2006_v19 = vpop.xlane.xlu1 %2005 }
 0x6ce   : > { %v2054_v17 = vadd.f32 %v2038_v38, %v2006_v19  ;;  %v2074_v38 = vld [vmem:[#allocation5 + $0x10] sm:$0xff] }
 0x6cf   : > { %v2170_v19 = vmul.f32 %v6517_v20, %v2074_v38  ;;  %v2073_v20 = vld [vmem:[#allocation5 + $0x8] sm:$0xff] }
 0x6d0   : > { %2071 = vst.msk [vmem:[#allocation4 + $0x78] sm:$0xff] %vm2055_vm8, %v2054_v17  ;;  %v6845_v17 = vld [vmem:[#allocation3 + $0x10] sm:$0xff]  ;;  %v2169_v1 = vmul.f32 %v6512_v21, %v2073_v20 }
 0x6d9   : > { %5004 = vmatmul.msk.bf16.gmra.mxu1 %vm797_vm5, %v8192_v31 }
 0x6da   : > { %v1985_v55 = vpop.xlane.xlu2 %1984 }
 0x6db   : > { %v2047_v47 = vadd.f32 %v2031_v49, %v1985_v55 }
 0x6dd   : > { %2064 = vst.msk [vmem:[#allocation4 + $0x40] sm:$0xff] %vm2055_vm8, %v2047_v47 }
 0x6e2   : > { %v3221_v37 = vpop.permute.xlu2 %3220 }
 0x6e3   : > { %5014 = vmatmul.msk.bf16.gmra.mxu0 %vm797_vm5, %v3221_v37 }
 0x6e6   : > { %v6789_v61 = vpop.f32.mrf.mxu1 }
 0x6e7   : > { %v2507_v5 = vsel %vm899_vm6, %v6789_v61, -inf }
 0x6e8   : > { %2508 = vmax.xlane.f32.xlu1 %v2507_v5 }
 0x6e9   : > { %2002 = vadd.xlane.f32.xlu2 %v2001_v44 }
 0x6ee   : > { %v6794_v53 = vpop.f32.mrf.mxu1 }
 0x6ef   : > { %v2510_v22 = vsel %vm899_vm6, %v6794_v53, -inf }
 0x6f1   : > { %2511 = vmax.xlane.f32.xlu2 %v2510_v22 }
 0x6f6   : > { %v6798_v8 = vpop.f32.mrf.mxu1 }
 0x6f7   : > { %v2513_v15 = vsel %vm899_vm6, %v6798_v8, -inf }
 0x6f8   : > { %2514 = vmax.xlane.f32.xlu0 %v2513_v15 }
 0x6fe   : > { %v6807_v39 = vpop.f32.mrf.mxu1 }
 0x6ff   : > { %v2516_v29 = vsel %vm899_vm6, %v6807_v39, -inf }
 0x701   : > { %2287 = vrot.lane.b32.xlu1 %v2231_v30, %s5617_s30  ;;  %v2246_v30 = vpop.f32.mrf.mxu3 }
 0x706   : > { %v6811_v56 = vpop.f32.mrf.mxu1 }
 0x707   : > { %v2519_v62 = vsel %vm899_vm6, %v6811_v56, -inf }
 0x709   : > { %2289 = vrot.lane.b32.xlu2 %v2234_v6, %s5617_s30  ;;  %v2249_v21 = vpop.f32.mrf.mxu3 }
 0x70c   : > { %2291 = vrot.lane.b32.xlu0 %v2236_v2, %s5617_s30  ;;  %v2075_v2 = vld [vmem:[#allocation5 + $0x18] sm:$0xff] }
 0x70e   : > { %v6815_v40 = vpop.f32.mrf.mxu1 }
 0x70f   : > { %v2522_v18 = vsel %vm899_vm6, %v6815_v40, -inf }
 0x711   : > { %3224 = vrot.lane.b32.xlu2 %v5486_v63, %s5616_s11  ;;  %v2171_v63 = vmul.f32 %v6466_v3, %v2075_v2 }
 0x716   : > { %v6827_v46 = vpop.f32.mrf.mxu1 }
 0x717   : > { %v2525_v47 = vsel %vm899_vm6, %v6827_v46, -inf }
 0x71b   : > { %v1994_v10 = vpop.xlane.xlu2 %1993 }
 0x71c   : > { %v2050_v9 = vadd.f32 %v2034_v28, %v1994_v10  ;;  %v2251_v10 = vpop.f32.mrf.mxu3 }
 0x71e   : > { %2067 = vst.msk [vmem:[#allocation4 + $0x58] sm:$0xff] %vm2055_vm8, %v2050_v9  ;;  %v6840_v54 = vpop.f32.mrf.mxu1 }
 0x71f   : > { %v2528_v6 = vsel %vm899_vm6, %v6840_v54, -inf }
 0x723   : > { %v3223_v57 = vpop.permute.xlu2 %3222 }
 0x724   : > { %5015 = vmatmul.msk.bf16.gmra.mxu0 %vm797_vm5, %v3223_v57  ;;  %v6872_v57 = vld [vmem:[#allocation3 + $0x18] sm:$0xff] }
 0x726   : > { %v6855_v37 = vpop.f32.mrf.mxu1 }
 0x727   : > { %v2531_v44 = vsel %vm899_vm6, %v6855_v37, -inf }
 0x72b   : > { %2517 = vmax.xlane.f32.xlu1 %v2516_v29 }
 0x72e   : > { %v6870_v9 = vpop.f32.mrf.mxu1 }
 0x736   : > { %2523 = vmax.xlane.f32.xlu0 %v2522_v18  ;;  %v6879_v18 = vpop.f32.mrf.mxu1 }
 0x73a   : > { %2520 = vmax.xlane.f32.xlu2 %v2519_v62 }
 0x744   : > { %2293 = vrot.lane.b32.xlu1 %v2239_v42, %s5617_s30  ;;  %v6881_v42 = vld [vmem:[#allocation3 + $0x28] sm:$0xff] }
 0x74a   : > { %2297 = vrot.lane.b32.xlu0 %v2244_v0, %s5617_s30  ;;  %v6888_v0 = vld [vmem:[#allocation3 + $0x20] sm:$0xff] }
 0x752   : > { %2295 = vrot.lane.b32.xlu2 %v2241_v14, %s5617_s30 }
 0x75b   : > { %v2509_v34 = vpop.xlane.xlu1 %2508 }
 0x75c   : > { %v6830_v51 = vmax.f32 %v6824_v59, %v2509_v34  ;;  %v2003_v11 = vpop.xlane.xlu2 %2002  ;;  %v6890_v34 = vpop.f32.mrf.mxu1 }
 0x75d   : > { %v2053_v60 = vadd.f32 %v2037_v25, %v2003_v11  ;;  %v2534_v11 = vsel %vm899_vm6, %v6870_v9, -inf }
 0x75e   : > { %3202 = vst.msk [vmem:[#allocation3] sm:$0xff] %vm2891_vm10, %v6830_v51 }
 0x75f   : > { %2070 = vst.msk [vmem:[#allocation4 + $0x70] sm:$0xff] %vm2055_vm8, %v2053_v60  ;;  %v2540_v60 = vsel %vm899_vm6, %v6890_v34, -inf }
 0x764   : > { %v2512_v13 = vpop.xlane.xlu2 %2511 }
 0x765   : > { %v6838_v43 = vmax.f32 %v6835_v58, %v2512_v13  ;;  %v2254_v13 = vpop.f32.mrf.mxu3 }
 0x767   : > { %3203 = vst.msk [vmem:[#allocation3 + $0x8] sm:$0xff] %vm2891_vm10, %v6838_v43 }
 0x76b   : > { %v2515_v7 = vpop.xlane.xlu0 %2514 }
 0x76c   : > { %v6848_v31 = vmax.f32 %v6845_v17, %v2515_v7  ;;  %v2290_v49 = vpop.permute.xlu2 %2289 }
 0x76d   : > { %v2335_v55 = vadd.f32 %v2290_v49, %v2170_v19  ;;  %v2076_v19 = vld [vmem:[#allocation5 + $0x20] sm:$0xff] }
 0x76e   : > { %3204 = vst.msk [vmem:[#allocation3 + $0x10] sm:$0xff] %vm2891_vm10, %v6848_v31  ;;  %2526 = vmax.xlane.f32.xlu1 %v2525_v47  ;;  %v2172_v7 = vmul.f32 %v6572_v45, %v2076_v19  ;;  %v2080_v19 = vld [vmem:[#allocation5 + $0x40] sm:$0xff] }
 0x76f   : > { %2352 = vst.msk [vmem:[#allocation5 + $0x10] sm:$0xff] %vm2349_vm9, %v2335_v55 }
 0x773   : > { %v2288_v5 = vpop.permute.xlu1 %2287 }
 0x774   : > { %v2334_v22 = vadd.f32 %v2288_v5, %v2169_v1  ;;  %v3225_v15 = vpop.permute.xlu2 %3224  ;;  %2532 = vmax.xlane.f32.xlu0 %v2531_v44  ;;  %v2078_v1 = vld [vmem:[#allocation5 + $0x30] sm:$0xff]  ;;  %v2537_v44 = vsel %vm899_vm6, %v6879_v18, -inf }
 0x775   : > { %5016 = vmatmul.msk.bf16.gmra.mxu0 %vm797_vm5, %v3225_v15  ;;  %v2174_v5 = vmul.f32 %v6594_v16, %v2078_v1  ;;  %v2081_v1 = vld [vmem:[#allocation5 + $0x48] sm:$0xff] }
 0x776   : > { %2351 = vst.msk [vmem:[#allocation5 + $0x8] sm:$0xff] %vm2349_vm9, %v2334_v22 }
 0x77b   : > { %2529 = vmax.xlane.f32.xlu2 %v2528_v6  ;;  %v2497_v6 = vld [vmem:[#allocation3 + $0x30] sm:$0xff] }
 0x77e   : > { %v2292_v23 = vpop.permute.xlu0 %2291 }
 0x77f   : > { %v2336_v28 = vadd.f32 %v2292_v23, %v2171_v63 }
 0x781   : > { %2353 = vst.msk [vmem:[#allocation5 + $0x18] sm:$0xff] %vm2349_vm9, %v2336_v28 }
 0x785   : > { %5017 = vmatmul.msk.bf16.gmra.mxu0 %vm797_vm5, %v3227_v4  ;;  %v2077_v4 = vld [vmem:[#allocation5 + $0x28] sm:$0xff] }
 0x786   : > { %v2173_v38 = vmul.f32 %v6509_v35, %v2077_v4  ;;  %v2256_v35 = vpop.f32.mrf.mxu3 }
 0x787   : > { %2299 = vrot.lane.b32.xlu1 %v2246_v30, %s5617_s30  ;;  %v6912_v30 = vpop.f32.mrf.mxu1 }
 0x788   : > { %2303 = vrot.lane.b32.xlu0 %v2251_v10, %s5617_s30 }
 0x78e   : > { %v2259_v45 = vpop.f32.mrf.mxu3 }
 0x78f   : > { %v6914_v2 = vpop.f32.mrf.mxu1 }
 0x793   : > { %2301 = vrot.lane.b32.xlu2 %v2249_v21, %s5617_s30  ;;  %v6920_v21 = vld [vmem:[#allocation3 + $0x40] sm:$0xff] }
 0x79e   : > { %v2518_v29 = vpop.xlane.xlu1 %2517 }
 0x79f   : > { %v6875_v3 = vmax.f32 %v6872_v57, %v2518_v29  ;;  %v5618_v29 = vmov 2  }
 0x7a0   : > { %5217 = vset.pattern.permute.xlu0 %v5618_v29  ;;  %5216 = vset.pattern.permute.xlu2 %v5618_v29 }
 0x7a1   : > { %3205 = vst.msk [vmem:[#allocation3 + $0x18] sm:$0xff] %vm2891_vm10, %v6875_v3  ;;  %5218 = vset.pattern.permute.xlu1 %v5618_v29  ;;  %v2571_v29 = vsub.f32 %v6824_v59, %v6830_v51 }
 0x7a9   : > { %v2524_v62 = vpop.xlane.xlu0 %2523 }
 0x7aa   : > { %v6884_v14 = vmax.f32 %v6881_v42, %v2524_v62  ;;  %v6929_v62 = vpop.f32.mrf.mxu1 }
 0x7ab   : > { %v2549_v4 = vsel %vm899_vm6, %v6929_v62, -inf }
 0x7ac   : > { %3207 = vst.msk [vmem:[#allocation3 + $0x28] sm:$0xff] %vm2891_vm10, %v6884_v14 }
 0x7ad   : > { %v2521_v48 = vpop.xlane.xlu2 %2520 }
 0x7ae   : > { %v6893_v25 = vmax.f32 %v6888_v0, %v2521_v48  ;;  %v6931_v48 = vld [vmem:[#allocation3 + $0x38] sm:$0xff] }
 0x7b0   : > { %3206 = vst.msk [vmem:[#allocation3 + $0x20] sm:$0xff] %vm2891_vm10, %v6893_v25 }
 0x7b1   : > { %2535 = vmax.xlane.f32.xlu1 %v2534_v11 }
 0x7b2   : > { %2541 = vmax.xlane.f32.xlu0 %v2540_v60 }
 0x7b5   : > { %v2296_v49 = vpop.permute.xlu2 %2295 }
 0x7b6   : > { %v2338_v55 = vadd.f32 %v2296_v49, %v2173_v38  ;;  %v2294_v47 = vpop.permute.xlu1 %2293  ;;  %v2543_v38 = vsel %vm899_vm6, %v6912_v30, -inf }
 0x7b7   : > { %v2337_v20 = vadd.f32 %v2294_v47, %v2172_v7  ;;  %v2176_v7 = vmul.f32 %v6565_v12, %v2080_v19  ;;  %v2546_v12 = vsel %vm899_vm6, %v6914_v2, -inf  ;;  %v6966_v19 = vld [vmem:[#allocation3 + $0x48] sm:$0xff] }
 0x7b8   : > { %2355 = vst.msk [vmem:[#allocation5 + $0x28] sm:$0xff] %vm2349_vm9, %v2338_v55  ;;  %v2079_v55 = vld [vmem:[#allocation5 + $0x38] sm:$0xff] }
 0x7b9   : > { %2354 = vst.msk [vmem:[#allocation5 + $0x20] sm:$0xff] %vm2349_vm9, %v2337_v20  ;;  %v2175_v20 = vmul.f32 %v6618_v33, %v2079_v55 }
 0x7bc   : > { %2538 = vmax.xlane.f32.xlu2 %v2537_v44  ;;  %v2298_v22 = vpop.permute.xlu0 %2297 }
 0x7bd   : > { %v2339_v15 = vadd.f32 %v2298_v22, %v2174_v5  ;;  %v2177_v5 = vmul.f32 %v6642_v26, %v2081_v1  ;;  %v2501_v1 = vld [vmem:[#allocation3 + $0x50] sm:$0xff] }
 0x7bf   : > { %2356 = vst.msk [vmem:[#allocation5 + $0x30] sm:$0xff] %vm2349_vm9, %v2339_v15 }
 0x7c6   : > { %2309 = vrot.lane.b32.xlu0 %v2259_v45, %s5617_s30 }
 0x7ca   : > { %2305 = vrot.lane.b32.xlu1 %v2254_v13, %s5617_s30  ;;  %v2261_v13 = vpop.f32.mrf.mxu3 }
 0x7d2   : > { %v2264_v44 = vpop.f32.mrf.mxu3 }
 0x7d4   : > { %2307 = vrot.lane.b32.xlu2 %v2256_v35, %s5617_s30 }
 0x7e1   : > { %v2527_v16 = vpop.xlane.xlu1 %2526 }
 0x7e2   : > { %v6916_v63 = vmax.f32 %v2497_v6, %v2527_v16  ;;  %v2266_v16 = vpop.f32.mrf.mxu3 }
 0x7e4   : > { %3208 = vst.msk [vmem:[#allocation3 + $0x30] sm:$0xff] %vm2891_vm10, %v6916_v63  ;;  %v2577_v33 = vsub.f32 %v2497_v6, %v6916_v63  ;;  %v2572_v6 = vsub.f32 %v6835_v58, %v6838_v43 }
 0x7e6   : > { %v2599_v26 = vmul.f32 1.442695, %v2577_v33 }
 0x7e7   : > { %v2533_v23 = vpop.xlane.xlu0 %2532 }
 0x7e8   : > { %v6923_v28 = vmax.f32 %v6920_v21, %v2533_v23  ;;  %v5487_v23 = vld [vmem:[#allocation2 + $0x28] sm:$0xff]  ;;  %5350 = vpow2.f32 %v2599_v26 }
 0x7ea   : > { %v2579_v10 = vsub.f32 %v6920_v21, %v6923_v28  ;;  %3210 = vst.msk [vmem:[#allocation3 + $0x40] sm:$0xff] %vm2891_vm10, %v6923_v28 }
 0x7ee   : > { %v2530_v11 = vpop.xlane.xlu2 %2529 }
 0x7ef   : > { %v6934_v60 = vmax.f32 %v6931_v48, %v2530_v11  ;;  %v2587_v11 = vmul.f32 1.442695, %v2571_v29  ;;  %v2082_v29 = vld [vmem:[#allocation5 + $0x50] sm:$0xff] }
 0x7f0   : > { %2550 = vmax.xlane.f32.xlu0 %v2549_v4  ;;  %v6958_v4 = vpop.eup %5350 }
 0x7f1   : > { %3209 = vst.msk [vmem:[#allocation3 + $0x38] sm:$0xff] %vm2891_vm10, %v6934_v60  ;;  %5352 = vpow2.f32 %v2587_v11  ;;  %v2178_v11 = vmul.f32 %v6665_v24, %v2082_v29  ;;  %v2574_v24 = vsub.f32 %v6872_v57, %v6875_v3  ;;  %v5489_v29 = vld [vmem:[#allocation2 + $0x38] sm:$0xff] }
 0x7f4   : > { %2544 = vmax.xlane.f32.xlu1 %v2543_v38 }
 0x7f6   : > { %v2302_v49 = vpop.permute.xlu2 %2301 }
 0x7f7   : > { %v2341_v47 = vadd.f32 %v2302_v49, %v2176_v7  ;;  %v6964_v38 = vpop.eup %5352  ;;  %v6973_v49 = vld [vmem:[#allocation3 + $0x58] sm:$0xff] }
 0x7f9   : > { %2358 = vst.msk [vmem:[#allocation5 + $0x40] sm:$0xff] %vm2349_vm9, %v2341_v47  ;;  %v2300_v22 = vpop.permute.xlu1 %2299 }
 0x7fa   : > { %v2340_v35 = vadd.f32 %v2300_v22, %v2175_v20  ;;  %v2304_v15 = vpop.permute.xlu0 %2303  ;;  %v2573_v20 = vsub.f32 %v6845_v17, %v6848_v31 }
 0x7fb   : > { %v2342_v45 = vadd.f32 %v2304_v15, %v2177_v5 }
 0x7fc   : > { %2357 = vst.msk [vmem:[#allocation5 + $0x38] sm:$0xff] %vm2349_vm9, %v2340_v35  ;;  %v2591_v22 = vmul.f32 1.442695, %v2573_v20  ;;  %v2084_v35 = vld [vmem:[#allocation5 + $0x60] sm:$0xff]  ;;  %v2593_v20 = vmul.f32 1.442695, %v2574_v24 }
 0x7fd   : > { %2359 = vst.msk [vmem:[#allocation5 + $0x48] sm:$0xff] %vm2349_vm9, %v2342_v45  ;;  %2547 = vmax.xlane.f32.xlu2 %v2546_v12  ;;  %v2180_v45 = vmul.f32 %v6681_v41, %v2084_v35  ;;  %v2504_v35 = vld [vmem:[#allocation3 + $0x68] sm:$0xff] }
 0x7fe   : > { %v2085_v24 = vld [vmem:[#allocation5 + $0x68] sm:$0xff] }
 0x804   : > { %2315 = vrot.lane.b32.xlu0 %v2266_v16, %s5617_s30 }
 0x80c   : > { %2626 = vperm.xlu0 %5217, %v6838_v43   ;;  %v2603_v43 = vmul.f32 1.442695, %v2579_v10 }
 0x80d   : > { %2311 = vrot.lane.b32.xlu1 %v2261_v13, %s5617_s30  ;;  %v2589_v13 = vmul.f32 1.442695, %v2572_v6 }
 0x80f   : > { %5354 = vpow2.f32 %v2589_v13  ;;  %v2575_v13 = vsub.f32 %v6888_v0, %v6893_v25  ;;  %v2576_v0 = vsub.f32 %v6881_v42, %v6884_v14  ;;  %v7041_v42 = vld [vmem:[#allocation3 + $0x70] sm:$0xff] }
 0x810   : > { %5356 = vpow2.f32 %v2603_v43 }
 0x811   : > { %5358 = vpow2.f32 %v2591_v22  ;;  %v5488_v22 = vld [vmem:[#allocation2 + $0x30] sm:$0xff] }
 0x814   : > { %3228 = vrot.lane.b32.xlu0 %v5487_v23, %s5616_s11 }
 0x815   : > { %2313 = vrot.lane.b32.xlu2 %v2264_v44, %s5617_s30  ;;  %v6987_v47 = vpop.eup %5354 }
 0x816   : > { %v6998_v21 = vpop.eup %5356 }
 0x81c   : > { %2956 = vperm.xlu0 %5217, %v6958_v4  }
 0x81d   : > { %2621 = vperm.xlu2 %5216, %v6830_v51  }
 0x824   : > { %v2536_v7 = vpop.xlane.xlu1 %2535  ;;  %2661 = vperm.xlu0 %5217, %v6923_v28   ;;  %v7000_v28 = vpop.f32.mrf.mxu1 }
 0x825   : > { %v6970_v59 = vmax.f32 %v6966_v19, %v2536_v7  ;;  %2926 = vperm.xlu2 %5216, %v6964_v38   ;;  %v2542_v51 = vpop.xlane.xlu0 %2541  ;;  %v2552_v15 = vsel %vm899_vm6, %v7000_v28, -inf  ;;  %v2595_v7 = vmul.f32 1.442695, %v2575_v13 }
 0x826   : > { %v6976_v55 = vmax.f32 %v6973_v49, %v2542_v51 }
 0x827   : > { %3211 = vst.msk [vmem:[#allocation3 + $0x48] sm:$0xff] %vm2891_vm10, %v6970_v59 }
 0x828   : > { %v2582_v58 = vsub.f32 %v6973_v49, %v6976_v55  ;;  %3213 = vst.msk [vmem:[#allocation3 + $0x58] sm:$0xff] %vm2891_vm10, %v6976_v55 }
 0x82c   : > { %3020 = vrot.lane.b32.xlu0 %v6602_v32, %s5619_s13  ;;  %v2083_v32 = vld [vmem:[#allocation5 + $0x58] sm:$0xff] }
 0x82d   : > { %2931 = vperm.xlu2 %5216, %v6987_v47   ;;  %v2179_v17 = vmul.f32 %v6607_v36, %v2083_v32  ;;  %v7012_v36 = vpop.eup %5358 }
 0x82f   : > { %v2539_v5 = vpop.xlane.xlu2 %2538 }
 0x830   : > { %v6994_v44 = vmax.f32 %v2501_v1, %v2539_v5 }
 0x832   : > { %3212 = vst.msk [vmem:[#allocation3 + $0x50] sm:$0xff] %vm2891_vm10, %v6994_v44  ;;  %v2581_v10 = vsub.f32 %v2501_v1, %v6994_v44  ;;  %v2597_v1 = vmul.f32 1.442695, %v2576_v0 }
 0x834   : > { %2966 = vperm.xlu0 %5217, %v6998_v21   ;;  %v2607_v26 = vmul.f32 1.442695, %v2581_v10 }
 0x835   : > { %2636 = vperm.xlu2 %5216, %v6875_v3   ;;  %v2578_v3 = vsub.f32 %v6931_v48, %v6934_v60 }
 0x836   : > { %5360 = vpow2.f32 %v2607_v26 }
 0x837   : > { %v2308_v12 = vpop.permute.xlu2 %2307  ;;  %2553 = vmax.xlane.f32.xlu1 %v2552_v15  ;;  %5362 = vpow2.f32 %v2595_v7 }
 0x838   : > { %v2344_v16 = vadd.f32 %v2308_v12, %v2179_v17  ;;  %v2310_v33 = vpop.permute.xlu0 %2309  ;;  %5364 = vpow2.f32 %v2593_v20 }
 0x839   : > { %v2345_v23 = vadd.f32 %v2310_v33, %v2180_v45  ;;  %5366 = vpow2.f32 %v2597_v1  ;;  %v2580_v45 = vsub.f32 %v6966_v19, %v6970_v59  ;;  %v2087_v33 = vld [vmem:[#allocation5 + $0x78] sm:$0xff] }
 0x83a   : > { %2361 = vst.msk [vmem:[#allocation5 + $0x58] sm:$0xff] %vm2349_vm9, %v2344_v16 }
 0x83b   : > { %2362 = vst.msk [vmem:[#allocation5 + $0x60] sm:$0xff] %vm2349_vm9, %v2345_v23  ;;  %v2605_v26 = vmul.f32 1.442695, %v2580_v45 }
 0x83c   : > { %v2306_v6 = vpop.permute.xlu1 %2305  ;;  %2676 = vperm.xlu0 %5217, %v6976_v55   ;;  %v7019_v51 = vpop.eup %5360 }
 0x83d   : > { %v2343_v41 = vadd.f32 %v2306_v6, %v2178_v11  ;;  %2936 = vperm.xlu2 %5216, %v7012_v36   ;;  %v7025_v43 = vpop.eup %5362  ;;  %v2086_v11 = vld [vmem:[#allocation5 + $0x70] sm:$0xff] }
 0x83f   : > { %2360 = vst.msk [vmem:[#allocation5 + $0x50] sm:$0xff] %vm2349_vm9, %v2343_v41  ;;  %v2182_v41 = vmul.f32 %v6654_v27, %v2086_v11  ;;  %v2181_v27 = vmul.f32 %v6696_v50, %v2085_v24 }
 0x844   : > { %2976 = vperm.xlu0 %5217, %v7019_v51  }
 0x845   : > { %2641 = vperm.xlu2 %5216, %v6893_v25   ;;  %v7032_v25 = vpop.eup %5364 }
 0x846   : > { %v7035_v57 = vpop.eup %5366 }
 0x84d   : > { %2946 = vperm.xlu2 %5216, %v7025_v43  }
 0x850   : > { %2631 = vperm.xlu1 %5218, %v6848_v31  }
 0x855   : > { %2651 = vperm.xlu2 %5216, %v6916_v63   ;;  %v2601_v63 = vmul.f32 1.442695, %v2578_v3 }
 0x857   : > { %5368 = vpow2.f32 %v2601_v63 }
 0x858   : > { %2941 = vperm.xlu1 %5218, %v7032_v25  }
 0x85d   : > { %2951 = vperm.xlu2 %5216, %v7035_v57   ;;  %v7055_v17 = vpop.eup %5368 }
 0x860   : > { %2646 = vperm.xlu1 %5218, %v6884_v14   ;;  %v2503_v14 = vld [vmem:[#allocation3 + $0x60] sm:$0xff] }
 0x863   : > { %v2551_v31 = vpop.xlane.xlu0 %2550 }
 0x864   : > { %v7044_v5 = vmax.f32 %v7041_v42, %v2551_v31 }
 0x865   : > { %3230 = vrot.lane.b32.xlu2 %v5488_v22, %s5616_s11 }
 0x866   : > { %v2585_v32 = vsub.f32 %v7041_v42, %v7044_v5  ;;  %3216 = vst.msk [vmem:[#allocation3 + $0x70] sm:$0xff] %vm2891_vm10, %v7044_v5  ;;  %2691 = vperm.xlu0 %5217, %v7044_v5   ;;  %v7110_v5 = vld [vmem:[%s5843_s7 + $0x18] sm:$0xff] }
 0x867   : > { %v2545_v48 = vpop.xlane.xlu1 %2544 }
 0x868   : > { %v2567_v10 = vmax.f32 %v2503_v14, %v2545_v48  ;;  %2656 = vperm.xlu1 %5218, %v6934_v60   ;;  %v2183_v60 = vmul.f32 %v6715_v52, %v2087_v33  ;;  %v2609_v52 = vmul.f32 1.442695, %v2582_v58  ;;  %v2615_v11 = vmul.f32 1.442695, %v2585_v32 }
 0x86a   : > { %3214 = vst.msk [vmem:[#allocation3 + $0x60] sm:$0xff] %vm2891_vm10, %v2567_v10  ;;  %v2583_v49 = vsub.f32 %v2503_v14, %v2567_v10 }
 0x86c   : > { %v2611_v58 = vmul.f32 1.442695, %v2583_v49 }
 0x86d   : > { %2666 = vperm.xlu2 %5216, %v6970_v59  }
 0x870   : > { %v2548_v15 = vpop.xlane.xlu2 %2547  ;;  %2961 = vperm.xlu1 %5218, %v7055_v17  }
 0x871   : > { %v2568_v12 = vmax.f32 %v2504_v35, %v2548_v15 }
 0x873   : > { %v2584_v16 = vsub.f32 %v2504_v35, %v2568_v12  ;;  %3215 = vst.msk [vmem:[#allocation3 + $0x68] sm:$0xff] %vm2891_vm10, %v2568_v12 }
 0x875   : > { %v2613_v23 = vmul.f32 1.442695, %v2584_v16  ;;  %3232 = vrot.lane.b32.xlu2 %v5489_v29, %s5616_s11 }
 0x876   : > { %v2316_v6 = vpop.permute.xlu0 %2315 }
 0x877   : > { %5370 = vpow2.f32 %v2613_v23  ;;  %v2348_v13 = vadd.f32 %v2316_v6, %v2183_v60  ;;  %v2506_v6 = vld [vmem:[#allocation3 + $0x78] sm:$0xff] }
 0x878   : > { %v2314_v7 = vpop.permute.xlu2 %2313  ;;  %2671 = vperm.xlu1 %5218, %v6994_v44   ;;  %5372 = vpow2.f32 %v2605_v26 }
 0x879   : > { %2365 = vst.msk [vmem:[#allocation5 + $0x78] sm:$0xff] %vm2349_vm9, %v2348_v13  ;;  %v2347_v19 = vadd.f32 %v2314_v7, %v2182_v41  ;;  %5374 = vpow2.f32 %v2609_v52 }
 0x87a   : > { %5376 = vpow2.f32 %v2611_v58 }
 0x87b   : > { %2364 = vst.msk [vmem:[#allocation5 + $0x70] sm:$0xff] %vm2349_vm9, %v2347_v19 }
 0x87d   : > { %v7070_v59 = vpop.eup %5370  ;;  %2681 = vperm.xlu2 %5216, %v2567_v10  }
 0x87e   : > { %2991 = vperm.xlu0 %5217, %v7070_v59   ;;  %v2627_v44 = vpop.permute.xlu0 %2626  ;;  %v7074_v20 = vpop.eup %5372 }
 0x87f   : > { %v2312_v0 = vpop.permute.xlu1 %2311  ;;  %v7078_v55 = vpop.eup %5374  ;;  %v2700_v63 = vsub.f32 %v6794_v53, %v2627_v44 }
 0x880   : > { %v2346_v1 = vadd.f32 %v2312_v0, %v2181_v27  ;;  %v2622_v3 = vpop.permute.xlu2 %2621  ;;  %2971 = vperm.xlu1 %5218, %v7074_v20   ;;  %v7086_v35 = vpop.eup %5376 }
 0x881   : > { %v2699_v31 = vsub.f32 %v6789_v61, %v2622_v3 }
 0x882   : > { %2363 = vst.msk [vmem:[#allocation5 + $0x68] sm:$0xff] %vm2349_vm9, %v2346_v1 }
 0x883   : > { %v2715_v48 = vpack.c.bf16 %v2700_v63, %v2699_v31 }
 0x885   : > { %2981 = vperm.xlu2 %5216, %v7078_v55   ;;  %v2723_v14 = vunpack.c.l.bf16 %v2715_v48  ;;  %v2724_v10 = vunpack.c.h.bf16 %v2715_v48 }
 0x886   : > { %v3229_v50 = vpop.permute.xlu0 %3228 }
 0x887   : > { %5018 = vmatmul.msk.bf16.gmra.mxu0 %vm797_vm5, %v3229_v50  ;;  %v2739_v61 = vmul.f32 1.442695, %v2723_v14  ;;  %v2741_v45 = vmul.f32 1.442695, %v2724_v10 }
 0x888   : > { %v7084_v22 = vpop.permute.xlu2 %2926  ;;  %2686 = vperm.xlu1 %5218, %v2568_v12  }
 0x889   : > { %5378 = vpow2.f32 %v2739_v61 }
 0x88a   : > { %5380 = vpow2.f32 %v2741_v45 }
 0x88b   : > { %5382 = vpow2.f32 %v2615_v11 }
 0x88e   : > { %v7114_v32 = vpop.permute.xlu0 %2956 }
 0x88f   : > { %v5379_v16 = vpop.eup %5378 }
 0x890   : > { %v7088_v15 = vpop.permute.xlu2 %2931  ;;  %2986 = vperm.xlu1 %5218, %v7086_v35   ;;  %v5381_v33 = vpop.eup %5380 }
 0x891   : > { %v7091_v60 = vpack.c.bf16 %v5381_v33, %v5379_v16  ;;  %v7103_v24 = vpop.eup %5382 }
 0x893   : > { %v2780_v26 = vunpack.c.h.bf16 %v7091_v60 }
 0x895   : > { %v2798_v23 = vsel %vm899_vm6, %v2780_v26, 0.0 }
 0x896   : > { %v7121_v14 = vpop.permute.xlu0 %2661 }
 0x898   : > { %v2637_v53 = vpop.permute.xlu2 %2636 }
 0x899   : > { %v2702_v1 = vsub.f32 %v6807_v39, %v2637_v53 }
 0x89e   : > { %v7129_v33 = vpop.permute.xlu0 %3020 }
 0x8a0   : > { %v7093_v12 = vpop.permute.xlu2 %2936 }
 0x8a8   : > { %v2642_v29 = vpop.permute.xlu2 %2641  ;;  %2799 = vadd.xlane.f32.xlu0 %v2798_v23 }
 0x8aa   : > { %v2554_v41 = vpop.xlane.xlu1 %2553 }
 0x8ab   : > { %v2570_v13 = vmax.f32 %v2506_v6, %v2554_v41 }
 0x8ad   : > { %v2586_v7 = vsub.f32 %v2506_v6, %v2570_v13  ;;  %3217 = vst.msk [vmem:[#allocation3 + $0x78] sm:$0xff] %vm2891_vm10, %v2570_v13  ;;  %2696 = vperm.xlu2 %5216, %v2570_v13  }
 0x8af   : > { %v2617_v19 = vmul.f32 1.442695, %v2586_v7 }
 0x8b0   : > { %v7101_v52 = vpop.permute.xlu2 %2946 }
 0x8b1   : > { %8193 = vst [vmem:[#allocation15_spill] sm:$0xff] %v7101_v52  ;;  %5384 = vpow2.f32 %v2617_v19 }
 0x8b5   : > { %2996 = vperm.xlu2 %5216, %v7103_v24  }
 0x8b7   : > { %v7106_v27 = vpop.eup %5384 }
 0x8b8   : > { %v2652_v42 = vpop.permute.xlu2 %2651  ;;  %3001 = vperm.xlu1 %5218, %v7106_v27  }
 0x8bc   : > { %3026 = vrot.lane.b32.xlu0 %v7110_v5, %s5619_s13 }
 0x8c0   : > { %v7116_v44 = vpop.permute.xlu2 %2951 }
 0x8c2   : > { %v2632_v0 = vpop.permute.xlu1 %2631 }
 0x8c3   : > { %v2701_v3 = vsub.f32 %v6798_v8, %v2632_v0  ;;  %v2703_v8 = vsub.f32 %v6811_v56, %v2642_v29 }
 0x8c5   : > { %v2716_v49 = vpack.c.bf16 %v2702_v1, %v2701_v3  ;;  %v2705_v1 = vsub.f32 %v6827_v46, %v2652_v42  ;;  %v2779_v3 = vunpack.c.l.bf16 %v7091_v60  ;;  %v7142_v46 = vpop.f32.mrf.mxu0 }
 0x8c7   : > { %v2725_v58 = vunpack.c.l.bf16 %v2716_v49  ;;  %v2726_v31 = vunpack.c.h.bf16 %v2716_v49  ;;  %v7139_v49 = vpop.permute.xlu0 %2966 }
 0x8c8   : > { %v3231_v50 = vpop.permute.xlu2 %3230 }
 0x8c9   : > { %v2743_v63 = vmul.f32 1.442695, %v2725_v58  ;;  %v2745_v48 = vmul.f32 1.442695, %v2726_v31  ;;  %5019 = vmatmul.msk.bf16.gmra.mxu0 %vm797_vm5, %v3231_v50 }
 0x8ca   : > { %v7123_v10 = vpop.permute.xlu1 %2941 }
 0x8cb   : > { %5386 = vpow2.f32 %v2743_v63 }
 0x8cc   : > { %5388 = vpow2.f32 %v2745_v48  ;;  %v2795_v48 = vsel %vm899_vm6, %v2779_v3, 0.0 }
 0x8d0   : > { %v7125_v61 = vpop.permute.xlu2 %2666 }
 0x8d1   : > { %v5387_v45 = vpop.eup %5386 }
 0x8d2   : > { %v5389_v39 = vpop.eup %5388  ;;  %v2647_v53 = vpop.permute.xlu1 %2646 }
 0x8d3   : > { %v2704_v16 = vsub.f32 %v6815_v40, %v2647_v53  ;;  %v7131_v23 = vpack.c.bf16 %v5389_v39, %v5387_v45 }
 0x8d5   : > { %v2717_v26 = vpack.c.bf16 %v2704_v16, %v2703_v8  ;;  %v2781_v19 = vunpack.c.l.bf16 %v7131_v23  ;;  %v2677_v16 = vpop.permute.xlu0 %2676 }
 0x8d7   : > { %v2727_v11 = vunpack.c.l.bf16 %v2717_v26  ;;  %v2728_v6 = vunpack.c.h.bf16 %v2717_v26  ;;  %v2801_v29 = vsel %vm899_vm6, %v2781_v19, 0.0 }
 0x8d8   : > { %v3233_v41 = vpop.permute.xlu2 %3232 }
 0x8d9   : > { %v2747_v13 = vmul.f32 1.442695, %v2727_v11  ;;  %v2749_v7 = vmul.f32 1.442695, %v2728_v6  ;;  %5020 = vmatmul.msk.bf16.gmra.mxu0 %vm797_vm5, %v3233_v41  ;;  %v2710_v6 = vsub.f32 %v6890_v34, %v2677_v16 }
 0x8da   : > { %v2657_v0 = vpop.permute.xlu1 %2656 }
 0x8db   : > { %5390 = vpow2.f32 %v2747_v13  ;;  %v2706_v56 = vsub.f32 %v6840_v54, %v2657_v0 }
 0x8dc   : > { %5392 = vpow2.f32 %v2749_v7  ;;  %v7152_v7 = vpop.f32.mrf.mxu0 }
 0x8dd   : > { %v2718_v40 = vpack.c.bf16 %v2706_v56, %v2705_v1  ;;  %v3346_v56 = vsel %vm899_vm6, %v7152_v7, -inf }
 0x8de   : > { %2802 = vadd.xlane.f32.xlu2 %v2801_v29 }
 0x8df   : > { %v2729_v58 = vunpack.c.l.bf16 %v2718_v40  ;;  %v2730_v31 = vunpack.c.h.bf16 %v2718_v40 }
 0x8e1   : > { %v5391_v50 = vpop.eup %5390  ;;  %v2751_v63 = vmul.f32 1.442695, %v2729_v58  ;;  %v2753_v42 = vmul.f32 1.442695, %v2730_v31  ;;  %v7162_v58 = vld [vmem:[%s5843_s7 + $0x8] sm:$0xff] }
 0x8e2   : > { %v5393_v45 = vpop.eup %5392  ;;  %v7144_v54 = vpop.permute.xlu1 %2961  ;;  %2796 = vadd.xlane.f32.xlu1 %v2795_v48  ;;  %v7168_v48 = vld [vmem:[%s5843_s7 + $0x10] sm:$0xff] }
 0x8e3   : > { %8194 = vst [vmem:[#allocation23_spill] sm:$0xff] %v7144_v54  ;;  %v7146_v39 = vpack.c.bf16 %v5393_v45, %v5391_v50  ;;  %5394 = vpow2.f32 %v2751_v63 }
 0x8e4   : > { %5396 = vpow2.f32 %v2753_v42  ;;  %v7174_v42 = vpop.permute.xlu0 %2976 }
 0x8e5   : > { %v2783_v53 = vunpack.c.l.bf16 %v7146_v39  ;;  %8195 = vst [vmem:[#allocation20_spill] sm:$0xff] %v7174_v42 }
 0x8e7   : > { %v2807_v8 = vsel %vm899_vm6, %v2783_v53, 0.0 }
 0x8e8   : > { %2808 = vadd.xlane.f32.xlu0 %v2807_v8 }
 0x8e9   : > { %v5395_v11 = vpop.eup %5394 }
 0x8ea   : > { %v2672_v26 = vpop.permute.xlu1 %2671  ;;  %v5397_v13 = vpop.eup %5396 }
 0x8eb   : > { %v2709_v41 = vsub.f32 %v6879_v18, %v2672_v26  ;;  %v7156_v40 = vpack.c.bf16 %v5397_v13, %v5395_v11  ;;  %v7159_v18 = vpop.permute.xlu2 %2681  ;;  %v2708_v26 = vsub.f32 %v6870_v9, %v7125_v61 }
 0x8ec   : > { %v2692_v11 = vpop.permute.xlu0 %2691 }
 0x8ed   : > { %v2720_v19 = vpack.c.bf16 %v2710_v6, %v2709_v41  ;;  %v2786_v34 = vunpack.c.h.bf16 %v7156_v40  ;;  %v2707_v6 = vsub.f32 %v6855_v37, %v7121_v14 }
 0x8ef   : > { %v2733_v0 = vunpack.c.l.bf16 %v2720_v19  ;;  %v2734_v1 = vunpack.c.h.bf16 %v2720_v19  ;;  %v2816_v31 = vsel %vm899_vm6, %v2786_v34, 0.0  ;;  %v2719_v13 = vpack.c.bf16 %v2708_v26, %v2707_v6 }
 0x8f0   : > { %3347 = vmax.xlane.f32.xlu0 %v3346_v56  ;;  %v2713_v19 = vsub.f32 %v6929_v62, %v2692_v11  ;;  %v2784_v11 = vunpack.c.h.bf16 %v7146_v39 }
 0x8f1   : > { %v2759_v29 = vmul.f32 1.442695, %v2733_v0  ;;  %v2761_v3 = vmul.f32 1.442695, %v2734_v1  ;;  %v2731_v56 = vunpack.c.l.bf16 %v2719_v13  ;;  %v2732_v34 = vunpack.c.h.bf16 %v2719_v13 }
 0x8f3   : > { %5398 = vpow2.f32 %v2759_v29  ;;  %v7177_v8 = vpop.permute.xlu2 %2981  ;;  %v2757_v9 = vmul.f32 1.442695, %v2732_v34  ;;  %v2782_v34 = vunpack.c.h.bf16 %v7131_v23 }
 0x8f4   : > { %5400 = vpow2.f32 %v2761_v3  ;;  %v7186_v61 = vpop.permute.xlu0 %2991 }
 0x8f5   : > { %8196 = vst [vmem:[#allocation19_spill] sm:$0xff] %v7186_v61 }
 0x8f6   : > { %3022 = vrot.lane.b32.xlu2 %v7162_v58, %s5619_s13 }
 0x8f8   : > { %2817 = vadd.xlane.f32.xlu0 %v2816_v31 }
 0x8f9   : > { %v5399_v50 = vpop.eup %5398 }
 0x8fa   : > { %v5401_v63 = vpop.eup %5400 }
 0x8fb   : > { %3024 = vrot.lane.b32.xlu1 %v7168_v48, %s5619_s13  ;;  %v7172_v45 = vpack.c.bf16 %v5401_v63, %v5399_v50  ;;  %v2755_v63 = vmul.f32 1.442695, %v2731_v56 }
 0x8fd   : > { %v2789_v53 = vunpack.c.l.bf16 %v7172_v45 }
 0x8ff   : > { %v2825_v16 = vsel %vm899_vm6, %v2789_v53, 0.0 }
 0x900   : > { %2826 = vadd.xlane.f32.xlu0 %v2825_v16 }
 0x907   : > { %v2697_v41 = vpop.permute.xlu2 %2696 }
 0x908   : > { %v2714_v0 = vsub.f32 %v7000_v28, %v2697_v41  ;;  %v2844_v28 = vld [vmem:[#allocation4 + $0x8] sm:$0xff] }
 0x909   : > { %v2860_v16 = vmul.f32 %v6987_v47, %v2844_v28  ;;  %v3343_v47 = vsel %vm899_vm6, %v7142_v46, -inf }
 0x90a   : > { %v2722_v1 = vpack.c.bf16 %v2714_v0, %v2713_v19  ;;  %v2810_v0 = vsel %vm899_vm6, %v2784_v11, 0.0 }
 0x90c   : > { %v2737_v29 = vunpack.c.l.bf16 %v2722_v1  ;;  %v2738_v3 = vunpack.c.h.bf16 %v2722_v1 }
 0x90e   : > { %v2767_v31 = vmul.f32 1.442695, %v2737_v29  ;;  %v2769_v50 = vmul.f32 1.442695, %v2738_v3  ;;  %v7201_v29 = vpop.permute.xlu1 %2971 }
 0x910   : > { %5402 = vpow2.f32 %v2767_v31  ;;  %v2790_v31 = vunpack.c.h.bf16 %v7172_v45 }
 0x911   : > { %5404 = vpow2.f32 %v2769_v50  ;;  %v2804_v50 = vsel %vm899_vm6, %v2782_v34, 0.0 }
 0x912   : > { %5406 = vpow2.f32 %v2755_v63  ;;  %v2828_v63 = vsel %vm899_vm6, %v2790_v31, 0.0  ;;  %v7225_v31 = vpop.permute.xlu2 %2996 }
 0x913   : > { %5408 = vpow2.f32 %v2757_v9 }
 0x916   : > { %v5403_v37 = vpop.eup %5402 }
 0x917   : > { %v5405_v14 = vpop.eup %5404 }
 0x918   : > { %v7188_v62 = vpack.c.bf16 %v5405_v14, %v5403_v37  ;;  %v5407_v53 = vpop.eup %5406  ;;  %v2687_v37 = vpop.permute.xlu1 %2686  ;;  %v2785_v14 = vunpack.c.l.bf16 %v7156_v40 }
 0x919   : > { %v5409_v6 = vpop.eup %5408  ;;  %v2712_v28 = vsub.f32 %v6914_v2, %v2687_v37 }
 0x91a   : > { %v2793_v26 = vunpack.c.l.bf16 %v7188_v62  ;;  %v7196_v1 = vpack.c.bf16 %v5409_v6, %v5407_v53  ;;  %v2711_v53 = vsub.f32 %v6912_v30, %v7159_v18 }
 0x91b   : > { %v2800_v41 = vpop.xlane.xlu0 %2799 }
 0x91c   : > { %v2876_v13 = vadd.f32 %v2860_v16, %v2800_v41  ;;  %v2837_v19 = vsel %vm899_vm6, %v2793_v26, 0.0  ;;  %v2787_v56 = vunpack.c.l.bf16 %v7196_v1  ;;  %v2813_v16 = vsel %vm899_vm6, %v2785_v14, 0.0  ;;  %v7213_v26 = vpop.f32.mrf.mxu0  ;;  %v2845_v14 = vld [vmem:[#allocation4 + $0x10] sm:$0xff] }
 0x91d   : > { %2838 = vadd.xlane.f32.xlu0 %v2837_v19  ;;  %v2721_v11 = vpack.c.bf16 %v2712_v28, %v2711_v53  ;;  %v3349_v6 = vsel %vm899_vm6, %v7213_v26, -inf  ;;  %v2788_v41 = vunpack.c.h.bf16 %v7196_v1  ;;  %v2861_v28 = vmul.f32 %v7012_v36, %v2845_v14 }
 0x91e   : > { %2893 = vst.msk [vmem:[#allocation4 + $0x8] sm:$0xff] %vm2891_vm10, %v2876_v13  ;;  %v2819_v3 = vsel %vm899_vm6, %v2787_v56, 0.0 }
 0x91f   : > { %2811 = vadd.xlane.f32.xlu2 %v2810_v0  ;;  %v2735_v13 = vunpack.c.l.bf16 %v2721_v11  ;;  %v2736_v19 = vunpack.c.h.bf16 %v2721_v11  ;;  %v2822_v0 = vsel %vm899_vm6, %v2788_v41, 0.0 }
 0x921   : > { %v2763_v2 = vmul.f32 1.442695, %v2735_v13  ;;  %v2765_v56 = vmul.f32 1.442695, %v2736_v19 }
 0x923   : > { %5410 = vpow2.f32 %v2763_v2  ;;  %v2847_v2 = vld [vmem:[#allocation4 + $0x20] sm:$0xff] }
 0x924   : > { %v7219_v30 = vpop.f32.mrf.mxu0  ;;  %5412 = vpow2.f32 %v2765_v56  ;;  %v2863_v36 = vmul.f32 %v7025_v43, %v2847_v2 }
 0x925   : > { %3344 = vmax.xlane.f32.xlu1 %v3343_v47  ;;  %v3352_v18 = vsel %vm899_vm6, %v7219_v30, -inf  ;;  %v7223_v47 = vpop.permute.xlu1 %2986 }
 0x927   : > { %2820 = vadd.xlane.f32.xlu2 %v2819_v3 }
 0x929   : > { %v5411_v3 = vpop.eup %5410 }
 0x92a   : > { %v5413_v34 = vpop.eup %5412 }
 0x92d   : > { %2805 = vadd.xlane.f32.xlu1 %v2804_v50  ;;  %v7227_v50 = vpop.f32.mrf.mxu0  ;;  %v7233_v37 = vpop.permute.xlu1 %3001 }
 0x92e   : > { %v3027_v9 = vpop.permute.xlu0 %3026 }
 0x92f   : > { %2829 = vadd.xlane.f32.xlu2 %v2828_v63  ;;  %3060 = vmatpush.bf16.msrb.mxu3 %v3027_v9  ;;  %v3355_v63 = vsel %vm899_vm6, %v7227_v50, -inf  ;;  %v7231_v9 = vpack.c.bf16 %v5413_v34, %v5411_v3  ;;  %v7248_v34 = vld [vmem:[#allocation3 + $0x8] sm:$0xff] }
 0x931   : > { %v2791_v53 = vunpack.c.l.bf16 %v7231_v9 }
 0x933   : > { %v2831_v13 = vsel %vm899_vm6, %v2791_v53, 0.0  ;;  %v2850_v53 = vld [vmem:[#allocation4 + $0x38] sm:$0xff] }
 0x935   : > { %2814 = vadd.xlane.f32.xlu1 %v2813_v16  ;;  %v7256_v43 = vpop.f32.mrf.mxu0 }
 0x937   : > { %3350 = vmax.xlane.f32.xlu2 %v3349_v6  ;;  %v2843_v6 = vld [vmem:[#allocation4] sm:$0xff] }
 0x938   : > { %v2859_v41 = vmul.f32 %v6964_v38, %v2843_v6  ;;  %v2794_v38 = vunpack.c.h.bf16 %v7188_v62 }
 0x93d   : > { %2823 = vadd.xlane.f32.xlu1 %v2822_v0 }
 0x945   : > { %3353 = vmax.xlane.f32.xlu1 %v3352_v18 }
 0x94d   : > { %3356 = vmax.xlane.f32.xlu1 %v3355_v63 }
 0x94f   : > { %3862 = vrot.lane.b32.xlu2 %v7110_v5, %s5617_s30  ;;  %v2792_v5 = vunpack.c.h.bf16 %v7231_v9 }
 0x951   : > { %v2803_v16 = vpop.xlane.xlu2 %2802  ;;  %v2834_v3 = vsel %vm899_vm6, %v2792_v5, 0.0 }
 0x952   : > { %v2877_v11 = vadd.f32 %v2861_v28, %v2803_v16  ;;  %v2840_v28 = vsel %vm899_vm6, %v2794_v38, 0.0  ;;  %v2866_v16 = vmul.f32 %v7055_v17, %v2850_v53  ;;  %v5620_v17 = vmov 3  }
 0x953   : > { %5219 = vset.pattern.permute.xlu0 %v5620_v17  ;;  %5221 = vset.pattern.permute.xlu1 %v5620_v17 }
 0x954   : > { %2894 = vst.msk [vmem:[#allocation4 + $0x10] sm:$0xff] %vm2891_vm10, %v2877_v11  ;;  %5220 = vset.pattern.permute.xlu2 %v5620_v17 }
 0x955   : > { %v2797_v19 = vpop.xlane.xlu1 %2796  ;;  %2832 = vadd.xlane.f32.xlu1 %v2831_v13 }
 0x956   : > { %v2875_v0 = vadd.f32 %v2859_v41, %v2797_v19  ;;  %v3358_v41 = vsel %vm899_vm6, %v7256_v43, -inf }
 0x958   : > { %2892 = vst.msk [vmem:[#allocation4] sm:$0xff] %vm2891_vm10, %v2875_v0  ;;  %v2853_v0 = vld [vmem:[#allocation4 + $0x50] sm:$0xff] }
 0x959   : > { %v3023_v19 = vpop.permute.xlu2 %3022  ;;  %v2869_v5 = vmul.f32 %v7019_v51, %v2853_v0  ;;  %v7271_v51 = vpop.f32.mrf.mxu0 }
 0x95b   : > { %v2809_v56 = vpop.xlane.xlu0 %2808 }
 0x95c   : > { %v2879_v18 = vadd.f32 %v2863_v36, %v2809_v56 }
 0x95d   : > { %2835 = vadd.xlane.f32.xlu1 %v2834_v3 }
 0x95e   : > { %2896 = vst.msk [vmem:[#allocation4 + $0x20] sm:$0xff] %vm2891_vm10, %v2879_v18  ;;  %v2848_v18 = vld [vmem:[#allocation4 + $0x28] sm:$0xff] }
 0x95f   : > { %v2864_v38 = vmul.f32 %v7035_v57, %v2848_v18 }
 0x963   : > { %v3348_v63 = vpop.xlane.xlu0 %3347 }
 0x964   : > { %v7251_v14 = vmax.f32 %v7248_v34, %v3348_v63 }
 0x965   : > { %2841 = vadd.xlane.f32.xlu1 %v2840_v28  ;;  %v5493_v28 = vld [vmem:[%s5843_s7] sm:$0xff] }
 0x966   : > { %4039 = vst.msk [vmem:[#allocation3 + $0x8] sm:$0xff] %vm3727_vm11, %v7251_v14 }
 0x96b   : > { %v2818_v11 = vpop.xlane.xlu0 %2817 }
 0x96c   : > { %v2882_v6 = vadd.f32 %v2866_v16, %v2818_v11 }
 0x96d   : > { %v3025_v13 = vpop.permute.xlu1 %3024  ;;  %3359 = vmax.xlane.f32.xlu1 %v3358_v41 }
 0x96e   : > { %2899 = vst.msk [vmem:[#allocation4 + $0x38] sm:$0xff] %vm2891_vm10, %v2882_v6  ;;  %3061 = vmatpush.bf16.msrb.mxu3 %v3025_v13  ;;  %v2846_v13 = vld [vmem:[#allocation4 + $0x18] sm:$0xff] }
 0x96f   : > { %v7464_v6 = vld [vmem:[#allocation3 + $0x58] sm:$0xff] }
 0x970   : > { %8201 = vst [vmem:[#allocation24_spill] sm:$0xff] %v7464_v6 }
 0x972   : > { %3062 = vmatpush.bf16.msrb.mxu3 %v3023_v19  ;;  %v2862_v19 = vmul.f32 %v7032_v25, %v2846_v13  ;;  %v7335_v13 = vld [vmem:[#allocation3 + $0x20] sm:$0xff] }
 0x973   : > { %v2827_v2 = vpop.xlane.xlu0 %2826 }
 0x974   : > { %v2885_v36 = vadd.f32 %v2869_v5, %v2827_v2  ;;  %v2854_v5 = vld [vmem:[#allocation4 + $0x58] sm:$0xff] }
 0x975   : > { %v2870_v2 = vmul.f32 %v7078_v55, %v2854_v5 }
 0x976   : > { %2902 = vst.msk [vmem:[#allocation4 + $0x50] sm:$0xff] %vm2891_vm10, %v2885_v36  ;;  %3063 = vmatpush.bf16.msrb.mxu3 %v7129_v33  ;;  %v2857_v33 = vld [vmem:[#allocation4 + $0x70] sm:$0xff] }
 0x977   : > { %v2873_v56 = vmul.f32 %v7103_v24, %v2857_v33  ;;  %v2851_v24 = vld [vmem:[#allocation4 + $0x40] sm:$0xff]  ;;  %v2849_v33 = vld [vmem:[#allocation4 + $0x30] sm:$0xff] }
 0x978   : > { %v2867_v57 = vmul.f32 %v6998_v21, %v2851_v24  ;;  %v7322_v24 = vld [vmem:[#allocation3 + $0x18] sm:$0xff] }
 0x979   : > { %5005 = vmatmul.msk.bf16.vlgmr.msrb.gmra.mxu3 %vm899_vm6, %v7091_v60 }
 0x986   : > { %3860 = vrot.lane.b32.xlu1 %v7168_v48, %s5617_s30 }
 0x989   : > { %5006 = vmatmul.msk.bf16.gmra.mxu3 %vm899_vm6, %v7131_v23  ;;  %v7279_v23 = vpop.f32.mrf.mxu0 }
 0x98e   : > { %3858 = vrot.lane.b32.xlu1 %v7162_v58, %s5617_s30  ;;  %v7283_v58 = vld [vmem:[#allocation3] sm:$0xff] }
 0x990   : > { %v2839_v60 = vpop.xlane.xlu0 %2838 }
 0x991   : > { %v2889_v3 = vadd.f32 %v2873_v56, %v2839_v60  ;;  %v7298_v0 = vpop.f32.mrf.mxu0  ;;  %v2865_v56 = vmul.f32 %v6958_v4, %v2849_v33  ;;  %v2852_v4 = vld [vmem:[#allocation4 + $0x48] sm:$0xff] }
 0x992   : > { %v2812_v63 = vpop.xlane.xlu2 %2811  ;;  %v2856_v33 = vld [vmem:[#allocation4 + $0x68] sm:$0xff] }
 0x993   : > { %2906 = vst.msk [vmem:[#allocation4 + $0x70] sm:$0xff] %vm2891_vm10, %v2889_v3  ;;  %v2880_v48 = vadd.f32 %v2864_v38, %v2812_v63  ;;  %v7308_v3 = vld [vmem:[#allocation3 + $0x10] sm:$0xff] }
 0x995   : > { %2897 = vst.msk [vmem:[#allocation4 + $0x28] sm:$0xff] %vm2891_vm10, %v2880_v48  ;;  %v2868_v48 = vmul.f32 %v7074_v20, %v2852_v4 }
 0x996   : > { %3856 = vrot.lane.b32.xlu1 %v5493_v28, %s5617_s30 }
 0x998   : > { %v3345_v53 = vpop.xlane.xlu1 %3344 }
 0x999   : > { %v7286_v16 = vmax.f32 %v7283_v58, %v3345_v53  ;;  %5007 = vmatmul.msk.bf16.gmra.mxu3 %vm899_vm6, %v7146_v39  ;;  %v7306_v25 = vpop.f32.mrf.mxu0 }
 0x99a   : > { %v2821_v11 = vpop.xlane.xlu2 %2820  ;;  %v3370_v20 = vsel %vm899_vm6, %v7306_v25, -inf }
 0x99b   : > { %4038 = vst.msk [vmem:[#allocation3] sm:$0xff] %vm3727_vm11, %v7286_v16  ;;  %v2883_v41 = vadd.f32 %v2867_v57, %v2821_v11  ;;  %3457 = vperm.xlu0 %5219, %v7286_v16  }
 0x99d   : > { %2900 = vst.msk [vmem:[#allocation4 + $0x40] sm:$0xff] %vm2891_vm10, %v2883_v41 }
 0x9a0   : > { %v2806_v39 = vpop.xlane.xlu1 %2805 }
 0x9a1   : > { %v2878_v21 = vadd.f32 %v2862_v19, %v2806_v39  ;;  %v7319_v53 = vpop.f32.mrf.mxu0 }
 0x9a2   : > { %v2830_v36 = vpop.xlane.xlu2 %2829 }
 0x9a3   : > { %2895 = vst.msk [vmem:[#allocation4 + $0x18] sm:$0xff] %vm2891_vm10, %v2878_v21  ;;  %v2886_v17 = vadd.f32 %v2870_v2, %v2830_v36 }
 0x9a5   : > { %2903 = vst.msk [vmem:[#allocation4 + $0x58] sm:$0xff] %vm2891_vm10, %v2886_v17 }
 0x9a8   : > { %v2815_v60 = vpop.xlane.xlu1 %2814 }
 0x9a9   : > { %v2881_v18 = vadd.f32 %v2865_v56, %v2815_v60  ;;  %5008 = vmatmul.msk.bf16.gmra.mxu3 %vm899_vm6, %v7156_v40  ;;  %v7331_v41 = vpop.f32.mrf.mxu0  ;;  %v2872_v56 = vmul.f32 %v7070_v59, %v2856_v33  ;;  %v3367_v33 = vsel %vm899_vm6, %v7298_v0, -inf }
 0x9aa   : > { %v3351_v38 = vpop.xlane.xlu2 %3350 }
 0x9ab   : > { %2898 = vst.msk [vmem:[#allocation4 + $0x30] sm:$0xff] %vm2891_vm10, %v2881_v18  ;;  %v7312_v55 = vmax.f32 %v7308_v3, %v3351_v38  ;;  %v2858_v38 = vld [vmem:[#allocation4 + $0x78] sm:$0xff] }
 0x9ad   : > { %4040 = vst.msk [vmem:[#allocation3 + $0x10] sm:$0xff] %vm3727_vm11, %v7312_v55 }
 0x9b0   : > { %v2824_v40 = vpop.xlane.xlu1 %2823 }
 0x9b1   : > { %v2884_v28 = vadd.f32 %v2868_v48, %v2824_v40  ;;  %v7342_v5 = vpop.f32.mrf.mxu0 }
 0x9b2   : > { %v3379_v2 = vsel %vm899_vm6, %v7342_v5, -inf }
 0x9b3   : > { %2901 = vst.msk [vmem:[#allocation4 + $0x48] sm:$0xff] %vm2891_vm10, %v2884_v28 }
 0x9b8   : > { %v3354_v57 = vpop.xlane.xlu1 %3353 }
 0x9b9   : > { %v7325_v11 = vmax.f32 %v7322_v24, %v3354_v57  ;;  %5009 = vmatmul.msk.bf16.gmra.mxu3 %vm899_vm6, %v7196_v1  ;;  %v2855_v1 = vld [vmem:[#allocation4 + $0x60] sm:$0xff] }
 0x9ba   : > { %v2871_v21 = vmul.f32 %v7086_v35, %v2855_v1  ;;  %v2874_v35 = vmul.f32 %v7106_v27, %v2858_v38  ;;  %v3364_v1 = vsel %vm899_vm6, %v7279_v23, -inf  ;;  %v3376_v38 = vsel %vm899_vm6, %v7331_v41, -inf }
 0x9bb   : > { %4041 = vst.msk [vmem:[#allocation3 + $0x18] sm:$0xff] %vm3727_vm11, %v7325_v11 }
 0x9c0   : > { %v3357_v19 = vpop.xlane.xlu1 %3356  ;;  %3371 = vmax.xlane.f32.xlu1 %v3370_v20 }
 0x9c1   : > { %v7338_v39 = vmax.f32 %v7335_v13, %v3357_v19 }
 0x9c3   : > { %4042 = vst.msk [vmem:[#allocation3 + $0x20] sm:$0xff] %vm3727_vm11, %v7338_v39 }
 0x9c8   : > { %v2833_v36 = vpop.xlane.xlu1 %2832  ;;  %3380 = vmax.xlane.f32.xlu1 %v3379_v2 }
 0x9c9   : > { %v2887_v17 = vadd.f32 %v2871_v21, %v2833_v36  ;;  %5010 = vmatmul.msk.bf16.gmra.mxu3 %vm899_vm6, %v7172_v45  ;;  %v7356_v45 = vld [vmem:[#allocation3 + $0x28] sm:$0xff]  ;;  %v3863_v21 = vpop.permute.xlu2 %3862 }
 0x9ca   : > { %3896 = vmatpush.bf16.msrb.mxu2 %v3863_v21 }
 0x9cb   : > { %2904 = vst.msk [vmem:[#allocation4 + $0x60] sm:$0xff] %vm2891_vm10, %v2887_v17  ;;  %v3361_v17 = vsel %vm899_vm6, %v7271_v51, -inf }
 0x9d0   : > { %v2836_v60 = vpop.xlane.xlu1 %2835 }
 0x9d1   : > { %v2888_v18 = vadd.f32 %v2872_v56, %v2836_v60  ;;  %v7383_v56 = vld [vmem:[#allocation3 + $0x60] sm:$0xff] }
 0x9d3   : > { %2905 = vst.msk [vmem:[#allocation4 + $0x68] sm:$0xff] %vm2891_vm10, %v2888_v18 }
 0x9d8   : > { %v2842_v4 = vpop.xlane.xlu1 %2841 }
 0x9d9   : > { %v2890_v48 = vadd.f32 %v2874_v35, %v2842_v4  ;;  %5011 = vmatmul.msk.bf16.gmra.mxu3 %vm899_vm6, %v7231_v9  ;;  %v7392_v35 = vpop.f32.mrf.mxu0 }
 0x9da   : > { %v3382_v4 = vsel %vm899_vm6, %v7392_v35, -inf }
 0x9db   : > { %2907 = vst.msk [vmem:[#allocation4 + $0x78] sm:$0xff] %vm2891_vm10, %v2890_v48 }
 0x9e0   : > { %v3360_v40 = vpop.xlane.xlu1 %3359 }
 0x9e1   : > { %v7359_v28 = vmax.f32 %v7356_v45, %v3360_v40  ;;  %3462 = vperm.xlu1 %5221, %v7251_v14   ;;  %v7396_v48 = vpop.f32.mrf.mxu0 }
 0x9e2   : > { %8197 = vst [vmem:[#allocation17_spill] sm:$0xff] %v7396_v48  ;;  %v3385_v40 = vsel %vm899_vm6, %v7396_v48, -inf }
 0x9e3   : > { %4043 = vst.msk [vmem:[#allocation3 + $0x28] sm:$0xff] %vm3727_vm11, %v7359_v28 }
 0x9e9   : > { %5012 = vmatmul.msk.bf16.gmra.mxu3 %vm899_vm6, %v7188_v62  ;;  %3467 = vperm.xlu1 %5221, %v7312_v55   ;;  %v7372_v62 = vld [vmem:[#allocation3 + $0x48] sm:$0xff] }
 0x9f8   : > { %v3861_v57 = vpop.permute.xlu1 %3860 }
 0x9f9   : > { %3897 = vmatpush.bf16.msrb.mxu2 %v3861_v57 }
 0x9fc   : > { %v3065_v59 = vpop.f32.mrf.mxu3 }
 0x9fd   : > { %3121 = vrot.lane.b32.xlu2 %v3065_v59, %s5619_s13 }
 0xa00   : > { %v3859_v20 = vpop.permute.xlu1 %3858 }
 0xa01   : > { %3898 = vmatpush.bf16.msrb.mxu2 %v3859_v20  ;;  %v2908_v20 = vld [vmem:[#allocation5] sm:$0xff] }
 0xa04   : > { %v3067_v27 = vpop.f32.mrf.mxu3 }
 0xa05   : > { %3123 = vrot.lane.b32.xlu0 %v3067_v27, %s5619_s13 }
 0xa08   : > { %v3857_v19 = vpop.permute.xlu1 %3856 }
 0xa09   : > { %3899 = vmatpush.bf16.msrb.mxu2 %v3857_v19  ;;  %v3004_v19 = vmul.f32 %v7084_v22, %v2908_v20  ;;  %v2910_v22 = vld [vmem:[#allocation5 + $0x10] sm:$0xff]  ;;  %v2909_v20 = vld [vmem:[#allocation5 + $0x8] sm:$0xff] }
 0xa0c   : > { %v3070_v9 = vpop.f32.mrf.mxu3 }
 0xa0d   : > { %3125 = vrot.lane.b32.xlu2 %v3070_v9, %s5619_s13  ;;  %v3458_v59 = vpop.permute.xlu0 %3457 }
 0xa0e   : > { %v3535_v9 = vsub.f32 %v7142_v46, %v3458_v59  ;;  %v3006_v59 = vmul.f32 %v7093_v12, %v2910_v22 }
 0xa14   : > { %v7406_v46 = vpop.f32.mrf.mxu3 }
 0xa2f   : > { %3365 = vmax.xlane.f32.xlu0 %v3364_v1 }
 0xa33   : > { %v3372_v2 = vpop.xlane.xlu1 %3371 }
 0xa34   : > { %v7375_v36 = vmax.f32 %v7372_v62, %v3372_v2 }
 0xa36   : > { %4047 = vst.msk [vmem:[#allocation3 + $0x48] sm:$0xff] %vm3727_vm11, %v7375_v36  ;;  %3362 = vmax.xlane.f32.xlu2 %v3361_v17 }
 0xa37   : > { %3368 = vmax.xlane.f32.xlu0 %v3367_v33 }
 0xa3b   : > { %v3381_v60 = vpop.xlane.xlu1 %3380 }
 0xa3c   : > { %v7386_v18 = vmax.f32 %v7383_v56, %v3381_v60 }
 0xa3e   : > { %4050 = vst.msk [vmem:[#allocation3 + $0x60] sm:$0xff] %vm3727_vm11, %v7386_v18 }
 0xa3f   : > { %3377 = vmax.xlane.f32.xlu0 %v3376_v38 }
 0xa47   : > { %3383 = vmax.xlane.f32.xlu0 %v3382_v4 }
 0xa4e   : > { %3472 = vperm.xlu2 %5220, %v7325_v11  }
 0xa4f   : > { %3386 = vmax.xlane.f32.xlu0 %v3385_v40 }
 0xa53   : > { %v3463_v27 = vpop.permute.xlu1 %3462 }
 0xa54   : > { %v3536_v57 = vsub.f32 %v7152_v7, %v3463_v27 }
 0xa56   : > { %v3551_v1 = vpack.c.bf16 %v3536_v57, %v3535_v9  ;;  %v7414_v57 = vpop.f32.mrf.mxu3 }
 0xa57   : > { %v3122_v21 = vpop.permute.xlu2 %3121 }
 0xa58   : > { %v3559_v2 = vunpack.c.l.bf16 %v3551_v1  ;;  %v3560_v17 = vunpack.c.h.bf16 %v3551_v1  ;;  %v3169_v33 = vadd.f32 %v3122_v21, %v3004_v19  ;;  %v3005_v19 = vmul.f32 %v7088_v15, %v2909_v20 }
 0xa59   : > { %v3373_v1 = vsel %vm899_vm6, %v7319_v53, -inf }
 0xa5a   : > { %v3575_v60 = vmul.f32 1.442695, %v3559_v2  ;;  %v3577_v38 = vmul.f32 1.442695, %v3560_v17  ;;  %3186 = vst.msk [vmem:[#allocation5] sm:$0xff] %vm3185_vm12, %v3169_v33  ;;  %v7422_v17 = vpop.f32.mrf.mxu0 }
 0xa5b   : > { %8198 = vst [vmem:[#allocation18_spill] sm:$0xff] %v7422_v17  ;;  %v3388_v33 = vsel %vm899_vm6, %v7422_v17, -inf }
 0xa5c   : > { %5414 = vpow2.f32 %v3575_v60 }
 0xa5d   : > { %5416 = vpow2.f32 %v3577_v38 }
 0xa5e   : > { %v7419_v2 = vpop.f32.mrf.mxu3 }
 0xa62   : > { %v5415_v4 = vpop.eup %5414 }
 0xa63   : > { %v5417_v40 = vpop.eup %5416  ;;  %3477 = vperm.xlu0 %5219, %v7338_v39  }
 0xa64   : > { %v7408_v7 = vpack.c.bf16 %v5417_v40, %v5415_v4  ;;  %v7429_v40 = vld [vmem:[#allocation3 + $0x38] sm:$0xff] }
 0xa66   : > { %5021 = vmatmul.msk.bf16.vlgmr.msrb.gmra.mxu2 %vm899_vm6, %v7408_v7  ;;  %v3080_v60 = vpop.f32.mrf.mxu3 }
 0xa67   : > { %v3126_v27 = vpop.permute.xlu2 %3125 }
 0xa68   : > { %v3171_v9 = vadd.f32 %v3126_v27, %v3006_v59 }
 0xa6a   : > { %3188 = vst.msk [vmem:[#allocation5 + $0x10] sm:$0xff] %vm3185_vm12, %v3171_v9  ;;  %v7439_v9 = vld [vmem:[#allocation3 + $0x30] sm:$0xff] }
 0xa6e   : > { %v7426_v38 = vpop.f32.mrf.mxu3 }
 0xa76   : > { %v3085_v15 = vpop.f32.mrf.mxu3 }
 0xa77   : > { %3374 = vmax.xlane.f32.xlu2 %v3373_v1  ;;  %v3124_v21 = vpop.permute.xlu0 %3123 }
 0xa78   : > { %v3170_v12 = vadd.f32 %v3124_v21, %v3005_v19  ;;  %v7446_v21 = vld [vmem:[#allocation3 + $0x40] sm:$0xff] }
 0xa79   : > { %8199 = vst [vmem:[#allocation30_spill] sm:$0xff] %v7446_v21 }
 0xa7a   : > { %3187 = vst.msk [vmem:[#allocation5 + $0x8] sm:$0xff] %vm3185_vm12, %v3170_v12 }
 0xa7e   : > { %v3087_v4 = vpop.f32.mrf.mxu3 }
 0xa7f   : > { %3389 = vmax.xlane.f32.xlu2 %v3388_v33 }
 0xa86   : > { %v7441_v19 = vpop.f32.mrf.mxu3 }
 0xa8e   : > { %v3092_v63 = vpop.f32.mrf.mxu3 }
 0xa97   : > { %3482 = vperm.xlu2 %5220, %v7359_v28  }
 0xaa2   : > { %v3366_v22 = vpop.xlane.xlu0 %3365 }
 0xaa3   : > { %v7432_v59 = vmax.f32 %v7429_v40, %v3366_v22 }
 0xaa5   : > { %4045 = vst.msk [vmem:[#allocation3 + $0x38] sm:$0xff] %vm3727_vm11, %v7432_v59  ;;  %3492 = vperm.xlu2 %5220, %v7432_v59  }
 0xaa9   : > { %v3363_v20 = vpop.xlane.xlu2 %3362 }
 0xaaa   : > { %v7444_v1 = vmax.f32 %v7439_v9, %v3363_v20  ;;  %v3369_v12 = vpop.xlane.xlu0 %3368  ;;  %v3468_v20 = vpop.permute.xlu1 %3467 }
 0xaab   : > { %v7449_v33 = vmax.f32 %v7446_v21, %v3369_v12  ;;  %v3537_v27 = vsub.f32 %v7213_v26, %v3468_v20 }
 0xaac   : > { %4044 = vst.msk [vmem:[#allocation3 + $0x30] sm:$0xff] %vm3727_vm11, %v7444_v1  ;;  %3487 = vperm.xlu1 %5221, %v7444_v1  }
 0xaad   : > { %8200 = vst [vmem:[#allocation25_spill] sm:$0xff] %v7449_v33  ;;  %3502 = vperm.xlu2 %5220, %v7375_v36   ;;  %3497 = vperm.xlu0 %5219, %v7449_v33  }
 0xaae   : > { %4046 = vst.msk [vmem:[#allocation3 + $0x40] sm:$0xff] %vm3727_vm11, %v7449_v33 }
 0xab1   : > { %v3473_v12 = vpop.permute.xlu2 %3472 }
 0xab2   : > { %v3538_v22 = vsub.f32 %v7219_v30, %v3473_v12  ;;  %v3378_v61 = vpop.xlane.xlu0 %3377  ;;  %v7474_v12 = vld [vmem:[#allocation3 + $0x68] sm:$0xff] }
 0xab3   : > { %v7467_v42 = vmax.f32 %v7464_v6, %v3378_v61 }
 0xab4   : > { %v3552_v54 = vpack.c.bf16 %v3538_v22, %v3537_v27 }
 0xab5   : > { %8202 = vst [vmem:[#allocation21_spill] sm:$0xff] %v7467_v42  ;;  %3517 = vperm.xlu0 %5219, %v7386_v18  }
 0xab6   : > { %4049 = vst.msk [vmem:[#allocation3 + $0x58] sm:$0xff] %vm3727_vm11, %v7467_v42  ;;  %v3561_v17 = vunpack.c.l.bf16 %v3552_v54  ;;  %v3562_v26 = vunpack.c.h.bf16 %v3552_v54  ;;  %v3095_v54 = vpop.f32.mrf.mxu3 }
 0xab8   : > { %v3579_v20 = vmul.f32 1.442695, %v3561_v17  ;;  %v3581_v30 = vmul.f32 1.442695, %v3562_v26  ;;  %v7486_v26 = vld [vmem:[#allocation3 + $0x70] sm:$0xff] }
 0xab9   : > { %8203 = vst [vmem:[#allocation22_spill] sm:$0xff] %v7486_v26 }
 0xaba   : > { %5418 = vpow2.f32 %v3579_v20  ;;  %v3384_v48 = vpop.xlane.xlu0 %3383 }
 0xabb   : > { %5420 = vpow2.f32 %v3581_v30  ;;  %v7477_v61 = vmax.f32 %v7474_v12, %v3384_v48 }
 0xabd   : > { %4051 = vst.msk [vmem:[#allocation3 + $0x68] sm:$0xff] %vm3727_vm11, %v7477_v61  ;;  %3127 = vrot.lane.b32.xlu0 %v7406_v46, %s5619_s13  ;;  %3522 = vperm.xlu2 %5220, %v7477_v61  }
 0xabe   : > { %v7502_v46 = vpop.f32.mrf.mxu3 }
 0xac0   : > { %v5419_v17 = vpop.eup %5418 }
 0xac1   : > { %v5421_v22 = vpop.eup %5420 }
 0xac2   : > { %v3387_v20 = vpop.xlane.xlu0 %3386  ;;  %v7488_v30 = vpack.c.bf16 %v5421_v22, %v5419_v17 }
 0xac3   : > { %v7491_v48 = vmax.f32 %v7486_v26, %v3387_v20 }
 0xac4   : > { %5022 = vmatmul.msk.bf16.gmra.mxu2 %vm899_vm6, %v7488_v30  ;;  %v3617_v21 = vunpack.c.l.bf16 %v7488_v30 }
 0xac5   : > { %4052 = vst.msk [vmem:[#allocation3 + $0x70] sm:$0xff] %vm3727_vm11, %v7491_v48  ;;  %3133 = vrot.lane.b32.xlu0 %v3080_v60, %s5619_s13  ;;  %3131 = vrot.lane.b32.xlu2 %v7419_v2, %s5619_s13  ;;  %v7510_v60 = vld [vmem:[#allocation3 + $0x50] sm:$0xff] }
 0xac6   : > { %v3100_v17 = vpop.f32.mrf.mxu3 }
 0xacd   : > { %3139 = vrot.lane.b32.xlu0 %v3087_v4, %s5619_s13  ;;  %3137 = vrot.lane.b32.xlu2 %v3085_v15, %s5619_s13  ;;  %v7518_v15 = vld [vmem:[#allocation3 + $0x78] sm:$0xff] }
 0xace   : > { %v3102_v22 = vpop.f32.mrf.mxu3 }
 0xad5   : > { %3145 = vrot.lane.b32.xlu0 %v3095_v54, %s5619_s13  ;;  %3143 = vrot.lane.b32.xlu2 %v3092_v63, %s5619_s13  ;;  %v3616_v54 = vunpack.c.h.bf16 %v7408_v7 }
 0xadd   : > { %3151 = vrot.lane.b32.xlu0 %v3102_v22, %s5619_s13  ;;  %3149 = vrot.lane.b32.xlu2 %v3100_v17, %s5619_s13  ;;  %v3478_v17 = vpop.permute.xlu0 %3477 }
 0xaea   : > { %v3375_v20 = vpop.xlane.xlu2 %3374 }
 0xaeb   : > { %v7513_v2 = vmax.f32 %v7510_v60, %v3375_v20  ;;  %v3539_v20 = vsub.f32 %v7227_v50, %v3478_v17  ;;  %v3634_v50 = vsel %vm899_vm6, %v3616_v54, 0.0  ;;  %v8204_v54 = vsub.f32 %v7283_v58, %v7286_v16  ;;  %v2913_v16 = vld [vmem:[#allocation5 + $0x28] sm:$0xff] }
 0xaed   : > { %4048 = vst.msk [vmem:[#allocation3 + $0x50] sm:$0xff] %vm3727_vm11, %v7513_v2  ;;  %3507 = vperm.xlu1 %5221, %v7513_v2  }
 0xaf2   : > { %v3390_v4 = vpop.xlane.xlu2 %3389 }
 0xaf3   : > { %v7521_v63 = vmax.f32 %v7518_v15, %v3390_v4 }
 0xaf5   : > { %4053 = vst.msk [vmem:[#allocation3 + $0x78] sm:$0xff] %vm3727_vm11, %v7521_v63  ;;  %3512 = vperm.xlu1 %5221, %v7467_v42  }
 0xafa   : > { %v3483_v22 = vpop.permute.xlu2 %3482 }
 0xafb   : > { %v3540_v52 = vsub.f32 %v7256_v43, %v3483_v22  ;;  %v3410_v22 = vsub.f32 %v7322_v24, %v7325_v11  ;;  %v3009_v24 = vmul.f32 %v7116_v44, %v2913_v16  ;;  %v8206_v44 = vsub.f32 %v7429_v40, %v7432_v59 }
 0xafd   : > { %v3553_v27 = vpack.c.bf16 %v3540_v52, %v3539_v20  ;;  %3527 = vperm.xlu1 %5221, %v7491_v48   ;;  %v3637_v52 = vsel %vm899_vm6, %v3617_v21, 0.0  ;;  %v3423_v21 = vmul.f32 1.442695, %v8204_v54  ;;  %v3429_v20 = vmul.f32 1.442695, %v3410_v22 }
 0xaff   : > { %v3563_v26 = vunpack.c.l.bf16 %v3553_v27  ;;  %v3564_v4 = vunpack.c.h.bf16 %v3553_v27 }
 0xb01   : > { %v3583_v6 = vmul.f32 1.442695, %v3563_v26  ;;  %v3585_v33 = vmul.f32 1.442695, %v3564_v4  ;;  %v3408_v26 = vsub.f32 %v7248_v34, %v7251_v14  ;;  %v3411_v34 = vsub.f32 %v7335_v13, %v7338_v39 }
 0xb02   : > { %v3493_v42 = vpop.permute.xlu2 %3492 }
 0xb03   : > { %5422 = vpow2.f32 %v3583_v6  ;;  %v3431_v4 = vmul.f32 1.442695, %v3411_v34  ;;  %v3542_v13 = vsub.f32 %v7279_v23, %v3493_v42  ;;  %v3416_v42 = vsub.f32 %v7372_v62, %v7375_v36 }
 0xb04   : > { %5424 = vpow2.f32 %v3585_v33  ;;  %v3425_v33 = vmul.f32 1.442695, %v3408_v26  ;;  %v3417_v36 = vsub.f32 %v7510_v60, %v7513_v2  ;;  %v2911_v2 = vld [vmem:[#allocation5 + $0x18] sm:$0xff] }
 0xb05   : > { %3532 = vperm.xlu1 %5221, %v7521_v63   ;;  %v3441_v62 = vmul.f32 1.442695, %v3416_v42 }
 0xb06   : > { %3635 = vadd.xlane.f32.xlu2 %v3634_v50  ;;  %5426 = vpow2.f32 %v3425_v33 }
 0xb07   : > { %3638 = vadd.xlane.f32.xlu0 %v3637_v52  ;;  %5428 = vpow2.f32 %v3423_v21  ;;  %v8205_v52 = vsub.f32 %v7439_v9, %v7444_v1  ;;  %v2916_v1 = vld [vmem:[#allocation5 + $0x40] sm:$0xff] }
 0xb08   : > { %5430 = vpow2.f32 %v3429_v20  ;;  %v3012_v40 = vmul.f32 %v7139_v49, %v2916_v1 }
 0xb09   : > { %v5423_v43 = vpop.eup %5422  ;;  %5432 = vpow2.f32 %v3431_v4 }
 0xb0a   : > { %v5425_v17 = vpop.eup %5424  ;;  %v3503_v6 = vpop.permute.xlu2 %3502 }
 0xb0b   : > { %v7536_v27 = vpack.c.bf16 %v5425_v17, %v5423_v43  ;;  %v3435_v43 = vmul.f32 1.442695, %v8205_v52  ;;  %v3544_v59 = vsub.f32 %v7306_v25, %v3503_v6  ;;  %v2919_v6 = vld [vmem:[#allocation5 + $0x58] sm:$0xff] }
 0xb0d   : > { %5023 = vmatmul.msk.bf16.gmra.mxu2 %vm899_vm6, %v7536_v27  ;;  %3129 = vrot.lane.b32.xlu1 %v7414_v57, %s5619_s13  ;;  %v7553_v57 = vpop.eup %5426  ;;  %5434 = vpow2.f32 %v3435_v43 }
 0xb0e   : > { %v7556_v58 = vpop.eup %5428 }
 0xb0f   : > { %v7567_v33 = vpop.eup %5430 }
 0xb10   : > { %v7576_v9 = vpop.eup %5432 }
 0xb13   : > { %v7588_v49 = vpop.eup %5434 }
 0xb15   : > { %3135 = vrot.lane.b32.xlu1 %v7426_v38, %s5619_s13 }
 0xb17   : > { %v3523_v14 = vpop.permute.xlu2 %3522 }
 0xb18   : > { %v3548_v4 = vsub.f32 %v7392_v35, %v3523_v14  ;;  %v3419_v35 = vsub.f32 %v7383_v56, %v7386_v18 }
 0xb1b   : > { %3767 = vperm.xlu0 %5219, %v7553_v57  }
 0xb1d   : > { %3141 = vrot.lane.b32.xlu1 %v7441_v19, %s5619_s13  ;;  %v3437_v19 = vmul.f32 1.442695, %v8206_v44 }
 0xb1e   : > { %v3488_v11 = vpop.permute.xlu1 %3487  ;;  %3762 = vperm.xlu2 %5220, %v7556_v58  }
 0xb1f   : > { %v3541_v39 = vsub.f32 %v7271_v51, %v3488_v11  ;;  %v3132_v38 = vpop.permute.xlu2 %3131  ;;  %v3498_v50 = vpop.permute.xlu0 %3497  ;;  %5436 = vpow2.f32 %v3437_v19  ;;  %v3443_v11 = vmul.f32 1.442695, %v3417_v36 }
 0xb20   : > { %v3174_v17 = vadd.f32 %v3132_v38, %v3009_v24  ;;  %v3543_v22 = vsub.f32 %v7298_v0, %v3498_v50 }
 0xb21   : > { %v3554_v26 = vpack.c.bf16 %v3542_v13, %v3541_v39  ;;  %v3007_v13 = vmul.f32 %v7123_v10, %v2911_v2  ;;  %v3015_v39 = vmul.f32 %v7177_v8, %v2919_v6  ;;  %v8207_v8 = vsub.f32 %v7474_v12, %v7477_v61 }
 0xb22   : > { %3191 = vst.msk [vmem:[#allocation5 + $0x28] sm:$0xff] %vm3185_vm12, %v3174_v17  ;;  %v3555_v16 = vpack.c.bf16 %v3544_v59, %v3543_v22  ;;  %v3447_v17 = vmul.f32 1.442695, %v3419_v35  ;;  %v3615_v35 = vunpack.c.l.bf16 %v7408_v7 }
 0xb23   : > { %v3565_v51 = vunpack.c.l.bf16 %v3554_v26  ;;  %v3566_v23 = vunpack.c.h.bf16 %v3554_v26  ;;  %3777 = vperm.xlu0 %5219, %v7567_v33   ;;  %v3449_v19 = vmul.f32 1.442695, %v8207_v8 }
 0xb24   : > { %v3568_v38 = vunpack.c.h.bf16 %v3555_v16  ;;  %v3631_v6 = vsel %vm899_vm6, %v3615_v35, 0.0 }
 0xb25   : > { %v3587_v54 = vmul.f32 1.442695, %v3565_v51  ;;  %v3589_v21 = vmul.f32 1.442695, %v3566_v23  ;;  %3147 = vrot.lane.b32.xlu1 %v7502_v46, %s5619_s13  ;;  %v7594_v25 = vpop.eup %5436  ;;  %v2914_v51 = vld [vmem:[#allocation5 + $0x30] sm:$0xff] }
 0xb26   : > { %3782 = vperm.xlu2 %5220, %v7576_v9   ;;  %v3593_v10 = vmul.f32 1.442695, %v3568_v38  ;;  %v2922_v23 = vld [vmem:[#allocation5 + $0x70] sm:$0xff]  ;;  %v3010_v1 = vmul.f32 %v7114_v32, %v2914_v51  ;;  %v3619_v38 = vunpack.c.l.bf16 %v7536_v27 }
 0xb27   : > { %5438 = vpow2.f32 %v3587_v54  ;;  %v3138_v34 = vpop.permute.xlu2 %3137  ;;  %v3518_v20 = vpop.permute.xlu0 %3517  ;;  %v3018_v54 = vmul.f32 %v7225_v31, %v2922_v23 }
 0xb28   : > { %5440 = vpow2.f32 %v3589_v21  ;;  %v3177_v0 = vadd.f32 %v3138_v34, %v3012_v40  ;;  %v3547_v46 = vsub.f32 %v7342_v5, %v3518_v20  ;;  %v3567_v5 = vunpack.c.l.bf16 %v3555_v16  ;;  %v2917_v34 = vld [vmem:[#allocation5 + $0x48] sm:$0xff] }
 0xb29   : > { %5442 = vpow2.f32 %v3441_v62  ;;  %v8208_v21 = vsub.f32 %v7518_v15, %v7521_v63  ;;  %v3013_v20 = vmul.f32 %v7201_v29, %v2917_v34 }
 0xb2a   : > { %3194 = vst.msk [vmem:[#allocation5 + $0x40] sm:$0xff] %vm3185_vm12, %v3177_v0  ;;  %v7591_v24 = vpack.c.bf16 %v3548_v4, %v3547_v46  ;;  %5444 = vpow2.f32 %v3443_v11  ;;  %v3591_v18 = vmul.f32 1.442695, %v3567_v5  ;;  %v2920_v46 = vld [vmem:[#allocation5 + $0x60] sm:$0xff] }
 0xb2b   : > { %3792 = vperm.xlu0 %5219, %v7588_v49   ;;  %5446 = vpow2.f32 %v3447_v17  ;;  %v3453_v22 = vmul.f32 1.442695, %v8208_v21  ;;  %v3016_v16 = vmul.f32 %v7223_v47, %v2920_v46  ;;  %v3643_v17 = vsel %vm899_vm6, %v3619_v38, 0.0  ;;  %v3680_v46 = vld [vmem:[#allocation4 + $0x8] sm:$0xff] }
 0xb2c   : > { %5448 = vpow2.f32 %v3591_v18  ;;  %v3571_v7 = vunpack.c.l.bf16 %v7591_v24 }
 0xb2d   : > { %v5439_v60 = vpop.eup %5438  ;;  %5450 = vpow2.f32 %v3593_v10 }
 0xb2e   : > { %v5441_v14 = vpop.eup %5440  ;;  %3797 = vperm.xlu2 %5220, %v7594_v25   ;;  %5452 = vpow2.f32 %v3449_v19 }
 0xb2f   : > { %v3144_v50 = vpop.permute.xlu2 %3143  ;;  %v3128_v52 = vpop.permute.xlu0 %3127  ;;  %v7601_v43 = vpack.c.bf16 %v5441_v14, %v5439_v60  ;;  %5454 = vpow2.f32 %v3453_v22  ;;  %v2923_v60 = vld [vmem:[#allocation5 + $0x78] sm:$0xff]  ;;  %v8210_v22 = vld [vmem:[#allocation30_spill] sm:$0xff] }
 0xb30   : > { %v3180_v26 = vadd.f32 %v3144_v50, %v3015_v39  ;;  %v3172_v56 = vadd.f32 %v3128_v52, %v3007_v13  ;;  %v7605_v44 = vpop.eup %5442  ;;  %v3019_v2 = vmul.f32 %v7233_v37, %v2923_v60  ;;  %v3618_v13 = vunpack.c.h.bf16 %v7488_v30 }
 0xb31   : > { %5024 = vmatmul.msk.bf16.gmra.mxu2 %vm899_vm6, %v7601_v43  ;;  %v7613_v42 = vpop.eup %5444  ;;  %v8209_v37 = vsub.f32 %v7308_v3, %v7312_v55  ;;  %v3572_v52 = vunpack.c.h.bf16 %v7591_v24  ;;  %v3621_v8 = vunpack.c.l.bf16 %v7601_v43  ;;  %v3622_v55 = vunpack.c.h.bf16 %v7601_v43 }
 0xb32   : > { %3197 = vst.msk [vmem:[#allocation5 + $0x58] sm:$0xff] %vm3185_vm12, %v3180_v26  ;;  %v7621_v36 = vpop.eup %5446  ;;  %v3640_v47 = vsel %vm899_vm6, %v3618_v13, 0.0  ;;  %v3412_v26 = vsub.f32 %v7356_v45, %v7359_v28  ;;  %v3696_v60 = vmul.f32 %v7553_v57, %v3680_v46  ;;  %v2918_v46 = vld [vmem:[#allocation5 + $0x50] sm:$0xff] }
 0xb33   : > { %3189 = vst.msk [vmem:[#allocation5 + $0x18] sm:$0xff] %vm3185_vm12, %v3172_v56  ;;  %3807 = vperm.xlu0 %5219, %v7605_v44   ;;  %v5449_v59 = vpop.eup %5448  ;;  %v3427_v50 = vmul.f32 1.442695, %v8209_v37  ;;  %v3599_v56 = vmul.f32 1.442695, %v3571_v7  ;;  %v3649_v45 = vsel %vm899_vm6, %v3621_v8, 0.0 }
 0xb34   : > { %v5451_v32 = vpop.eup %5450  ;;  %v3601_v19 = vmul.f32 1.442695, %v3572_v52  ;;  %v3433_v24 = vmul.f32 1.442695, %v3412_v26  ;;  %v8215_v37 = vld [vmem:[#allocation24_spill] sm:$0xff] }
 0xb35   : > { %v7626_v31 = vpop.eup %5452  ;;  %v7630_v63 = vpack.c.bf16 %v5451_v32, %v5449_v59  ;;  %5456 = vpow2.f32 %v3427_v50  ;;  %v8216_v50 = vld [vmem:[#allocation21_spill] sm:$0xff] }
 0xb36   : > { %3812 = vperm.xlu2 %5220, %v7613_v42   ;;  %v7634_v0 = vpop.eup %5454  ;;  %5458 = vpow2.f32 %v3599_v56  ;;  %v8217_v52 = vsub.f32 %v8215_v37, %v8216_v50 }
 0xb37   : > { %v3150_v12 = vpop.permute.xlu2 %3149  ;;  %v3134_v61 = vpop.permute.xlu0 %3133  ;;  %5460 = vpow2.f32 %v3601_v19 }
 0xb38   : > { %v3183_v40 = vadd.f32 %v3150_v12, %v3018_v54  ;;  %v3175_v62 = vadd.f32 %v3134_v61, %v3010_v1  ;;  %5462 = vpow2.f32 %v3433_v24  ;;  %v3624_v12 = vunpack.c.h.bf16 %v7630_v63  ;;  %v3901_v19 = vpop.f32.mrf.mxu2 }
 0xb3a   : > { %3200 = vst.msk [vmem:[#allocation5 + $0x70] sm:$0xff] %vm3185_vm12, %v3183_v40  ;;  %v8211_v40 = vld [vmem:[#allocation25_spill] sm:$0xff]  ;;  %v3658_v34 = vsel %vm899_vm6, %v3624_v12, 0.0 }
 0xb3b   : > { %3192 = vst.msk [vmem:[#allocation5 + $0x30] sm:$0xff] %vm3185_vm12, %v3175_v62  ;;  %3822 = vperm.xlu0 %5219, %v7621_v36   ;;  %v8212_v62 = vsub.f32 %v8210_v22, %v8211_v40  ;;  %v8221_v22 = vld [vmem:[#allocation23_spill] sm:$0xff] }
 0xb3d   : > { %v3439_v59 = vmul.f32 1.442695, %v8212_v62 }
 0xb3e   : > { %3827 = vperm.xlu2 %5220, %v7626_v31  }
 0xb3f   : > { %v3140_v15 = vpop.permute.xlu0 %3139 }
 0xb40   : > { %v3178_v4 = vadd.f32 %v3140_v15, %v3013_v20 }
 0xb41   : > { %5025 = vmatmul.msk.bf16.gmra.mxu2 %vm899_vm6, %v7630_v63 }
 0xb42   : > { %3195 = vst.msk [vmem:[#allocation5 + $0x48] sm:$0xff] %vm3185_vm12, %v3178_v4 }
 0xb43   : > { %3837 = vperm.xlu0 %5219, %v7634_v0  }
 0xb47   : > { %v3146_v11 = vpop.permute.xlu0 %3145 }
 0xb48   : > { %v3181_v29 = vadd.f32 %v3146_v11, %v3016_v16  ;;  %v8213_v16 = vld [vmem:[#allocation17_spill] sm:$0xff] }
 0xb4a   : > { %3198 = vst.msk [vmem:[#allocation5 + $0x60] sm:$0xff] %vm3185_vm12, %v3181_v29  ;;  %v8214_v29 = vld [vmem:[#allocation18_spill] sm:$0xff] }
 0xb4f   : > { %3632 = vadd.xlane.f32.xlu1 %v3631_v6  ;;  %v3152_v5 = vpop.permute.xlu0 %3151  ;;  %v3681_v6 = vld [vmem:[#allocation4 + $0x10] sm:$0xff] }
 0xb50   : > { %v3184_v14 = vadd.f32 %v3152_v5, %v3019_v2 }
 0xb52   : > { %3201 = vst.msk [vmem:[#allocation5 + $0x78] sm:$0xff] %vm3185_vm12, %v3184_v14 }
 0xb57   : > { %3641 = vadd.xlane.f32.xlu1 %v3640_v47 }
 0xb5f   : > { %v3508_v39 = vpop.permute.xlu1 %3507 }
 0xb60   : > { %v3545_v18 = vsub.f32 %v7319_v53, %v3508_v39  ;;  %v3652_v53 = vsel %vm899_vm6, %v3622_v55, 0.0 }
 0xb67   : > { %v3513_v30 = vpop.permute.xlu1 %3512  ;;  %3644 = vadd.xlane.f32.xlu2 %v3643_v17  ;;  %v3445_v17 = vmul.f32 1.442695, %v8217_v52 }
 0xb68   : > { %v3546_v10 = vsub.f32 %v7331_v41, %v3513_v30  ;;  %v5457_v41 = vpop.eup %5456 }
 0xb69   : > { %v5459_v43 = vpop.eup %5458  ;;  %v3697_v14 = vmul.f32 %v5457_v41, %v3681_v6 }
 0xb6a   : > { %v3556_v3 = vpack.c.bf16 %v3546_v10, %v3545_v18  ;;  %v5461_v61 = vpop.eup %5460  ;;  %v2912_v18 = vld [vmem:[#allocation5 + $0x20] sm:$0xff]  ;;  %v8218_v10 = vld [vmem:[#allocation15_spill] sm:$0xff] }
 0xb6b   : > { %v7662_v21 = vpop.eup %5462  ;;  %v3613_v20 = vpack.c.bf16 %v5461_v61, %v5459_v43  ;;  %v3008_v8 = vmul.f32 %v8218_v10, %v2912_v18  ;;  %v3623_v10 = vunpack.c.l.bf16 %v7630_v63  ;;  %v3682_v63 = vld [vmem:[#allocation4 + $0x18] sm:$0xff] }
 0xb6c   : > { %v3569_v51 = vunpack.c.l.bf16 %v3556_v3  ;;  %v3570_v23 = vunpack.c.h.bf16 %v3556_v3 }
 0xb6d   : > { %3650 = vadd.xlane.f32.xlu0 %v3649_v45  ;;  %v3627_v7 = vunpack.c.l.bf16 %v3613_v20 }
 0xb6e   : > { %v3595_v28 = vmul.f32 1.442695, %v3569_v51  ;;  %v3597_v1 = vmul.f32 1.442695, %v3570_v23 }
 0xb6f   : > { %v3528_v54 = vpop.permute.xlu1 %3527  ;;  %3653 = vadd.xlane.f32.xlu2 %v3652_v53  ;;  %v3667_v24 = vsel %vm899_vm6, %v3627_v7, 0.0 }
 0xb70   : > { %5464 = vpow2.f32 %v3595_v28  ;;  %3772 = vperm.xlu1 %5221, %v5457_v41   ;;  %v3549_v11 = vsub.f32 %v8213_v16, %v3528_v54  ;;  %v3628_v28 = vunpack.c.h.bf16 %v3613_v20  ;;  %v2915_v41 = vld [vmem:[#allocation5 + $0x38] sm:$0xff]  ;;  %v8219_v54 = vld [vmem:[#allocation22_spill] sm:$0xff]  ;;  %v8222_v16 = vld [vmem:[#allocation20_spill] sm:$0xff] }
 0xb71   : > { %5466 = vpow2.f32 %v3597_v1  ;;  %v8220_v43 = vsub.f32 %v8219_v54, %v7491_v48  ;;  %v3011_v40 = vmul.f32 %v8221_v22, %v2915_v41  ;;  %v3698_v41 = vmul.f32 %v7567_v33, %v3682_v63 }
 0xb72   : > { %5468 = vpow2.f32 %v3439_v59  ;;  %v3670_v1 = vsel %vm899_vm6, %v3628_v28, 0.0 }
 0xb73   : > { %5470 = vpow2.f32 %v3445_v17  ;;  %v3451_v12 = vmul.f32 1.442695, %v8220_v43 }
 0xb76   : > { %v5465_v32 = vpop.eup %5464 }
 0xb77   : > { %v5467_v15 = vpop.eup %5466  ;;  %v3533_v4 = vpop.permute.xlu1 %3532  ;;  %3659 = vadd.xlane.f32.xlu2 %v3658_v34 }
 0xb78   : > { %v3550_v35 = vsub.f32 %v8214_v29, %v3533_v4  ;;  %3787 = vperm.xlu1 %5221, %v7662_v21   ;;  %v7672_v2 = vpack.c.bf16 %v5467_v15, %v5465_v32  ;;  %v7685_v51 = vpop.eup %5468  ;;  %v7696_v32 = vpop.f32.mrf.mxu2 }
 0xb79   : > { %v3636_v5 = vpop.xlane.xlu2 %3635  ;;  %v7690_v53 = vpop.eup %5470 }
 0xb7a   : > { %v3558_v13 = vpack.c.bf16 %v3550_v35, %v3549_v11  ;;  %v3712_v47 = vadd.f32 %v3696_v60, %v3636_v5  ;;  %5026 = vmatmul.msk.bf16.gmra.mxu2 %vm899_vm6, %v7672_v2  ;;  %v3639_v39 = vpop.xlane.xlu0 %3638  ;;  %v3625_v38 = vunpack.c.l.bf16 %v7672_v2  ;;  %v3014_v11 = vmul.f32 %v8222_v16, %v2918_v46  ;;  %v2921_v5 = vld [vmem:[#allocation5 + $0x68] sm:$0xff]  ;;  %v3686_v16 = vld [vmem:[#allocation4 + $0x38] sm:$0xff] }
 0xb7b   : > { %v3713_v57 = vadd.f32 %v3697_v14, %v3639_v39  ;;  %v8223_v14 = vld [vmem:[#allocation19_spill] sm:$0xff]  ;;  %v3626_v28 = vunpack.c.h.bf16 %v7672_v2 }
 0xb7c   : > { %v3573_v26 = vunpack.c.l.bf16 %v3558_v13  ;;  %v3574_v30 = vunpack.c.h.bf16 %v3558_v13  ;;  %3729 = vst.msk [vmem:[#allocation4 + $0x8] sm:$0xff] %vm3727_vm11, %v3712_v47  ;;  %v3661_v56 = vsel %vm899_vm6, %v3625_v38, 0.0 }
 0xb7d   : > { %3730 = vst.msk [vmem:[#allocation4 + $0x10] sm:$0xff] %vm3727_vm11, %v3713_v57  ;;  %3662 = vadd.xlane.f32.xlu0 %v3661_v56  ;;  %v3664_v54 = vsel %vm899_vm6, %v3626_v28, 0.0  ;;  %v3744_v28 = vld [vmem:[#allocation5] sm:$0xff] }
 0xb7e   : > { %v3603_v3 = vmul.f32 1.442695, %v3573_v26  ;;  %v3605_v55 = vmul.f32 1.442695, %v3574_v30  ;;  %v3620_v26 = vunpack.c.h.bf16 %v7536_v27 }
 0xb7f   : > { %v3130_v23 = vpop.permute.xlu1 %3129  ;;  %3668 = vadd.xlane.f32.xlu2 %v3667_v24 }
 0xb80   : > { %5472 = vpow2.f32 %v3603_v3  ;;  %v3173_v45 = vadd.f32 %v3130_v23, %v3008_v8  ;;  %3802 = vperm.xlu1 %5221, %v7685_v51   ;;  %v3906_v60 = vpop.f32.mrf.mxu2  ;;  %v3646_v30 = vsel %vm899_vm6, %v3620_v26, 0.0 }
 0xb81   : > { %5474 = vpow2.f32 %v3605_v55  ;;  %v7720_v37 = vpop.permute.xlu2 %3762  ;;  %v3655_v55 = vsel %vm899_vm6, %v3623_v10, 0.0  ;;  %v3694_v10 = vld [vmem:[#allocation4 + $0x78] sm:$0xff] }
 0xb82   : > { %3190 = vst.msk [vmem:[#allocation5 + $0x20] sm:$0xff] %vm3185_vm12, %v3173_v45  ;;  %5476 = vpow2.f32 %v3451_v12 }
 0xb85   : > { %3671 = vadd.xlane.f32.xlu0 %v3670_v1 }
 0xb86   : > { %v5473_v61 = vpop.eup %5472 }
 0xb87   : > { %v5475_v62 = vpop.eup %5474  ;;  %v3136_v59 = vpop.permute.xlu1 %3135 }
 0xb88   : > { %v3176_v34 = vadd.f32 %v3136_v59, %v3011_v40  ;;  %3817 = vperm.xlu1 %5221, %v7690_v53   ;;  %v7699_v15 = vpack.c.bf16 %v5475_v62, %v5473_v61  ;;  %v7706_v29 = vpop.eup %5476  ;;  %v3908_v39 = vpop.f32.mrf.mxu2  ;;  %v3683_v62 = vld [vmem:[#allocation4 + $0x20] sm:$0xff] }
 0xb89   : > { %v7726_v17 = vpop.permute.xlu2 %3782  ;;  %v3699_v59 = vmul.f32 %v7576_v9, %v3683_v62 }
 0xb8a   : > { %3193 = vst.msk [vmem:[#allocation5 + $0x38] sm:$0xff] %vm3185_vm12, %v3176_v34  ;;  %5027 = vmatmul.msk.bf16.gmra.mxu2 %vm899_vm6, %v3613_v20  ;;  %v3630_v48 = vunpack.c.h.bf16 %v7699_v15  ;;  %v3017_v20 = vmul.f32 %v8223_v14, %v2921_v5  ;;  %v3629_v61 = vunpack.c.l.bf16 %v7699_v15  ;;  %v3688_v5 = vld [vmem:[#allocation4 + $0x48] sm:$0xff] }
 0xb8b   : > { %v3704_v9 = vmul.f32 %v7605_v44, %v3688_v5  ;;  %v3692_v44 = vld [vmem:[#allocation4 + $0x68] sm:$0xff] }
 0xb8c   : > { %v3676_v4 = vsel %vm899_vm6, %v3630_v48, 0.0  ;;  %v3673_v2 = vsel %vm899_vm6, %v3629_v61, 0.0 }
 0xb8d   : > { %3677 = vadd.xlane.f32.xlu2 %v3676_v4  ;;  %v7717_v7 = vpop.permute.xlu0 %3767  ;;  %v3685_v4 = vld [vmem:[#allocation4 + $0x30] sm:$0xff] }
 0xb8e   : > { %v3701_v46 = vmul.f32 %v7588_v49, %v3685_v4  ;;  %v3689_v49 = vld [vmem:[#allocation4 + $0x50] sm:$0xff] }
 0xb8f   : > { %v3142_v35 = vpop.permute.xlu1 %3141 }
 0xb90   : > { %v3179_v6 = vadd.f32 %v3142_v35, %v3014_v11  ;;  %3832 = vperm.xlu1 %5221, %v7706_v29   ;;  %v3911_v38 = vpop.f32.mrf.mxu2  ;;  %v3702_v35 = vmul.f32 %v7594_v25, %v3686_v16 }
 0xb91   : > { %v7735_v8 = vpop.permute.xlu2 %3797 }
 0xb92   : > { %3196 = vst.msk [vmem:[#allocation5 + $0x50] sm:$0xff] %vm3185_vm12, %v3179_v6 }
 0xb95   : > { %v7724_v52 = vpop.permute.xlu0 %3777 }
 0xb97   : > { %v3148_v13 = vpop.permute.xlu1 %3147 }
 0xb98   : > { %v3182_v47 = vadd.f32 %v3148_v13, %v3017_v20  ;;  %v7722_v50 = vpop.f32.mrf.mxu2  ;;  %v3705_v13 = vmul.f32 %v7613_v42, %v3689_v49 }
 0xb99   : > { %3957 = vrot.lane.b32.xlu0 %v3901_v19, %s5612_s12  ;;  %v3679_v19 = vld [vmem:[#allocation4] sm:$0xff]  ;;  %v7743_v1 = vpop.permute.xlu2 %3812 }
 0xb9a   : > { %3199 = vst.msk [vmem:[#allocation5 + $0x68] sm:$0xff] %vm3185_vm12, %v3182_v47  ;;  %5028 = vmatmul.msk.bf16.gmra.mxu2 %vm899_vm6, %v7699_v15  ;;  %v3695_v3 = vmul.f32 %v7556_v58, %v3679_v19  ;;  %v3691_v47 = vld [vmem:[#allocation4 + $0x60] sm:$0xff]  ;;  %v3710_v19 = vmul.f32 %v7634_v0, %v3694_v10 }
 0xb9d   : > { %v7731_v56 = vpop.permute.xlu0 %3792 }
 0xba1   : > { %3963 = vrot.lane.b32.xlu0 %v3908_v39, %s5612_s12  ;;  %v7753_v40 = vpop.permute.xlu2 %3827 }
 0xba5   : > { %3961 = vrot.lane.b32.xlu2 %v3906_v60, %s5612_s12  ;;  %v7739_v23 = vpop.permute.xlu0 %3807 }
 0xba9   : > { %3965 = vrot.lane.b32.xlu0 %v3911_v38, %s5612_s12  ;;  %v3707_v38 = vmul.f32 %v7621_v36, %v3691_v47 }
 0xbad   : > { %v7750_v22 = vpop.permute.xlu0 %3822 }
 0xbb4   : > { %v3916_v57 = vpop.f32.mrf.mxu2 }
 0xbb5   : > { %3969 = vrot.lane.b32.xlu2 %v3916_v57, %s5612_s12  ;;  %v7755_v33 = vpop.permute.xlu0 %3837 }
 0xbba   : > { %3647 = vadd.xlane.f32.xlu1 %v3646_v30 }
 0xbbc   : > { %v3918_v18 = vpop.f32.mrf.mxu2 }
 0xbbd   : > { %3971 = vrot.lane.b32.xlu0 %v3918_v18, %s5612_s12 }
 0xbc2   : > { %v3633_v24 = vpop.xlane.xlu1 %3632  ;;  %3656 = vadd.xlane.f32.xlu1 %v3655_v55 }
 0xbc3   : > { %v3711_v27 = vadd.f32 %v3695_v3, %v3633_v24  ;;  %v3746_v24 = vld [vmem:[#allocation5 + $0x10] sm:$0xff] }
 0xbc4   : > { %v3921_v45 = vpop.f32.mrf.mxu2 }
 0xbc5   : > { %3728 = vst.msk [vmem:[#allocation4] sm:$0xff] %vm3727_vm11, %v3711_v27 }
 0xbca   : > { %v3642_v58 = vpop.xlane.xlu1 %3641  ;;  %3665 = vadd.xlane.f32.xlu1 %v3664_v54 }
 0xbcb   : > { %v3714_v43 = vadd.f32 %v3698_v41, %v3642_v58  ;;  %v3840_v41 = vmul.f32 %v7720_v37, %v3744_v28 }
 0xbcc   : > { %v3923_v12 = vpop.f32.mrf.mxu2 }
 0xbcd   : > { %3731 = vst.msk [vmem:[#allocation4 + $0x18] sm:$0xff] %vm3727_vm11, %v3714_v43  ;;  %3975 = vrot.lane.b32.xlu2 %v3923_v12, %s5612_s12  ;;  %v3750_v43 = vld [vmem:[#allocation5 + $0x30] sm:$0xff] }
 0xbce   : > { %v3846_v12 = vmul.f32 %v7731_v56, %v3750_v43 }
 0xbd2   : > { %3674 = vadd.xlane.f32.xlu1 %v3673_v2  ;;  %v3747_v2 = vld [vmem:[#allocation5 + $0x18] sm:$0xff] }
 0xbda   : > { %v3645_v34 = vpop.xlane.xlu2 %3644 }
 0xbdb   : > { %v3715_v48 = vadd.f32 %v3699_v59, %v3645_v34  ;;  %v3843_v34 = vmul.f32 %v7724_v52, %v3747_v2  ;;  %v3753_v52 = vld [vmem:[#allocation5 + $0x48] sm:$0xff] }
 0xbdc   : > { %v3849_v5 = vmul.f32 %v7739_v23, %v3753_v52  ;;  %v3687_v23 = vld [vmem:[#allocation4 + $0x40] sm:$0xff] }
 0xbdd   : > { %3732 = vst.msk [vmem:[#allocation4 + $0x20] sm:$0xff] %vm3727_vm11, %v3715_v48 }
 0xbe0   : > { %v3651_v15 = vpop.xlane.xlu0 %3650 }
 0xbe1   : > { %v3717_v11 = vadd.f32 %v3701_v46, %v3651_v15  ;;  %v3748_v46 = vld [vmem:[#allocation5 + $0x20] sm:$0xff] }
 0xbe2   : > { %v3654_v60 = vpop.xlane.xlu2 %3653  ;;  %v3773_v42 = vpop.permute.xlu1 %3772  ;;  %v3844_v15 = vmul.f32 %v7726_v17, %v3748_v46  ;;  %v3751_v17 = vld [vmem:[#allocation5 + $0x38] sm:$0xff] }
 0xbe3   : > { %3734 = vst.msk [vmem:[#allocation4 + $0x30] sm:$0xff] %vm3727_vm11, %v3717_v11  ;;  %v3718_v6 = vadd.f32 %v3702_v35, %v3654_v60 }
 0xbe5   : > { %3735 = vst.msk [vmem:[#allocation4 + $0x38] sm:$0xff] %vm3727_vm11, %v3718_v6 }
 0xbea   : > { %v3660_v14 = vpop.xlane.xlu2 %3659  ;;  %v7780_v27 = vpop.permute.xlu1 %3787 }
 0xbeb   : > { %v3720_v20 = vadd.f32 %v3704_v9, %v3660_v14  ;;  %3959 = vrot.lane.b32.xlu1 %v7696_v32, %s5612_s12  ;;  %v3708_v32 = vmul.f32 %v7626_v31, %v3692_v44  ;;  %v3842_v31 = vmul.f32 %v3773_v42, %v3746_v24 }
 0xbed   : > { %3737 = vst.msk [vmem:[#allocation4 + $0x48] sm:$0xff] %vm3727_vm11, %v3720_v20  ;;  %v3684_v20 = vld [vmem:[#allocation4 + $0x28] sm:$0xff] }
 0xbee   : > { %v3700_v49 = vmul.f32 %v7662_v21, %v3684_v20 }
 0xbf0   : > { %v3663_v25 = vpop.xlane.xlu0 %3662 }
 0xbf1   : > { %v3721_v39 = vadd.f32 %v3705_v13, %v3663_v25  ;;  %v3847_v25 = vmul.f32 %v7735_v8, %v3751_v17  ;;  %v3693_v8 = vld [vmem:[#allocation4 + $0x70] sm:$0xff] }
 0xbf2   : > { %v3669_v57 = vpop.xlane.xlu2 %3668  ;;  %v7787_v62 = vpop.permute.xlu1 %3802  ;;  %v3709_v42 = vmul.f32 %v7706_v29, %v3693_v8 }
 0xbf3   : > { %3738 = vst.msk [vmem:[#allocation4 + $0x50] sm:$0xff] %vm3727_vm11, %v3721_v39  ;;  %v3723_v26 = vadd.f32 %v3707_v38, %v3669_v57  ;;  %3967 = vrot.lane.b32.xlu1 %v7722_v50, %s5612_s12  ;;  %v3703_v57 = vmul.f32 %v7685_v51, %v3687_v23 }
 0xbf5   : > { %3740 = vst.msk [vmem:[#allocation4 + $0x60] sm:$0xff] %vm3727_vm11, %v3723_v26 }
 0xbf8   : > { %v3672_v30 = vpop.xlane.xlu0 %3671 }
 0xbf9   : > { %v3724_v18 = vadd.f32 %v3708_v32, %v3672_v30  ;;  %v3690_v32 = vld [vmem:[#allocation4 + $0x58] sm:$0xff] }
 0xbfa   : > { %v7794_v56 = vpop.permute.xlu1 %3817  ;;  %v3706_v21 = vmul.f32 %v7690_v53, %v3690_v32 }
 0xbfb   : > { %3741 = vst.msk [vmem:[#allocation4 + $0x68] sm:$0xff] %vm3727_vm11, %v3724_v18  ;;  %3973 = vrot.lane.b32.xlu1 %v3921_v45, %s5612_s12 }
 0xbfd   : > { %v3926_v36 = vpop.f32.mrf.mxu2 }
 0xbfe   : > { %3977 = vrot.lane.b32.xlu0 %v3926_v36, %s5612_s12 }
 0xc00   : > { %v3678_v3 = vpop.xlane.xlu2 %3677 }
 0xc01   : > { %v3726_v50 = vadd.f32 %v3710_v19, %v3678_v3  ;;  %v3745_v19 = vld [vmem:[#allocation5 + $0x8] sm:$0xff] }
 0xc02   : > { %v7798_v60 = vpop.permute.xlu1 %3832  ;;  %v3841_v51 = vmul.f32 %v7717_v7, %v3745_v19  ;;  %v3754_v7 = vld [vmem:[#allocation5 + $0x50] sm:$0xff] }
 0xc03   : > { %3743 = vst.msk [vmem:[#allocation4 + $0x78] sm:$0xff] %vm3727_vm11, %v3726_v50  ;;  %v3850_v43 = vmul.f32 %v7743_v1, %v3754_v7  ;;  %v3757_v1 = vld [vmem:[#allocation5 + $0x68] sm:$0xff] }
 0xc05   : > { %v3928_v55 = vpop.f32.mrf.mxu2 }
 0xc06   : > { %3979 = vrot.lane.b32.xlu1 %v3928_v55, %s5612_s12  ;;  %v3749_v55 = vld [vmem:[#allocation5 + $0x28] sm:$0xff] }
 0xc07   : > { %v3845_v53 = vmul.f32 %v7780_v27, %v3749_v55 }
 0xc08   : > { %v3962_v45 = vpop.permute.xlu2 %3961 }
 0xc09   : > { %v4007_v63 = vadd.f32 %v3962_v45, %v3842_v31  ;;  %v3756_v31 = vld [vmem:[#allocation5 + $0x60] sm:$0xff] }
 0xc0a   : > { %v3852_v28 = vmul.f32 %v7750_v22, %v3756_v31  ;;  %v3755_v22 = vld [vmem:[#allocation5 + $0x58] sm:$0xff] }
 0xc0b   : > { %4024 = vst.msk [vmem:[#allocation5 + $0x10] sm:$0xff] %vm4021_vm13, %v4007_v63  ;;  %v3958_v0 = vpop.permute.xlu0 %3957 }
 0xc0c   : > { %v4005_v54 = vadd.f32 %v3958_v0, %v3840_v41  ;;  %v3752_v41 = vld [vmem:[#allocation5 + $0x40] sm:$0xff] }
 0xc0d   : > { %v3931_v58 = vpop.f32.mrf.mxu2  ;;  %v3848_v0 = vmul.f32 %v7787_v62, %v3752_v41 }
 0xc0e   : > { %4022 = vst.msk [vmem:[#allocation5] sm:$0xff] %vm4021_vm13, %v4005_v54  ;;  %3981 = vrot.lane.b32.xlu2 %v3931_v58, %s5612_s12 }
 0xc10   : > { %v3970_v61 = vpop.permute.xlu2 %3969 }
 0xc11   : > { %v4011_v59 = vadd.f32 %v3970_v61, %v3846_v12  ;;  %v3851_v61 = vmul.f32 %v7794_v56, %v3755_v22 }
 0xc13   : > { %4028 = vst.msk [vmem:[#allocation5 + $0x30] sm:$0xff] %vm4021_vm13, %v4011_v59  ;;  %v3964_v37 = vpop.permute.xlu0 %3963 }
 0xc14   : > { %v4008_v48 = vadd.f32 %v3964_v37, %v3843_v34  ;;  %v3759_v34 = vld [vmem:[#allocation5 + $0x78] sm:$0xff] }
 0xc15   : > { %v3933_v4 = vpop.f32.mrf.mxu2  ;;  %v3855_v62 = vmul.f32 %v7755_v33, %v3759_v34 }
 0xc16   : > { %4025 = vst.msk [vmem:[#allocation5 + $0x18] sm:$0xff] %vm4021_vm13, %v4008_v48  ;;  %3983 = vrot.lane.b32.xlu0 %v3933_v4, %s5612_s12  ;;  %v3853_v4 = vmul.f32 %v7753_v40, %v3757_v1 }
 0xc1b   : > { %v3966_v16 = vpop.permute.xlu0 %3965 }
 0xc1c   : > { %v4009_v11 = vadd.f32 %v3966_v16, %v3844_v15  ;;  %v3758_v16 = vld [vmem:[#allocation5 + $0x70] sm:$0xff] }
 0xc1d   : > { %v3936_v35 = vpop.f32.mrf.mxu2  ;;  %v3854_v56 = vmul.f32 %v7798_v60, %v3758_v16 }
 0xc1e   : > { %4026 = vst.msk [vmem:[#allocation5 + $0x20] sm:$0xff] %vm4021_vm13, %v4009_v11  ;;  %3985 = vrot.lane.b32.xlu1 %v3936_v35, %s5612_s12 }
 0xc25   : > { %v3938_v6 = vpop.f32.mrf.mxu2 }
 0xc26   : > { %3987 = vrot.lane.b32.xlu2 %v3938_v6, %s5612_s12 }
 0xc27   : > { %v3976_v9 = vpop.permute.xlu2 %3975 }
 0xc28   : > { %v4014_v14 = vadd.f32 %v3976_v9, %v3849_v5 }
 0xc2a   : > { %4031 = vst.msk [vmem:[#allocation5 + $0x48] sm:$0xff] %vm4021_vm13, %v4014_v14 }
 0xc2d   : > { %v3648_v13 = vpop.xlane.xlu1 %3647 }
 0xc2e   : > { %v3716_v47 = vadd.f32 %v3700_v49, %v3648_v13 }
 0xc2f   : > { %v3972_v39 = vpop.permute.xlu0 %3971 }
 0xc30   : > { %3733 = vst.msk [vmem:[#allocation4 + $0x28] sm:$0xff] %vm3727_vm11, %v3716_v47  ;;  %v4012_v38 = vadd.f32 %v3972_v39, %v3847_v25 }
 0xc32   : > { %4029 = vst.msk [vmem:[#allocation5 + $0x38] sm:$0xff] %vm4021_vm13, %v4012_v38 }
 0xc35   : > { %v3657_v26 = vpop.xlane.xlu1 %3656 }
 0xc36   : > { %v3719_v44 = vadd.f32 %v3703_v57, %v3657_v26 }
 0xc38   : > { %3736 = vst.msk [vmem:[#allocation4 + $0x40] sm:$0xff] %vm3727_vm11, %v3719_v44 }
 0xc3d   : > { %v3666_v30 = vpop.xlane.xlu1 %3665 }
 0xc3e   : > { %v3722_v18 = vadd.f32 %v3706_v21, %v3666_v30 }
 0xc40   : > { %3739 = vst.msk [vmem:[#allocation4 + $0x58] sm:$0xff] %vm3727_vm11, %v3722_v18 }
 0xc45   : > { %v3675_v36 = vpop.xlane.xlu1 %3674 }
 0xc46   : > { %v3725_v10 = vadd.f32 %v3709_v42, %v3675_v36 }
 0xc48   : > { %3742 = vst.msk [vmem:[#allocation4 + $0x70] sm:$0xff] %vm3727_vm11, %v3725_v10 }
 0xc5d   : > { %v3960_v3 = vpop.permute.xlu1 %3959 }
 0xc5e   : > { %v4006_v50 = vadd.f32 %v3960_v3, %v3841_v51 }
 0xc60   : > { %4023 = vst.msk [vmem:[#allocation5 + $0x8] sm:$0xff] %vm4021_vm13, %v4006_v50 }
 0xc65   : > { %v3968_v24 = vpop.permute.xlu1 %3967 }
 0xc66   : > { %v4010_v45 = vadd.f32 %v3968_v24, %v3845_v53 }
 0xc68   : > { %4027 = vst.msk [vmem:[#allocation5 + $0x28] sm:$0xff] %vm4021_vm13, %v4010_v45  ;;  %v3982_v29 = vpop.permute.xlu2 %3981 }
 0xc69   : > { %v4017_v63 = vadd.f32 %v3982_v29, %v3852_v28 }
 0xc6b   : > { %4034 = vst.msk [vmem:[#allocation5 + $0x60] sm:$0xff] %vm4021_vm13, %v4017_v63 }
 0xc6d   : > { %v3974_v54 = vpop.permute.xlu1 %3973 }
 0xc6e   : > { %v4013_v58 = vadd.f32 %v3974_v54, %v3848_v0 }
 0xc70   : > { %4030 = vst.msk [vmem:[#allocation5 + $0x40] sm:$0xff] %vm4021_vm13, %v4013_v58  ;;  %v3978_v27 = vpop.permute.xlu0 %3977 }
 0xc71   : > { %v4015_v12 = vadd.f32 %v3978_v27, %v3850_v43 }
 0xc73   : > { %4032 = vst.msk [vmem:[#allocation5 + $0x50] sm:$0xff] %vm4021_vm13, %v4015_v12 }
 0xc78   : > { %v3980_v2 = vpop.permute.xlu1 %3979 }
 0xc79   : > { %v4016_v59 = vadd.f32 %v3980_v2, %v3851_v61 }
 0xc7b   : > { %4033 = vst.msk [vmem:[#allocation5 + $0x58] sm:$0xff] %vm4021_vm13, %v4016_v59 }
 0xc80   : > { %v3988_v37 = vpop.permute.xlu2 %3987 }
 0xc81   : > { %v4020_v48 = vadd.f32 %v3988_v37, %v3855_v62 }
 0xc83   : > { %4037 = vst.msk [vmem:[#allocation5 + $0x78] sm:$0xff] %vm4021_vm13, %v4020_v48 }
 0xc88   : > { %v3984_v46 = vpop.permute.xlu0 %3983 }
 0xc89   : > { %v4018_v15 = vadd.f32 %v3984_v46, %v3853_v4 }
 0xc8b   : > { %4035 = vst.msk [vmem:[#allocation5 + $0x68] sm:$0xff] %vm4021_vm13, %v4018_v15 }
 0xc8f   : > { %4057 = sbr.rel (%p5029_p12) target bundleno = 3686 (0xe66), region = 56 }
 0xc90   : > { %v3986_v11 = vpop.permute.xlu1 %3985 }
 0xc91   : > { %v4019_v35 = vadd.f32 %v3986_v11, %v3854_v56 }
 0xc93   : > { %4036 = vst.msk [vmem:[#allocation5 + $0x70] sm:$0xff] %vm4021_vm13, %v4019_v35 }
 0xc94   : > { %v4062_v33 = vld [vmem:[#allocation4 + $0x20] sm:$0xff]  ;;  %v4060_v52 = vld [vmem:[#allocation4 + $0x10] sm:$0xff]  ;;  %v5621_v5 = vmov 0   ;;  %v4063_v40 = vld [vmem:[#allocation4 + $0x28] sm:$0xff]  ;;  %v5622_v53 = vmov 1   ;;  %v5623_v24 = vmov 2  }
 0xc95   : > { %v4058_v6 = vld [vmem:[#allocation4] sm:$0xff]  ;;  %5496 = vset.pattern.permute.xlu2 %v5621_v5  ;;  %5495 = vset.pattern.permute.xlu1 %v5621_v5  ;;  %5520 = vrcp.f32 %v4062_v33  ;;  %v4061_v9 = vld [vmem:[#allocation4 + $0x18] sm:$0xff]  ;;  %v4059_v60 = vld [vmem:[#allocation4 + $0x8] sm:$0xff]  ;;  %v5624_v31 = vmov 3   ;;  %vm4687_vm14 = vcmask 261120  }
 0xc96   : > { %5494 = vset.pattern.permute.xlu0 %v5621_v5  ;;  %5522 = vrcp.f32 %v4060_v52  ;;  %v4066_v49 = vld [vmem:[#allocation4 + $0x40] sm:$0xff]  ;;  %v4065_v25 = vld [vmem:[#allocation4 + $0x38] sm:$0xff]  ;;  %v4064_v39 = vld [vmem:[#allocation4 + $0x30] sm:$0xff] }
 0xc97   : > { %5524 = vrcp.f32 %v4058_v6  ;;  %v4069_v23 = vld [vmem:[#allocation4 + $0x58] sm:$0xff]  ;;  %v4068_v26 = vld [vmem:[#allocation4 + $0x50] sm:$0xff]  ;;  %v4067_v32 = vld [vmem:[#allocation4 + $0x48] sm:$0xff] }
 0xc98   : > { %5526 = vrcp.f32 %v4063_v40  ;;  %v4072_v30 = vld [vmem:[#allocation4 + $0x70] sm:$0xff]  ;;  %v4071_v8 = vld [vmem:[#allocation4 + $0x68] sm:$0xff]  ;;  %v4070_v36 = vld [vmem:[#allocation4 + $0x60] sm:$0xff] }
 0xc99   : > { %5528 = vrcp.f32 %v4061_v9  ;;  %v4073_v3 = vld [vmem:[#allocation4 + $0x78] sm:$0xff]  ;;  %v4094_v45 = vld [vmem:[#allocation5 + $0x20] sm:$0xff]  ;;  %v4095_v63 = vld [vmem:[#allocation5 + $0x28] sm:$0xff] }
 0xc9a   : > { %5530 = vrcp.f32 %v4059_v60  ;;  %v4098_v0 = vld [vmem:[#allocation5 + $0x40] sm:$0xff]  ;;  %v4101_v43 = vld [vmem:[#allocation5 + $0x58] sm:$0xff]  ;;  %v4092_v27 = vld [vmem:[#allocation5 + $0x10] sm:$0xff] }
 0xc9b   : > { %v7832_v14 = vpop.eup %5520  ;;  %5532 = vrcp.f32 %v4066_v49  ;;  %v4090_v22 = vld [vmem:[#allocation5] sm:$0xff]  ;;  %v4104_v37 = vld [vmem:[#allocation5 + $0x70] sm:$0xff]  ;;  %v4093_v48 = vld [vmem:[#allocation5 + $0x18] sm:$0xff] }
 0xc9c   : > { %v7834_v17 = vpop.eup %5522  ;;  %4128 = vperm.xlu2 %5496, %v7832_v14   ;;  %5534 = vrcp.f32 %v4065_v25  ;;  %v4091_v4 = vld [vmem:[#allocation5 + $0x8] sm:$0xff]  ;;  %v4097_v35 = vld [vmem:[#allocation5 + $0x38] sm:$0xff]  ;;  %v4096_v33 = vld [vmem:[#allocation5 + $0x30] sm:$0xff] }
 0xc9d   : > { %v7837_v20 = vpop.eup %5524  ;;  %4118 = vperm.xlu1 %5495, %v7834_v17   ;;  %5536 = vrcp.f32 %v4064_v39  ;;  %v4100_v49 = vld [vmem:[#allocation5 + $0x50] sm:$0xff]  ;;  %v4099_v25 = vld [vmem:[#allocation5 + $0x48] sm:$0xff] }
 0xc9e   : > { %4108 = vperm.xlu0 %5494, %v7837_v20   ;;  %v7841_v13 = vpop.eup %5526  ;;  %5538 = vrcp.f32 %v4069_v23 }
 0xc9f   : > { %v7843_v47 = vpop.eup %5528  ;;  %5540 = vrcp.f32 %v4068_v26 }
 0xca0   : > { %v7845_v38 = vpop.eup %5530  ;;  %5542 = vrcp.f32 %v4067_v32 }
 0xca1   : > { %v7850_v57 = vpop.eup %5532  ;;  %5544 = vrcp.f32 %v4072_v30 }
 0xca2   : > { %v7852_v44 = vpop.eup %5534  ;;  %5546 = vrcp.f32 %v4071_v8 }
 0xca3   : > { %v7854_v21 = vpop.eup %5536  ;;  %5548 = vrcp.f32 %v4070_v36  ;;  %v4103_v36 = vld [vmem:[#allocation5 + $0x68] sm:$0xff] }
 0xca4   : > { %4133 = vperm.xlu2 %5496, %v7841_v13   ;;  %v7859_v18 = vpop.eup %5538  ;;  %5550 = vrcp.f32 %v4073_v3 }
 0xca5   : > { %4123 = vperm.xlu1 %5495, %v7843_v47   ;;  %v7861_v42 = vpop.eup %5540 }
 0xca6   : > { %4113 = vperm.xlu0 %5494, %v7845_v38   ;;  %v7863_v10 = vpop.eup %5542 }
 0xca7   : > { %v7868_v19 = vpop.eup %5544 }
 0xca8   : > { %v7870_v51 = vpop.eup %5546 }
 0xca9   : > { %v7872_v50 = vpop.eup %5548 }
 0xcaa   : > { %v7877_v55 = vpop.eup %5550 }
 0xcac   : > { %4148 = vperm.xlu2 %5496, %v7850_v57  }
 0xcad   : > { %4143 = vperm.xlu1 %5495, %v7852_v44  }
 0xcae   : > { %4138 = vperm.xlu0 %5494, %v7854_v21  }
 0xcb4   : > { %4163 = vperm.xlu2 %5496, %v7859_v18  }
 0xcb5   : > { %4158 = vperm.xlu1 %5495, %v7861_v42  }
 0xcb6   : > { %4153 = vperm.xlu0 %5494, %v7863_v10  }
 0xcbc   : > { %4178 = vperm.xlu2 %5496, %v7868_v19  }
 0xcbd   : > { %4173 = vperm.xlu1 %5495, %v7870_v51  }
 0xcbe   : > { %4168 = vperm.xlu0 %5494, %v7872_v50  }
 0xcc4   : > { %5498 = vset.pattern.permute.xlu2 %v5622_v53 }
 0xcc5   : > { %5497 = vset.pattern.permute.xlu1 %v5622_v53  ;;  %4239 = vperm.xlu2 %5498, %v7845_v38  }
 0xcc6   : > { %4183 = vperm.xlu0 %5494, %v7877_v55   ;;  %4235 = vperm.xlu1 %5497, %v7837_v20  }
 0xccd   : > { %4251 = vperm.xlu2 %5498, %v7832_v14  }
 0xcce   : > { %5499 = vset.pattern.permute.xlu0 %v5622_v53  ;;  %4247 = vperm.xlu1 %5497, %v7843_v47  }
 0xccf   : > { %4243 = vperm.xlu0 %5499, %v7834_v17  }
 0xcd5   : > { %4259 = vperm.xlu2 %5498, %v7854_v21  }
 0xcd6   : > { %4255 = vperm.xlu1 %5497, %v7841_v13  }
 0xcd7   : > { %4263 = vperm.xlu0 %5499, %v7852_v44  }
 0xcdd   : > { %4271 = vperm.xlu2 %5498, %v7863_v10  }
 0xcde   : > { %4267 = vperm.xlu1 %5497, %v7850_v57  }
 0xcdf   : > { %4283 = vperm.xlu0 %5499, %v7872_v50  }
 0xce5   : > { %5500 = vset.pattern.permute.xlu2 %v5623_v24 }
 0xce6   : > { %4287 = vperm.xlu1 %5497, %v7870_v51   ;;  %4379 = vperm.xlu2 %5500, %v7850_v57  }
 0xce7   : > { %4291 = vperm.xlu0 %5499, %v7868_v19  }
 0xcee   : > { %5501 = vset.pattern.permute.xlu1 %v5623_v24  ;;  %4399 = vperm.xlu2 %5500, %v7870_v51  }
 0xcef   : > { %5512 = vset.pattern.permute.xlu0 %v5624_v31  ;;  %4395 = vperm.xlu1 %5501, %v7872_v50  }
 0xcf0   : > { %4475 = vperm.xlu0 %5512, %v7832_v14  }
 0xcf6   : > { %v4129_v28 = vpop.permute.xlu2 %4128  ;;  %5503 = vset.pattern.permute.xlu2 %v5622_v53 }
 0xcf7   : > { %v4190_v29 = vmul.f32 %v4129_v28, %v4094_v45  ;;  %5502 = vset.pattern.permute.xlu1 %v5622_v53  ;;  %4279 = vperm.xlu2 %5503, %v7859_v18  }
 0xcf8   : > { %5513 = vset.pattern.permute.xlu0 %v5623_v24  ;;  %4275 = vperm.xlu1 %5502, %v7861_v42  }
 0xcf9   : > { %4206 = vst.msk [vmem:[#allocation5 + $0x20] sm:$0xff] %vm797_vm5, %v4190_v29  ;;  %4383 = vperm.xlu0 %5513, %v7863_v10  }
 0xcfe   : > { %v4134_v41 = vpop.permute.xlu2 %4133 }
 0xcff   : > { %v4191_v7 = vmul.f32 %v4134_v41, %v4095_v63  ;;  %5504 = vset.pattern.permute.xlu2 %v5623_v24  ;;  %v4105_v63 = vld [vmem:[#allocation5 + $0x78] sm:$0xff] }
 0xd00   : > { %4295 = vperm.xlu1 %5502, %v7877_v55   ;;  %4347 = vperm.xlu2 %5504, %v7837_v20   ;;  %v4222_v23 = vld [vmem:[#allocation5 + $0x20] sm:$0xff] }
 0xd01   : > { %4207 = vst.msk [vmem:[#allocation5 + $0x28] sm:$0xff] %vm797_vm5, %v4191_v7  ;;  %4367 = vperm.xlu0 %5513, %v7841_v13  }
 0xd06   : > { %v4149_v54 = vpop.permute.xlu2 %4148 }
 0xd07   : > { %v4194_v58 = vmul.f32 %v4149_v54, %v4098_v0 }
 0xd08   : > { %5505 = vset.pattern.permute.xlu1 %v5623_v24  ;;  %4363 = vperm.xlu2 %5504, %v7832_v14  }
 0xd09   : > { %4210 = vst.msk [vmem:[#allocation5 + $0x40] sm:$0xff] %vm797_vm5, %v4194_v58  ;;  %4387 = vperm.xlu0 %5513, %v7861_v42   ;;  %4351 = vperm.xlu1 %5505, %v7845_v38  }
 0xd0e   : > { %v4164_v12 = vpop.permute.xlu2 %4163 }
 0xd0f   : > { %v4197_v61 = vmul.f32 %v4164_v12, %v4101_v43  ;;  %v4119_v2 = vpop.permute.xlu1 %4118 }
 0xd10   : > { %v4188_v59 = vmul.f32 %v4119_v2, %v4092_v27  ;;  %v4109_v34 = vpop.permute.xlu0 %4108  ;;  %5507 = vset.pattern.permute.xlu2 %v5624_v31 }
 0xd11   : > { %4213 = vst.msk [vmem:[#allocation5 + $0x58] sm:$0xff] %vm797_vm5, %v4197_v61  ;;  %4407 = vperm.xlu0 %5513, %v7877_v55   ;;  %v4186_v62 = vmul.f32 %v4109_v34, %v4090_v22  ;;  %5506 = vset.pattern.permute.xlu1 %v5624_v31 }
 0xd12   : > { %4204 = vst.msk [vmem:[#allocation5 + $0x10] sm:$0xff] %vm797_vm5, %v4188_v59  ;;  %4495 = vperm.xlu2 %5507, %v7863_v10   ;;  %4491 = vperm.xlu1 %5506, %v7850_v57  }
 0xd13   : > { %4202 = vst.msk [vmem:[#allocation5] sm:$0xff] %vm797_vm5, %v4186_v62 }
 0xd16   : > { %v4179_v1 = vpop.permute.xlu2 %4178 }
 0xd17   : > { %v4200_v46 = vmul.f32 %v4179_v1, %v4104_v37  ;;  %v4124_v15 = vpop.permute.xlu1 %4123 }
 0xd18   : > { %v4189_v16 = vmul.f32 %v4124_v15, %v4093_v48  ;;  %v4114_v56 = vpop.permute.xlu0 %4113  ;;  %v4229_v15 = vld [vmem:[#allocation5 + $0x58] sm:$0xff] }
 0xd19   : > { %4216 = vst.msk [vmem:[#allocation5 + $0x70] sm:$0xff] %vm797_vm5, %v4200_v46  ;;  %4375 = vperm.xlu0 %5513, %v7852_v44   ;;  %v4187_v11 = vmul.f32 %v4114_v56, %v4091_v4  ;;  %v4220_v22 = vld [vmem:[#allocation5 + $0x10] sm:$0xff]  ;;  %v4226_v4 = vld [vmem:[#allocation5 + $0x40] sm:$0xff] }
 0xd1a   : > { %4205 = vst.msk [vmem:[#allocation5 + $0x18] sm:$0xff] %vm797_vm5, %v4189_v16  ;;  %4511 = vperm.xlu2 %5507, %v7870_v51   ;;  %4507 = vperm.xlu1 %5506, %v7872_v50   ;;  %v4102_v51 = vld [vmem:[#allocation5 + $0x60] sm:$0xff] }
 0xd1b   : > { %4203 = vst.msk [vmem:[#allocation5 + $0x8] sm:$0xff] %vm797_vm5, %v4187_v11 }
 0xd1f   : > { %v4144_v52 = vpop.permute.xlu1 %4143  ;;  %v4240_v6 = vpop.permute.xlu2 %4239 }
 0xd20   : > { %v4193_v5 = vmul.f32 %v4144_v52, %v4097_v35  ;;  %v4139_v40 = vpop.permute.xlu0 %4138 }
 0xd21   : > { %v4192_v9 = vmul.f32 %v4139_v40, %v4096_v33  ;;  %5518 = vset.pattern.permute.xlu0 %v5624_v31  ;;  %v4232_v33 = vld [vmem:[#allocation5 + $0x70] sm:$0xff] }
 0xd22   : > { %4209 = vst.msk [vmem:[#allocation5 + $0x38] sm:$0xff] %vm797_vm5, %v4193_v5  ;;  %v4219_v60 = vld [vmem:[#allocation5 + $0x8] sm:$0xff]  ;;  %5509 = vset.pattern.permute.xlu2 %v5623_v24  ;;  %5508 = vset.pattern.permute.xlu1 %v5623_v24 }
 0xd23   : > { %v4299_v14 = vmul.f32 %v4240_v6, %v4219_v60  ;;  %4208 = vst.msk [vmem:[#allocation5 + $0x30] sm:$0xff] %vm797_vm5, %v4192_v9  ;;  %4403 = vperm.xlu2 %5509, %v7868_v19   ;;  %4391 = vperm.xlu1 %5508, %v7859_v18  }
 0xd24   : > { %4467 = vperm.xlu0 %5518, %v7834_v17  }
 0xd25   : > { %4315 = vst.msk [vmem:[#allocation5 + $0x8] sm:$0xff] %vm2349_vm9, %v4299_v14 }
 0xd27   : > { %v4159_v39 = vpop.permute.xlu1 %4158  ;;  %v4252_v57 = vpop.permute.xlu2 %4251 }
 0xd28   : > { %v4196_v26 = vmul.f32 %v4159_v39, %v4100_v49  ;;  %v4302_v32 = vmul.f32 %v4252_v57, %v4222_v23  ;;  %v4154_v30 = vpop.permute.xlu0 %4153 }
 0xd29   : > { %v4195_v8 = vmul.f32 %v4154_v30, %v4099_v25  ;;  %v4225_v37 = vld [vmem:[#allocation5 + $0x38] sm:$0xff] }
 0xd2a   : > { %4212 = vst.msk [vmem:[#allocation5 + $0x50] sm:$0xff] %vm797_vm5, %v4196_v26  ;;  %v4224_v10 = vld [vmem:[#allocation5 + $0x30] sm:$0xff] }
 0xd2b   : > { %4318 = vst.msk [vmem:[#allocation5 + $0x20] sm:$0xff] %vm2349_vm9, %v4302_v32  ;;  %5511 = vset.pattern.permute.xlu2 %v5624_v31  ;;  %5510 = vset.pattern.permute.xlu1 %v5624_v31 }
 0xd2c   : > { %4211 = vst.msk [vmem:[#allocation5 + $0x48] sm:$0xff] %vm797_vm5, %v4195_v8  ;;  %4463 = vperm.xlu2 %5511, %v7845_v38   ;;  %4459 = vperm.xlu1 %5510, %v7837_v20   ;;  %v4218_v38 = vld [vmem:[#allocation5] sm:$0xff]  ;;  %v5085_v8 = vld [vmem:[%s8089_s4 + $0x8] sm:$0xff] }
 0xd2f   : > { %v4174_v3 = vpop.permute.xlu1 %4173  ;;  %v4260_v50 = vpop.permute.xlu2 %4259 }
 0xd30   : > { %v4199_v53 = vmul.f32 %v4174_v3, %v4103_v36  ;;  %v4169_v45 = vpop.permute.xlu0 %4168  ;;  %v4304_v28 = vmul.f32 %v4260_v50, %v4224_v10 }
 0xd31   : > { %v4198_v29 = vmul.f32 %v4169_v45, %v4102_v51  ;;  %v4228_v36 = vld [vmem:[#allocation5 + $0x50] sm:$0xff] }
 0xd32   : > { %4215 = vst.msk [vmem:[#allocation5 + $0x68] sm:$0xff] %vm797_vm5, %v4199_v53  ;;  %v4334_v23 = vld [vmem:[#allocation5 + $0x20] sm:$0xff] }
 0xd33   : > { %4214 = vst.msk [vmem:[#allocation5 + $0x60] sm:$0xff] %vm797_vm5, %v4198_v29  ;;  %v4227_v20 = vld [vmem:[#allocation5 + $0x48] sm:$0xff] }
 0xd34   : > { %4320 = vst.msk [vmem:[#allocation5 + $0x30] sm:$0xff] %vm2349_vm9, %v4304_v28  ;;  %5514 = vset.pattern.permute.xlu2 %v5623_v24  ;;  %4479 = vperm.xlu1 %5510, %v7841_v13  }
 0xd35   : > { %4355 = vperm.xlu2 %5514, %v7834_v17   ;;  %v4221_v17 = vld [vmem:[#allocation5 + $0x18] sm:$0xff] }
 0xd37   : > { %v4272_v41 = vpop.permute.xlu2 %4271 }
 0xd38   : > { %v4236_v7 = vpop.permute.xlu1 %4235  ;;  %v4184_v0 = vpop.permute.xlu0 %4183  ;;  %v4307_v54 = vmul.f32 %v4272_v41, %v4227_v20  ;;  %v5084_v20 = vld [vmem:[%s8089_s4] sm:$0xff] }
 0xd39   : > { %v4298_v58 = vmul.f32 %v4236_v7, %v4218_v38  ;;  %v4201_v43 = vmul.f32 %v4184_v0, %v4105_v63 }
 0xd3a   : > { %4323 = vst.msk [vmem:[#allocation5 + $0x48] sm:$0xff] %vm2349_vm9, %v4307_v54 }
 0xd3b   : > { %4314 = vst.msk [vmem:[#allocation5] sm:$0xff] %vm2349_vm9, %v4298_v58 }
 0xd3c   : > { %4217 = vst.msk [vmem:[#allocation5 + $0x78] sm:$0xff] %vm797_vm5, %v4201_v43  ;;  %5515 = vset.pattern.permute.xlu1 %v5623_v24  ;;  %v4223_v24 = vld [vmem:[#allocation5 + $0x28] sm:$0xff] }
 0xd3d   : > { %4371 = vperm.xlu2 %5514, %v7854_v21   ;;  %4359 = vperm.xlu1 %5515, %v7843_v47  }
 0xd40   : > { %v4248_v13 = vpop.permute.xlu1 %4247  ;;  %v4380_v27 = vpop.permute.xlu2 %4379 }
 0xd41   : > { %v4301_v12 = vmul.f32 %v4248_v13, %v4221_v17  ;;  %v4244_v61 = vpop.permute.xlu0 %4243  ;;  %v4339_v3 = vld [vmem:[#allocation5 + $0x48] sm:$0xff] }
 0xd42   : > { %v4300_v2 = vmul.f32 %v4244_v61, %v4220_v22  ;;  %v4330_v40 = vld [vmem:[#allocation5] sm:$0xff] }
 0xd43   : > { %4317 = vst.msk [vmem:[#allocation5 + $0x18] sm:$0xff] %vm2349_vm9, %v4301_v12  ;;  %v4233_v63 = vld [vmem:[#allocation5 + $0x78] sm:$0xff] }
 0xd44   : > { %4316 = vst.msk [vmem:[#allocation5 + $0x10] sm:$0xff] %vm2349_vm9, %v4300_v2  ;;  %v4331_v2 = vld [vmem:[#allocation5 + $0x8] sm:$0xff] }
 0xd45   : > { %5517 = vset.pattern.permute.xlu2 %v5624_v31  ;;  %5516 = vset.pattern.permute.xlu1 %v5624_v31  ;;  %v4230_v31 = vld [vmem:[#allocation5 + $0x60] sm:$0xff] }
 0xd46   : > { %4503 = vperm.xlu2 %5517, %v7859_v18   ;;  %4499 = vperm.xlu1 %5516, %v7861_v42  }
 0xd48   : > { %v4256_v59 = vpop.permute.xlu1 %4255  ;;  %v4400_v34 = vpop.permute.xlu2 %4399 }
 0xd49   : > { %v4303_v62 = vmul.f32 %v4256_v59, %v4223_v24  ;;  %v4264_v48 = vpop.permute.xlu0 %4263 }
 0xd4a   : > { %v4305_v1 = vmul.f32 %v4264_v48, %v4225_v37 }
 0xd4b   : > { %4319 = vst.msk [vmem:[#allocation5 + $0x28] sm:$0xff] %vm2349_vm9, %v4303_v62 }
 0xd4c   : > { %4321 = vst.msk [vmem:[#allocation5 + $0x38] sm:$0xff] %vm2349_vm9, %v4305_v1 }
 0xd4e   : > { %4519 = vperm.xlu2 %5517, %v7877_v55   ;;  %4515 = vperm.xlu1 %5516, %v7868_v19   ;;  %v4231_v19 = vld [vmem:[#allocation5 + $0x68] sm:$0xff] }
 0xd50   : > { %v4268_v18 = vpop.permute.xlu1 %4267 }
 0xd51   : > { %v4306_v46 = vmul.f32 %v4268_v18, %v4226_v4  ;;  %v4284_v42 = vpop.permute.xlu0 %4283  ;;  %v4280_v16 = vpop.permute.xlu2 %4279 }
 0xd52   : > { %v4310_v56 = vmul.f32 %v4284_v42, %v4230_v31  ;;  %v4309_v11 = vmul.f32 %v4280_v16, %v4229_v15  ;;  %v4335_v7 = vld [vmem:[#allocation5 + $0x28] sm:$0xff] }
 0xd53   : > { %4322 = vst.msk [vmem:[#allocation5 + $0x40] sm:$0xff] %vm2349_vm9, %v4306_v46 }
 0xd54   : > { %4326 = vst.msk [vmem:[#allocation5 + $0x60] sm:$0xff] %vm2349_vm9, %v4310_v56  ;;  %v4337_v56 = vld [vmem:[#allocation5 + $0x38] sm:$0xff] }
 0xd55   : > { %4325 = vst.msk [vmem:[#allocation5 + $0x58] sm:$0xff] %vm2349_vm9, %v4309_v11 }
 0xd56   : > { %4483 = vperm.xlu2 %5517, %v7854_v21   ;;  %4471 = vperm.xlu1 %5516, %v7843_v47   ;;  %v5087_v47 = vld [vmem:[%s8089_s4 + $0x18] sm:$0xff] }
 0xd57   : > { %5124 = vmatpush.bf16.msra.mxu2 %v5087_v47  ;;  %5125 = vmatpush.bf16.msra.mxu3 %v5087_v47 }
 0xd58   : > { %v4288_v55 = vpop.permute.xlu1 %4287  ;;  %4642 = vmatpush.bf16.msra.mxu0 %v5087_v47  ;;  %5123 = vmatpush.bf16.msra.mxu1 %v5087_v47 }
 0xd59   : > { %v4311_v35 = vmul.f32 %v4288_v55, %v4231_v19  ;;  %v4292_v52 = vpop.permute.xlu0 %4291 }
 0xd5a   : > { %v4312_v6 = vmul.f32 %v4292_v52, %v4232_v33  ;;  %v4348_v5 = vpop.permute.xlu2 %4347  ;;  %v4338_v9 = vld [vmem:[#allocation5 + $0x40] sm:$0xff] }
 0xd5b   : > { %4327 = vst.msk [vmem:[#allocation5 + $0x68] sm:$0xff] %vm2349_vm9, %v4311_v35  ;;  %v4410_v60 = vmul.f32 %v4348_v5, %v4330_v40  ;;  %v4418_v14 = vmul.f32 %v4380_v27, %v4338_v9  ;;  %v4342_v49 = vld [vmem:[#allocation5 + $0x60] sm:$0xff]  ;;  %v4332_v40 = vld [vmem:[#allocation5 + $0x10] sm:$0xff] }
 0xd5c   : > { %4328 = vst.msk [vmem:[#allocation5 + $0x70] sm:$0xff] %vm2349_vm9, %v4312_v6 }
 0xd5d   : > { %4426 = vst.msk [vmem:[#allocation5] sm:$0xff] %vm3185_vm12, %v4410_v60 }
 0xd5e   : > { %4487 = vperm.xlu1 %5516, %v7852_v44   ;;  %4434 = vst.msk [vmem:[#allocation5 + $0x40] sm:$0xff] %vm3185_vm12, %v4418_v14  ;;  %v5086_v44 = vld [vmem:[%s8089_s4 + $0x10] sm:$0xff]  ;;  %v4341_v14 = vld [vmem:[#allocation5 + $0x58] sm:$0xff] }
 0xd5f   : > { %5127 = vmatpush.bf16.msra.mxu2 %v5086_v44  ;;  %5128 = vmatpush.bf16.msra.mxu3 %v5086_v44 }
 0xd60   : > { %4643 = vmatpush.bf16.msra.mxu0 %v5086_v44  ;;  %5126 = vmatpush.bf16.msra.mxu1 %v5086_v44 }
 0xd61   : > { %v4396_v21 = vpop.permute.xlu1 %4395 }
 0xd62   : > { %v4422_v25 = vmul.f32 %v4396_v21, %v4342_v49  ;;  %v4476_v39 = vpop.permute.xlu0 %4475  ;;  %v4364_v57 = vpop.permute.xlu2 %4363  ;;  %v4343_v26 = vld [vmem:[#allocation5 + $0x68] sm:$0xff] }
 0xd63   : > { %v4414_v32 = vmul.f32 %v4364_v57, %v4334_v23  ;;  %v4423_v30 = vmul.f32 %v4400_v34, %v4343_v26  ;;  %5130 = vmatpush.bf16.msra.mxu2 %v5085_v8  ;;  %5131 = vmatpush.bf16.msra.mxu3 %v5085_v8  ;;  %v4344_v62 = vld [vmem:[#allocation5 + $0x70] sm:$0xff] }
 0xd64   : > { %4438 = vst.msk [vmem:[#allocation5 + $0x60] sm:$0xff] %vm3185_vm12, %v4422_v25  ;;  %4644 = vmatpush.bf16.msra.mxu0 %v5085_v8  ;;  %5129 = vmatpush.bf16.msra.mxu1 %v5085_v8  ;;  %v4336_v23 = vld [vmem:[#allocation5 + $0x30] sm:$0xff] }
 0xd65   : > { %4430 = vst.msk [vmem:[#allocation5 + $0x20] sm:$0xff] %vm3185_vm12, %v4414_v32  ;;  %v4450_v4 = vld [vmem:[#allocation5 + $0x40] sm:$0xff] }
 0xd66   : > { %4439 = vst.msk [vmem:[#allocation5 + $0x68] sm:$0xff] %vm3185_vm12, %v4423_v30 }
 0xd67   : > { %5133 = vmatpush.bf16.msra.mxu2 %v5084_v20  ;;  %5134 = vmatpush.bf16.msra.mxu3 %v5084_v20 }
 0xd68   : > { %4645 = vmatpush.bf16.msra.mxu0 %v5084_v20  ;;  %5132 = vmatpush.bf16.msra.mxu1 %v5084_v20 }
 0xd6a   : > { %v4276_v10 = vpop.permute.xlu1 %4275 }
 0xd6b   : > { %v4308_v51 = vmul.f32 %v4276_v10, %v4228_v36  ;;  %v4384_v50 = vpop.permute.xlu0 %4383  ;;  %v4454_v35 = vld [vmem:[#allocation5 + $0x60] sm:$0xff] }
 0xd6c   : > { %v4446_v53 = vld [vmem:[#allocation5 + $0x20] sm:$0xff]  ;;  %v4419_v45 = vmul.f32 %v4384_v50, %v4339_v3  ;;  %v4496_v28 = vpop.permute.xlu2 %4495 }
 0xd6d   : > { %v4526_v29 = vmul.f32 %v4476_v39, %v4446_v53  ;;  %4324 = vst.msk [vmem:[#allocation5 + $0x50] sm:$0xff] %vm2349_vm9, %v4308_v51  ;;  %v4455_v43 = vld [vmem:[#allocation5 + $0x68] sm:$0xff]  ;;  %v4442_v36 = vld [vmem:[#allocation5] sm:$0xff] }
 0xd6e   : > { %4435 = vst.msk [vmem:[#allocation5 + $0x48] sm:$0xff] %vm3185_vm12, %v4419_v45 }
 0xd6f   : > { %4542 = vst.msk [vmem:[#allocation5 + $0x20] sm:$0xff] %vm4021_vm13, %v4526_v29 }
 0xd72   : > { %v4296_v38 = vpop.permute.xlu1 %4295 }
 0xd73   : > { %v4313_v41 = vmul.f32 %v4296_v38, %v4233_v63  ;;  %v4368_v0 = vpop.permute.xlu0 %4367 }
 0xd74   : > { %v4415_v54 = vmul.f32 %v4368_v0, %v4335_v7  ;;  %v4512_v58 = vpop.permute.xlu2 %4511  ;;  %v4340_v12 = vld [vmem:[#allocation5 + $0x50] sm:$0xff]  ;;  %v4333_v0 = vld [vmem:[#allocation5 + $0x18] sm:$0xff] }
 0xd75   : > { %v4451_v17 = vld [vmem:[#allocation5 + $0x48] sm:$0xff]  ;;  %4329 = vst.msk [vmem:[#allocation5 + $0x78] sm:$0xff] %vm2349_vm9, %v4313_v41  ;;  %v4535_v13 = vmul.f32 %v4512_v58, %v4455_v43 }
 0xd76   : > { %v4531_v27 = vmul.f32 %v4496_v28, %v4451_v17  ;;  %4431 = vst.msk [vmem:[#allocation5 + $0x28] sm:$0xff] %vm3185_vm12, %v4415_v54 }
 0xd77   : > { %4551 = vst.msk [vmem:[#allocation5 + $0x68] sm:$0xff] %vm4021_vm13, %v4535_v13  ;;  %v4558_v13 = vld [vmem:[#allocation5 + $0x20] sm:$0xff] }
 0xd78   : > { %4547 = vst.msk [vmem:[#allocation5 + $0x48] sm:$0xff] %vm4021_vm13, %v4531_v27 }
 0xd7b   : > { %v4388_v22 = vpop.permute.xlu0 %4387  ;;  %v4352_v61 = vpop.permute.xlu1 %4351 }
 0xd7c   : > { %v4420_v24 = vmul.f32 %v4388_v22, %v4340_v12  ;;  %v4411_v59 = vmul.f32 %v4352_v61, %v4331_v2  ;;  %v4345_v48 = vld [vmem:[#allocation5 + $0x78] sm:$0xff] }
 0xd7d   : > { %v4404_v34 = vpop.permute.xlu2 %4403  ;;  %v4447_v45 = vld [vmem:[#allocation5 + $0x28] sm:$0xff] }
 0xd7e   : > { %4436 = vst.msk [vmem:[#allocation5 + $0x50] sm:$0xff] %vm3185_vm12, %v4420_v24  ;;  %v4424_v37 = vmul.f32 %v4404_v34, %v4344_v62  ;;  %v4567_v25 = vld [vmem:[#allocation5 + $0x68] sm:$0xff] }
 0xd7f   : > { %4427 = vst.msk [vmem:[#allocation5 + $0x8] sm:$0xff] %vm3185_vm12, %v4411_v59  ;;  %v4563_v6 = vld [vmem:[#allocation5 + $0x48] sm:$0xff] }
 0xd80   : > { %4440 = vst.msk [vmem:[#allocation5 + $0x70] sm:$0xff] %vm3185_vm12, %v4424_v37 }
 0xd83   : > { %v4408_v1 = vpop.permute.xlu0 %4407 }
 0xd84   : > { %v4425_v31 = vmul.f32 %v4408_v1, %v4345_v48  ;;  %v4492_v18 = vpop.permute.xlu1 %4491 }
 0xd85   : > { %v4530_v46 = vmul.f32 %v4492_v18, %v4450_v4  ;;  %v4452_v2 = vld [vmem:[#allocation5 + $0x50] sm:$0xff] }
 0xd86   : > { %4441 = vst.msk [vmem:[#allocation5 + $0x78] sm:$0xff] %vm3185_vm12, %v4425_v31  ;;  %v4464_v42 = vpop.permute.xlu2 %4463  ;;  %v4443_v15 = vld [vmem:[#allocation5 + $0x8] sm:$0xff] }
 0xd87   : > { %4546 = vst.msk [vmem:[#allocation5 + $0x40] sm:$0xff] %vm4021_vm13, %v4530_v46  ;;  %v4523_v16 = vmul.f32 %v4464_v42, %v4443_v15  ;;  %v4456_v34 = vld [vmem:[#allocation5 + $0x70] sm:$0xff] }
 0xd89   : > { %4539 = vst.msk [vmem:[#allocation5 + $0x8] sm:$0xff] %vm4021_vm13, %v4523_v16 }
 0xd8b   : > { %v4376_v11 = vpop.permute.xlu0 %4375 }
 0xd8c   : > { %v4417_v19 = vmul.f32 %v4376_v11, %v4337_v56  ;;  %v4508_v55 = vpop.permute.xlu1 %4507 }
 0xd8d   : > { %v4534_v33 = vmul.f32 %v4508_v55, %v4454_v35  ;;  %v4457_v20 = vld [vmem:[#allocation5 + $0x78] sm:$0xff] }
 0xd8e   : > { %4433 = vst.msk [vmem:[#allocation5 + $0x38] sm:$0xff] %vm3185_vm12, %v4417_v19  ;;  %v4562_v52 = vld [vmem:[#allocation5 + $0x40] sm:$0xff] }
 0xd8f   : > { %4550 = vst.msk [vmem:[#allocation5 + $0x60] sm:$0xff] %vm4021_vm13, %v4534_v33  ;;  %v4356_v5 = vpop.permute.xlu2 %4355  ;;  %v4574_v9 = vpack.c.bf16 %v4563_v6, %v4562_v52 }
 0xd90   : > { %v4412_v60 = vmul.f32 %v4356_v5, %v4332_v40  ;;  %v4555_v63 = vld [vmem:[#allocation5 + $0x8] sm:$0xff]  ;;  %v5519_v5 = vld [vmem:[%s8090_s5] ss:$0 sm:$0xff] }
 0xd91   : > { %5050 = vmatmul.msk.bf16.vlgmr.msra.gmra.mxu2 %vm899_vm6, %v4574_v9 }
 0xd92   : > { %4428 = vst.msk [vmem:[#allocation5 + $0x10] sm:$0xff] %vm3185_vm12, %v4412_v60 }
 0xd95   : > { %v4392_v47 = vpop.permute.xlu1 %4391  ;;  %v4449_v56 = vld [vmem:[#allocation5 + $0x38] sm:$0xff] }
 0xd96   : > { %v4421_v21 = vmul.f32 %v4392_v47, %v4341_v14  ;;  %v4566_v49 = vld [vmem:[#allocation5 + $0x60] sm:$0xff]  ;;  %v4468_v26 = vpop.permute.xlu0 %4467 }
 0xd97   : > { %v4372_v39 = vpop.permute.xlu2 %4371  ;;  %v4576_v57 = vpack.c.bf16 %v4567_v25, %v4566_v49 }
 0xd98   : > { %4437 = vst.msk [vmem:[#allocation5 + $0x58] sm:$0xff] %vm3185_vm12, %v4421_v21  ;;  %v4416_v32 = vmul.f32 %v4372_v39, %v4336_v23 }
 0xd99   : > { %5052 = vmatmul.msk.bf16.vlgmr.msra.gmra.mxu3 %vm899_vm6, %v4576_v57  ;;  %v4444_v30 = vld [vmem:[#allocation5 + $0x10] sm:$0xff] }
 0xd9a   : > { %4432 = vst.msk [vmem:[#allocation5 + $0x30] sm:$0xff] %vm3185_vm12, %v4416_v32  ;;  %v4524_v44 = vmul.f32 %v4468_v26, %v4444_v30 }
 0xd9c   : > { %4540 = vst.msk [vmem:[#allocation5 + $0x10] sm:$0xff] %vm4021_vm13, %v4524_v44 }
 0xd9e   : > { %v4460_v8 = vpop.permute.xlu1 %4459 }
 0xd9f   : > { %v4522_v10 = vmul.f32 %v4460_v8, %v4442_v36  ;;  %v4453_v51 = vld [vmem:[#allocation5 + $0x58] sm:$0xff] }
 0xda0   : > { %v4504_v3 = vpop.permute.xlu2 %4503 }
 0xda1   : > { %4538 = vst.msk [vmem:[#allocation5] sm:$0xff] %vm4021_vm13, %v4522_v10  ;;  %v4533_v50 = vmul.f32 %v4504_v3, %v4453_v51  ;;  %v4448_v17 = vld [vmem:[#allocation5 + $0x30] sm:$0xff] }
 0xda3   : > { %4549 = vst.msk [vmem:[#allocation5 + $0x58] sm:$0xff] %vm4021_vm13, %v4533_v50  ;;  %v4556_v19 = vld [vmem:[#allocation5 + $0x10] sm:$0xff] }
 0xda6   : > { %v4480_v53 = vpop.permute.xlu1 %4479 }
 0xda7   : > { %v4527_v28 = vmul.f32 %v4480_v53, %v4447_v45 }
 0xda8   : > { %v4520_v29 = vpop.permute.xlu2 %4519  ;;  %v4554_v38 = vld [vmem:[#allocation5] sm:$0xff] }
 0xda9   : > { %4543 = vst.msk [vmem:[#allocation5 + $0x28] sm:$0xff] %vm4021_vm13, %v4527_v28  ;;  %v4537_v41 = vmul.f32 %v4520_v29, %v4457_v20  ;;  %v4570_v7 = vpack.c.bf16 %v4555_v63, %v4554_v38 }
 0xdaa   : > { %v4565_v48 = vld [vmem:[#allocation5 + $0x58] sm:$0xff] }
 0xdab   : > { %4553 = vst.msk [vmem:[#allocation5 + $0x78] sm:$0xff] %vm4021_vm13, %v4537_v41  ;;  %5046 = vmatmul.msk.bf16.vlgmr.msra.gmra.mxu0 %vm899_vm6, %v4570_v7 }
 0xdaf   : > { %v4360_v54 = vpop.permute.xlu1 %4359 }
 0xdb0   : > { %v4413_v58 = vmul.f32 %v4360_v54, %v4333_v0  ;;  %v4484_v43 = vpop.permute.xlu2 %4483  ;;  %v4559_v27 = vld [vmem:[#allocation5 + $0x28] sm:$0xff] }
 0xdb1   : > { %v4528_v12 = vmul.f32 %v4484_v43, %v4448_v17  ;;  %v4572_v22 = vpack.c.bf16 %v4559_v27, %v4558_v13 }
 0xdb2   : > { %4429 = vst.msk [vmem:[#allocation5 + $0x18] sm:$0xff] %vm3185_vm12, %v4413_v58  ;;  %v4569_v42 = vld [vmem:[#allocation5 + $0x78] sm:$0xff] }
 0xdb3   : > { %4544 = vst.msk [vmem:[#allocation5 + $0x30] sm:$0xff] %vm4021_vm13, %v4528_v12  ;;  %5048 = vmatmul.msk.bf16.vlgmr.msra.gmra.mxu1 %vm899_vm6, %v4572_v22 }
 0xdb8   : > { %v4500_v61 = vpop.permute.xlu1 %4499 }
 0xdb9   : > { %v4532_v24 = vmul.f32 %v4500_v61, %v4452_v2  ;;  %v4445_v31 = vld [vmem:[#allocation5 + $0x18] sm:$0xff] }
 0xdba   : > { %v4560_v33 = vld [vmem:[#allocation5 + $0x30] sm:$0xff] }
 0xdbb   : > { %4548 = vst.msk [vmem:[#allocation5 + $0x50] sm:$0xff] %vm4021_vm13, %v4532_v24 }
 0xdc0   : > { %v4516_v59 = vpop.permute.xlu1 %4515 }
 0xdc1   : > { %v4536_v62 = vmul.f32 %v4516_v59, %v4456_v34 }
 0xdc2   : > { %v4564_v37 = vld [vmem:[#allocation5 + $0x50] sm:$0xff] }
 0xdc3   : > { %4552 = vst.msk [vmem:[#allocation5 + $0x70] sm:$0xff] %vm4021_vm13, %v4536_v62  ;;  %v4575_v1 = vpack.c.bf16 %v4565_v48, %v4564_v37 }
 0xdc5   : > { %5051 = vmatmul.msk.bf16.gmra.mxu2 %vm899_vm6, %v4575_v1 }
 0xdc8   : > { %v4472_v4 = vpop.permute.xlu1 %4471 }
 0xdc9   : > { %v4525_v18 = vmul.f32 %v4472_v4, %v4445_v31 }
 0xdca   : > { %v4568_v46 = vld [vmem:[#allocation5 + $0x70] sm:$0xff] }
 0xdcb   : > { %4541 = vst.msk [vmem:[#allocation5 + $0x18] sm:$0xff] %vm4021_vm13, %v4525_v18  ;;  %v4577_v15 = vpack.c.bf16 %v4569_v42, %v4568_v46 }
 0xdcd   : > { %5053 = vmatmul.msk.bf16.gmra.mxu3 %vm899_vm6, %v4577_v15 }
 0xdd0   : > { %v4488_v16 = vpop.permute.xlu1 %4487 }
 0xdd1   : > { %v4529_v11 = vmul.f32 %v4488_v16, %v4449_v56 }
 0xdd2   : > { %v4557_v55 = vld [vmem:[#allocation5 + $0x18] sm:$0xff] }
 0xdd3   : > { %4545 = vst.msk [vmem:[#allocation5 + $0x38] sm:$0xff] %vm4021_vm13, %v4529_v11  ;;  %v4571_v35 = vpack.c.bf16 %v4557_v55, %v4556_v19 }
 0xdd5   : > { %5047 = vmatmul.msk.bf16.gmra.mxu0 %vm899_vm6, %v4571_v35 }
 0xdda   : > { %v4561_v52 = vld [vmem:[#allocation5 + $0x38] sm:$0xff] }
 0xddb   : > { %v4573_v6 = vpack.c.bf16 %v4561_v52, %v4560_v33 }
 0xddd   : > { %5049 = vmatmul.msk.bf16.gmra.mxu1 %vm899_vm6, %v4573_v6 }
 0xe14   : > { %v4667_v40 = vpop.f32.mrf.mxu2 }
 0xe15   : > { %v4668_v9 = vadd.f32 %v5519_v5, %v4667_v40 }
 0xe17   : > { %4696 = vst.msk [vmem:[%s5716_s17 + $0x40] sm:$0xff] %vm4687_vm14, %v4668_v9 }
 0xe1c   : > { %v4669_v60 = vpop.f32.mrf.mxu2  ;;  %v4677_v14 = vpop.f32.mrf.mxu3 }
 0xe1d   : > { %v4670_v47 = vadd.f32 %v5519_v5, %v4669_v60  ;;  %v4678_v21 = vadd.f32 %v5519_v5, %v4677_v14 }
 0xe1f   : > { %4697 = vst.msk [vmem:[%s5716_s17 + $0x48] sm:$0xff] %vm4687_vm14, %v4670_v47 }
 0xe20   : > { %4700 = vst.msk [vmem:[%s5716_s17 + $0x60] sm:$0xff] %vm4687_vm14, %v4678_v21 }
 0xe24   : > { %v4679_v49 = vpop.f32.mrf.mxu3 }
 0xe25   : > { %v4680_v25 = vadd.f32 %v5519_v5, %v4679_v49 }
 0xe27   : > { %4701 = vst.msk [vmem:[%s5716_s17 + $0x68] sm:$0xff] %vm4687_vm14, %v4680_v25 }
 0xe28   : > { %v4647_v39 = vpop.f32.mrf.mxu0 }
 0xe29   : > { %v4648_v23 = vadd.f32 %v5519_v5, %v4647_v39 }
 0xe2b   : > { %4688 = vst.msk [vmem:[%s5716_s17] sm:$0xff] %vm4687_vm14, %v4648_v23 }
 0xe30   : > { %v4649_v57 = vpop.f32.mrf.mxu0  ;;  %v4657_v26 = vpop.f32.mrf.mxu1 }
 0xe31   : > { %v4650_v32 = vadd.f32 %v5519_v5, %v4649_v57  ;;  %v4658_v30 = vadd.f32 %v5519_v5, %v4657_v26 }
 0xe33   : > { %4689 = vst.msk [vmem:[%s5716_s17 + $0x8] sm:$0xff] %vm4687_vm14, %v4650_v32 }
 0xe34   : > { %4692 = vst.msk [vmem:[%s5716_s17 + $0x20] sm:$0xff] %vm4687_vm14, %v4658_v30 }
 0xe38   : > { %v4659_v44 = vpop.f32.mrf.mxu1 }
 0xe39   : > { %v4660_v8 = vadd.f32 %v5519_v5, %v4659_v44 }
 0xe3b   : > { %4693 = vst.msk [vmem:[%s5716_s17 + $0x28] sm:$0xff] %vm4687_vm14, %v4660_v8 }
 0xe48   : > { %v4672_v36 = vpop.f32.mrf.mxu2 }
 0xe49   : > { %v4673_v10 = vadd.f32 %v5519_v5, %v4672_v36 }
 0xe4b   : > { %4698 = vst.msk [vmem:[%s5716_s17 + $0x50] sm:$0xff] %vm4687_vm14, %v4673_v10 }
 0xe50   : > { %v4674_v51 = vpop.f32.mrf.mxu2  ;;  %v4682_v3 = vpop.f32.mrf.mxu3 }
 0xe51   : > { %v4675_v50 = vadd.f32 %v5519_v5, %v4674_v51  ;;  %v4683_v53 = vadd.f32 %v5519_v5, %v4682_v3 }
 0xe52   : > { %v4652_v45 = vpop.f32.mrf.mxu0 }
 0xe53   : > { %4699 = vst.msk [vmem:[%s5716_s17 + $0x58] sm:$0xff] %vm4687_vm14, %v4675_v50  ;;  %v4653_v28 = vadd.f32 %v5519_v5, %v4652_v45 }
 0xe54   : > { %4702 = vst.msk [vmem:[%s5716_s17 + $0x70] sm:$0xff] %vm4687_vm14, %v4683_v53 }
 0xe55   : > { %4690 = vst.msk [vmem:[%s5716_s17 + $0x10] sm:$0xff] %vm4687_vm14, %v4653_v28 }
 0xe58   : > { %v4684_v29 = vpop.f32.mrf.mxu3 }
 0xe59   : > { %v4685_v20 = vadd.f32 %v5519_v5, %v4684_v29 }
 0xe5a   : > { %v4654_v38 = vpop.f32.mrf.mxu0  ;;  %v4662_v63 = vpop.f32.mrf.mxu1 }
 0xe5b   : > { %4703 = vst.msk [vmem:[%s5716_s17 + $0x78] sm:$0xff] %vm4687_vm14, %v4685_v20  ;;  %v4655_v41 = vadd.f32 %v5519_v5, %v4654_v38  ;;  %v4663_v7 = vadd.f32 %v5519_v5, %v4662_v63 }
 0xe5d   : > { %4691 = vst.msk [vmem:[%s5716_s17 + $0x18] sm:$0xff] %vm4687_vm14, %v4655_v41 }
 0xe5e   : > { %4694 = vst.msk [vmem:[%s5716_s17 + $0x30] sm:$0xff] %vm4687_vm14, %v4663_v7 }
 0xe62   : > { %v4664_v0 = vpop.f32.mrf.mxu1 }
 0xe63   : > { %v4665_v54 = vadd.f32 %v5519_v5, %v4664_v0 }
 0xe65   : > { %4695 = vst.msk [vmem:[%s5716_s17 + $0x38] sm:$0xff] %vm4687_vm14, %v4665_v54 }
 0xe66 PF: > { %s16_s27 = sadd.s32 1, %s5606_s27   ;;  %s8224_s9 = sld [smem:[#allocation7_spill]] }
 0xe67   : > { %p13_p13 = scmp.ge.s32.totalorder %s16_s27, 18   ;;  %s8225_s21 = smov %s5594_s24 }
 0xe68   : > { %s8226_s22 = smov %s5598_s25  ;;  %s8227_s23 = smov %s5602_s26 }
 0xe69   : > { %s8228_s24 = smov %s8232_s28  ;;  %s8229_s25 = smov %s8236_s29 }
 0xe6a   :  { %15 = sbr.rel (!%p13_p13) target bundleno = 4 (0x4), region = 91 }
 0xe6c   : > { %s8230_s26 = smov %s8224_s9 }

</bundles_post_ra>
